<compile_context>
chip_gen: v7x
topology: tpu7x:2x2x1
jax: 0.10.0
libtpu: 0.0.40
codegen_flags: <defaults>
</compile_context>

<pallas_src>
import functools

import jax
import jax.numpy as jnp
from jax import lax
from jax.experimental import pallas as pl
from jax.experimental.pallas import tpu as pltpu

LATENT_DIM = 100
LATENT_PAD = 128                 # 100 -> 128 (one clean lane tile)
IMAGE_SIZE = (1, 28, 28)
IMG_FLAT = 1 * 28 * 28           # 784
OUT_PAD = 896                    # 784 -> 896 = 7 * 128 (lane-dense output)
HIDDENS = (128, 256, 512, 1024)
EPS = 1e-5

# positions of w4 / w5 inside the flat kernel-param list
# [w1,b1,g1,be1, w2,b2,g2,be2, w3,b3,g3,be3, w4,b4,g4,be4, w5,b5]
_W4_IDX = 12
_W5_IDX = 16


def _gelu_exact(x):
    # PyTorch nn.GELU default: 0.5 * x * (1 + erf(x / sqrt(2)))
    return 0.5 * x * (1.0 + lax.erf(x * (1.0 / jnp.sqrt(2.0).astype(x.dtype))))


def _batchnorm_train(x, gamma, beta):
    # BatchNorm1d in training mode: batch mean, biased batch variance.
    mu = jnp.mean(x, axis=0, keepdims=True)
    var = jnp.mean((x - mu) * (x - mu), axis=0, keepdims=True)
    xn = (x - mu) * lax.rsqrt(var + EPS)
    return xn * gamma + beta


def generator_kernel(
    z_ref,
    w1_ref, b1_ref, g1_ref, be1_ref,
    w2_ref, b2_ref, g2_ref, be2_ref,
    w3_ref, b3_ref, g3_ref, be3_ref,
    w4_hbm, b4_ref, g4_ref, be4_ref,
    w5_hbm, b5_ref,
    out_ref,
    w4_vmem, w5_vmem, dma_sems,
):
    # Kick off the two large weight DMAs (bf16: 1 MiB + 1.75 MiB) immediately;
    # layers 1-3 (tiny weights, auto-DMA'd by BlockSpec) compute underneath.
    w4_cp = pltpu.make_async_copy(w4_hbm, w4_vmem, dma_sems.at[0])
    w5_cp = pltpu.make_async_copy(w5_hbm, w5_vmem, dma_sems.at[1])
    w4_cp.start()
    w5_cp.start()

    x = z_ref[...]  # (B, 128) f32

    def block(x, w_f32, b_ref, g_ref, be_ref):
        h = jnp.dot(x, w_f32, preferred_element_type=jnp.float32) + b_ref[...]
        h = _batchnorm_train(h, g_ref[...], be_ref[...])
        return _gelu_exact(h)

    x = block(x, w1_ref[...].astype(jnp.float32), b1_ref, g1_ref, be1_ref)   # (B, 128)
    x = block(x, w2_ref[...].astype(jnp.float32), b2_ref, g2_ref, be2_ref)   # (B, 256)
    x = block(x, w3_ref[...].astype(jnp.float32), b3_ref, g3_ref, be3_ref)   # (B, 512)

    w4_cp.wait()
    x = block(x, w4_vmem[...].astype(jnp.float32), b4_ref, g4_ref, be4_ref)  # (B, 1024)

    w5_cp.wait()
    y = jnp.dot(x, w5_vmem[...].astype(jnp.float32),
                preferred_element_type=jnp.float32) + b5_ref[...]
    out_ref[...] = jax.nn.sigmoid(y)                                         # (B, 896)


def _full_spec(shape):
    # whole-array block in VMEM, no grid -> index_map takes no args
    return pl.BlockSpec(shape, lambda: (0,) * len(shape))


def init_params(key):
    """Deterministic f32 parameters (shapes match the PyTorch module)."""
    dims = (LATENT_DIM,) + HIDDENS + (IMG_FLAT,)
    params = []
    for i in range(len(dims) - 1):
        fan_in, fan_out = dims[i], dims[i + 1]
        key, kw, kb = jax.random.split(key, 3)
        bound = 1.0 / jnp.sqrt(fan_in)
        w = jax.random.uniform(kw, (fan_in, fan_out), jnp.float32, -bound, bound)
        b = jax.random.uniform(kb, (1, fan_out), jnp.float32, -bound, bound)
        params.append(w)
        params.append(b)
        if i < len(dims) - 2:  # BatchNorm after every Linear except the last
            params.append(jnp.ones((1, fan_out), jnp.float32))   # gamma
            params.append(jnp.zeros((1, fan_out), jnp.float32))  # beta
    return params  # [w1,b1,g1,be1, ..., w4,b4,g4,be4, w5,b5]


def prepare_params(params):
    """Pad to lane-dense shapes and cast weight matrices to bf16 for DMA."""
    (w1, b1, g1, be1, w2, b2, g2, be2,
     w3, b3, g3, be3, w4, b4, g4, be4, w5, b5) = params
    # pad w1 rows 100 -> 128 (zero rows; z is zero-padded correspondingly)
    w1p = jnp.zeros((LATENT_PAD, HIDDENS[0]), jnp.float32).at[:LATENT_DIM].set(w1)
    # pad w5 / b5 output columns 784 -> 896 (sliced off in the wrapper)
    w5p = jnp.zeros((HIDDENS[3], OUT_PAD), jnp.float32).at[:, :IMG_FLAT].set(w5)
    b5p = jnp.zeros((1, OUT_PAD), jnp.float32).at[:, :IMG_FLAT].set(b5)
    bf = lambda w: w.astype(jnp.bfloat16)
    return [
        bf(w1p), b1, g1, be1,
        bf(w2),  b2, g2, be2,
        bf(w3),  b3, g3, be3,
        bf(w4),  b4, g4, be4,
        bf(w5p), b5p,
    ]


@jax.jit
def generator_forward(z, kernel_params):
    B = z.shape[0]
    # zero-pad latent 100 -> 128 so the first matmul is a clean full-width tile
    z_pad = jnp.zeros((B, LATENT_PAD), jnp.float32).at[:, :LATENT_DIM].set(
        z.astype(jnp.float32))

    in_specs = [_full_spec((B, LATENT_PAD))]
    for i, p in enumerate(kernel_params):
        if i in (_W4_IDX, _W5_IDX):
            # big weights: keep in HBM, DMA'd manually inside the kernel
            in_specs.append(pl.BlockSpec(memory_space=pl.ANY))
        else:
            in_specs.append(_full_spec(p.shape))

    out = pl.pallas_call(
        generator_kernel,
        out_shape=jax.ShapeDtypeStruct((B, OUT_PAD), jnp.float32),
        in_specs=in_specs,
        out_specs=_full_spec((B, OUT_PAD)),
        scratch_shapes=[
            pltpu.VMEM((HIDDENS[2], HIDDENS[3]), jnp.bfloat16),  # w4 landing buf
            pltpu.VMEM((HIDDENS[3], OUT_PAD), jnp.bfloat16),     # w5 landing buf
            pltpu.SemaphoreType.DMA((2,)),
        ],
        compiler_params=pltpu.CompilerParams(vmem_limit_bytes=32 << 20),
    )(z_pad, *kernel_params)

    # glue: drop output padding, NCHW reshape (matches output.reshape(B,1,28,28))
    return out[:, :IMG_FLAT].reshape(B, *IMAGE_SIZE)


def generator_reference(z, params):
    """Pure-JAX reference using the same bf16-rounded weights as the kernel."""
    (w1, b1, g1, be1, w2, b2, g2, be2,
     w3, b3, g3, be3, w4, b4, g4, be4, w5, b5) = params
    q = lambda w: w.astype(jnp.bfloat16).astype(jnp.float32)
    x = z
    for (w, b, g, be) in ((q(w1), b1, g1, be1), (q(w2), b2, g2, be2),
                          (q(w3), b3, g3, be3), (q(w4), b4, g4, be4)):
        h = x @ w + b
        mu = jnp.mean(h, axis=0, keepdims=True)
        var = jnp.mean((h - mu) ** 2, axis=0, keepdims=True)
        h = (h - mu) / jnp.sqrt(var + EPS) * g + be
        x = 0.5 * h * (1.0 + lax.erf(h / jnp.sqrt(2.0)))
    y = jax.nn.sigmoid(x @ q(w5) + b5)
    return y.reshape(z.shape[0], *IMAGE_SIZE)


if __name__ == "__main__":
    key = jax.random.PRNGKey(0)
    kp, kz = jax.random.split(key)
    params = init_params(kp)
    kernel_params = prepare_params(params)

    B = 8  # small batch (BatchNorm in train mode needs B > 1)
    z = jax.random.normal(kz, (B, LATENT_DIM), jnp.float32)

    img = generator_forward(z, kernel_params)
    jax.block_until_ready(img)

    assert img.shape == (B, 1, 28, 28), img.shape

    ref = generator_reference(z, params)
    max_err = float(jnp.max(jnp.abs(img - ref)))
    assert jnp.allclose(img, ref, atol=1e-4, rtol=1e-5), max_err

    print("KERNEL_OK")
</pallas_src>

<mosaic_0001>
module attributes {stable_mosaic.version = 11 : i64} {
  func.func @generator_kernel(%arg0: memref<8x128xf32, #tpu.memory_space<vmem>>, %arg1: memref<128x128xbf16, #tpu.memory_space<vmem>>, %arg2: memref<1x128xf32, #tpu.memory_space<vmem>>, %arg3: memref<1x128xf32, #tpu.memory_space<vmem>>, %arg4: memref<1x128xf32, #tpu.memory_space<vmem>>, %arg5: memref<128x256xbf16, #tpu.memory_space<vmem>>, %arg6: memref<1x256xf32, #tpu.memory_space<vmem>>, %arg7: memref<1x256xf32, #tpu.memory_space<vmem>>, %arg8: memref<1x256xf32, #tpu.memory_space<vmem>>, %arg9: memref<256x512xbf16, #tpu.memory_space<vmem>>, %arg10: memref<1x512xf32, #tpu.memory_space<vmem>>, %arg11: memref<1x512xf32, #tpu.memory_space<vmem>>, %arg12: memref<1x512xf32, #tpu.memory_space<vmem>>, %arg13: memref<512x1024xbf16, #tpu.memory_space<any>>, %arg14: memref<1x1024xf32, #tpu.memory_space<vmem>>, %arg15: memref<1x1024xf32, #tpu.memory_space<vmem>>, %arg16: memref<1x1024xf32, #tpu.memory_space<vmem>>, %arg17: memref<1024x896xbf16, #tpu.memory_space<any>>, %arg18: memref<1x896xf32, #tpu.memory_space<vmem>>, %arg19: memref<8x896xf32, #tpu.memory_space<vmem>>, %arg20: memref<512x1024xbf16, #tpu.memory_space<vmem>>, %arg21: memref<1024x896xbf16, #tpu.memory_space<vmem>>, %arg22: memref<2x!tpu.dma_semaphore, #tpu.memory_space<semaphore_mem>>) attributes {dimension_semantics = [], scalar_prefetch = 0 : i64, scratch_operands = 3 : i64, tpu.core_type = #tpu.core_type<tc>} {
    %c0_i32 = arith.constant 0 : i32
    %0 = tpu.memref_slice %arg22[%c0_i32] : memref<2x!tpu.dma_semaphore, #tpu.memory_space<semaphore_mem>> -> memref<1x!tpu.dma_semaphore, #tpu.memory_space<semaphore_mem>>
    %1 = tpu.memref_squeeze %0 : memref<1x!tpu.dma_semaphore, #tpu.memory_space<semaphore_mem>> -> memref<!tpu.dma_semaphore, #tpu.memory_space<semaphore_mem>>
    tpu.enqueue_dma source(%arg13 : memref<512x1024xbf16, #tpu.memory_space<any>>) target(%arg20 : memref<512x1024xbf16, #tpu.memory_space<vmem>>) target_semaphore(%1 : memref<!tpu.dma_semaphore, #tpu.memory_space<semaphore_mem>>)
    %c1_i32 = arith.constant 1 : i32
    %2 = tpu.memref_slice %arg22[%c1_i32] : memref<2x!tpu.dma_semaphore, #tpu.memory_space<semaphore_mem>> -> memref<1x!tpu.dma_semaphore, #tpu.memory_space<semaphore_mem>>
    %3 = tpu.memref_squeeze %2 : memref<1x!tpu.dma_semaphore, #tpu.memory_space<semaphore_mem>> -> memref<!tpu.dma_semaphore, #tpu.memory_space<semaphore_mem>>
    tpu.enqueue_dma source(%arg17 : memref<1024x896xbf16, #tpu.memory_space<any>>) target(%arg21 : memref<1024x896xbf16, #tpu.memory_space<vmem>>) target_semaphore(%3 : memref<!tpu.dma_semaphore, #tpu.memory_space<semaphore_mem>>)
    %c0 = arith.constant 0 : index
    %c0_0 = arith.constant 0 : index
    %4 = vector.load %arg0[%c0, %c0_0] : memref<8x128xf32, #tpu.memory_space<vmem>>, vector<8x128xf32>
    %c0_1 = arith.constant 0 : index
    %c0_2 = arith.constant 0 : index
    %5 = vector.load %arg1[%c0_1, %c0_2] : memref<128x128xbf16, #tpu.memory_space<vmem>>, vector<128x128xbf16>
    %6 = arith.extf %5 : vector<128x128xbf16> to vector<128x128xf32>
    %cst = arith.constant dense<0.000000e+00> : vector<8x128xf32>
    %7 = tpu.matmul %4, %6, %cst {dimension_numbers = #tpu.dot_dimension_numbers<[1], [0], [0], [1], [0, 0, 1, 1], [], []>} : vector<8x128xf32>, vector<128x128xf32>, vector<8x128xf32> -> vector<8x128xf32>
    %c0_3 = arith.constant 0 : index
    %c0_4 = arith.constant 0 : index
    %8 = vector.load %arg2[%c0_3, %c0_4] : memref<1x128xf32, #tpu.memory_space<vmem>>, vector<1x128xf32>
    %9 = vector.broadcast %8 : vector<1x128xf32> to vector<8x128xf32>
    %10 = arith.addf %7, %9 : vector<8x128xf32>
    %c0_5 = arith.constant 0 : index
    %c0_6 = arith.constant 0 : index
    %11 = vector.load %arg3[%c0_5, %c0_6] : memref<1x128xf32, #tpu.memory_space<vmem>>, vector<1x128xf32>
    %c0_7 = arith.constant 0 : index
    %c0_8 = arith.constant 0 : index
    %12 = vector.load %arg4[%c0_7, %c0_8] : memref<1x128xf32, #tpu.memory_space<vmem>>, vector<1x128xf32>
    %cst_9 = arith.constant dense<0.000000e+00> : vector<128xf32>
    %13 = vector.multi_reduction <add>, %10, %cst_9 [0] : vector<8x128xf32> to vector<128xf32>
    %14 = vector.shape_cast %13 : vector<128xf32> to vector<1x128xf32>
    %cst_10 = arith.constant 8.000000e+00 : f32
    %15 = vector.broadcast %cst_10 : f32 to vector<1x128xf32>
    %16 = arith.divf %14, %15 : vector<1x128xf32>
    %17 = vector.broadcast %16 : vector<1x128xf32> to vector<8x128xf32>
    %18 = arith.subf %10, %17 : vector<8x128xf32>
    %19 = vector.broadcast %16 : vector<1x128xf32> to vector<8x128xf32>
    %20 = arith.subf %10, %19 : vector<8x128xf32>
    %21 = arith.mulf %18, %20 : vector<8x128xf32>
    %cst_11 = arith.constant dense<0.000000e+00> : vector<128xf32>
    %22 = vector.multi_reduction <add>, %21, %cst_11 [0] : vector<8x128xf32> to vector<128xf32>
    %23 = vector.shape_cast %22 : vector<128xf32> to vector<1x128xf32>
    %cst_12 = arith.constant 8.000000e+00 : f32
    %24 = vector.broadcast %cst_12 : f32 to vector<1x128xf32>
    %25 = arith.divf %23, %24 : vector<1x128xf32>
    %26 = vector.broadcast %16 : vector<1x128xf32> to vector<8x128xf32>
    %27 = arith.subf %10, %26 : vector<8x128xf32>
    %cst_13 = arith.constant 9.99999974E-6 : f32
    %28 = vector.broadcast %cst_13 : f32 to vector<1x128xf32>
    %29 = arith.addf %25, %28 : vector<1x128xf32>
    %30 = math.rsqrt %29 : vector<1x128xf32>
    %31 = vector.broadcast %30 : vector<1x128xf32> to vector<8x128xf32>
    %32 = arith.mulf %27, %31 : vector<8x128xf32>
    %33 = vector.broadcast %11 : vector<1x128xf32> to vector<8x128xf32>
    %34 = arith.mulf %32, %33 : vector<8x128xf32>
    %35 = vector.broadcast %12 : vector<1x128xf32> to vector<8x128xf32>
    %36 = arith.addf %34, %35 : vector<8x128xf32>
    %cst_14 = arith.constant 5.000000e-01 : f32
    %37 = vector.broadcast %cst_14 : f32 to vector<8x128xf32>
    %38 = arith.mulf %37, %36 : vector<8x128xf32>
    %cst_15 = arith.constant 2.000000e+00 : f32
    %39 = math.sqrt %cst_15 : f32
    %cst_16 = arith.constant 1.000000e+00 : f32
    %40 = arith.divf %cst_16, %39 : f32
    %41 = vector.broadcast %40 : f32 to vector<8x128xf32>
    %42 = arith.mulf %36, %41 : vector<8x128xf32>
    %43 = math.erf %42 : vector<8x128xf32>
    %cst_17 = arith.constant 1.000000e+00 : f32
    %44 = vector.broadcast %cst_17 : f32 to vector<8x128xf32>
    %45 = arith.addf %44, %43 : vector<8x128xf32>
    %46 = arith.mulf %38, %45 : vector<8x128xf32>
    %c0_18 = arith.constant 0 : index
    %c0_19 = arith.constant 0 : index
    %47 = vector.load %arg5[%c0_18, %c0_19] : memref<128x256xbf16, #tpu.memory_space<vmem>>, vector<128x256xbf16>
    %48 = arith.extf %47 : vector<128x256xbf16> to vector<128x256xf32>
    %cst_20 = arith.constant dense<0.000000e+00> : vector<8x256xf32>
    %49 = tpu.matmul %46, %48, %cst_20 {dimension_numbers = #tpu.dot_dimension_numbers<[1], [0], [0], [1], [0, 0, 1, 1], [], []>} : vector<8x128xf32>, vector<128x256xf32>, vector<8x256xf32> -> vector<8x256xf32>
    %c0_21 = arith.constant 0 : index
    %c0_22 = arith.constant 0 : index
    %50 = vector.load %arg6[%c0_21, %c0_22] : memref<1x256xf32, #tpu.memory_space<vmem>>, vector<1x256xf32>
    %51 = vector.broadcast %50 : vector<1x256xf32> to vector<8x256xf32>
    %52 = arith.addf %49, %51 : vector<8x256xf32>
    %c0_23 = arith.constant 0 : index
    %c0_24 = arith.constant 0 : index
    %53 = vector.load %arg7[%c0_23, %c0_24] : memref<1x256xf32, #tpu.memory_space<vmem>>, vector<1x256xf32>
    %c0_25 = arith.constant 0 : index
    %c0_26 = arith.constant 0 : index
    %54 = vector.load %arg8[%c0_25, %c0_26] : memref<1x256xf32, #tpu.memory_space<vmem>>, vector<1x256xf32>
    %cst_27 = arith.constant dense<0.000000e+00> : vector<256xf32>
    %55 = vector.multi_reduction <add>, %52, %cst_27 [0] : vector<8x256xf32> to vector<256xf32>
    %56 = vector.shape_cast %55 : vector<256xf32> to vector<1x256xf32>
    %cst_28 = arith.constant 8.000000e+00 : f32
    %57 = vector.broadcast %cst_28 : f32 to vector<1x256xf32>
    %58 = arith.divf %56, %57 : vector<1x256xf32>
    %59 = vector.broadcast %58 : vector<1x256xf32> to vector<8x256xf32>
    %60 = arith.subf %52, %59 : vector<8x256xf32>
    %61 = vector.broadcast %58 : vector<1x256xf32> to vector<8x256xf32>
    %62 = arith.subf %52, %61 : vector<8x256xf32>
    %63 = arith.mulf %60, %62 : vector<8x256xf32>
    %cst_29 = arith.constant dense<0.000000e+00> : vector<256xf32>
    %64 = vector.multi_reduction <add>, %63, %cst_29 [0] : vector<8x256xf32> to vector<256xf32>
    %65 = vector.shape_cast %64 : vector<256xf32> to vector<1x256xf32>
    %cst_30 = arith.constant 8.000000e+00 : f32
    %66 = vector.broadcast %cst_30 : f32 to vector<1x256xf32>
    %67 = arith.divf %65, %66 : vector<1x256xf32>
    %68 = vector.broadcast %58 : vector<1x256xf32> to vector<8x256xf32>
    %69 = arith.subf %52, %68 : vector<8x256xf32>
    %cst_31 = arith.constant 9.99999974E-6 : f32
    %70 = vector.broadcast %cst_31 : f32 to vector<1x256xf32>
    %71 = arith.addf %67, %70 : vector<1x256xf32>
    %72 = math.rsqrt %71 : vector<1x256xf32>
    %73 = vector.broadcast %72 : vector<1x256xf32> to vector<8x256xf32>
    %74 = arith.mulf %69, %73 : vector<8x256xf32>
    %75 = vector.broadcast %53 : vector<1x256xf32> to vector<8x256xf32>
    %76 = arith.mulf %74, %75 : vector<8x256xf32>
    %77 = vector.broadcast %54 : vector<1x256xf32> to vector<8x256xf32>
    %78 = arith.addf %76, %77 : vector<8x256xf32>
    %cst_32 = arith.constant 5.000000e-01 : f32
    %79 = vector.broadcast %cst_32 : f32 to vector<8x256xf32>
    %80 = arith.mulf %79, %78 : vector<8x256xf32>
    %cst_33 = arith.constant 2.000000e+00 : f32
    %81 = math.sqrt %cst_33 : f32
    %cst_34 = arith.constant 1.000000e+00 : f32
    %82 = arith.divf %cst_34, %81 : f32
    %83 = vector.broadcast %82 : f32 to vector<8x256xf32>
    %84 = arith.mulf %78, %83 : vector<8x256xf32>
    %85 = math.erf %84 : vector<8x256xf32>
    %cst_35 = arith.constant 1.000000e+00 : f32
    %86 = vector.broadcast %cst_35 : f32 to vector<8x256xf32>
    %87 = arith.addf %86, %85 : vector<8x256xf32>
    %88 = arith.mulf %80, %87 : vector<8x256xf32>
    %c0_36 = arith.constant 0 : index
    %c0_37 = arith.constant 0 : index
    %89 = vector.load %arg9[%c0_36, %c0_37] : memref<256x512xbf16, #tpu.memory_space<vmem>>, vector<256x512xbf16>
    %90 = arith.extf %89 : vector<256x512xbf16> to vector<256x512xf32>
    %cst_38 = arith.constant dense<0.000000e+00> : vector<8x512xf32>
    %91 = tpu.matmul %88, %90, %cst_38 {dimension_numbers = #tpu.dot_dimension_numbers<[1], [0], [0], [1], [0, 0, 1, 1], [], []>} : vector<8x256xf32>, vector<256x512xf32>, vector<8x512xf32> -> vector<8x512xf32>
    %c0_39 = arith.constant 0 : index
    %c0_40 = arith.constant 0 : index
    %92 = vector.load %arg10[%c0_39, %c0_40] : memref<1x512xf32, #tpu.memory_space<vmem>>, vector<1x512xf32>
    %93 = vector.broadcast %92 : vector<1x512xf32> to vector<8x512xf32>
    %94 = arith.addf %91, %93 : vector<8x512xf32>
    %c0_41 = arith.constant 0 : index
    %c0_42 = arith.constant 0 : index
    %95 = vector.load %arg11[%c0_41, %c0_42] : memref<1x512xf32, #tpu.memory_space<vmem>>, vector<1x512xf32>
    %c0_43 = arith.constant 0 : index
    %c0_44 = arith.constant 0 : index
    %96 = vector.load %arg12[%c0_43, %c0_44] : memref<1x512xf32, #tpu.memory_space<vmem>>, vector<1x512xf32>
    %cst_45 = arith.constant dense<0.000000e+00> : vector<512xf32>
    %97 = vector.multi_reduction <add>, %94, %cst_45 [0] : vector<8x512xf32> to vector<512xf32>
    %98 = vector.shape_cast %97 : vector<512xf32> to vector<1x512xf32>
    %cst_46 = arith.constant 8.000000e+00 : f32
    %99 = vector.broadcast %cst_46 : f32 to vector<1x512xf32>
    %100 = arith.divf %98, %99 : vector<1x512xf32>
    %101 = vector.broadcast %100 : vector<1x512xf32> to vector<8x512xf32>
    %102 = arith.subf %94, %101 : vector<8x512xf32>
    %103 = vector.broadcast %100 : vector<1x512xf32> to vector<8x512xf32>
    %104 = arith.subf %94, %103 : vector<8x512xf32>
    %105 = arith.mulf %102, %104 : vector<8x512xf32>
    %cst_47 = arith.constant dense<0.000000e+00> : vector<512xf32>
    %106 = vector.multi_reduction <add>, %105, %cst_47 [0] : vector<8x512xf32> to vector<512xf32>
    %107 = vector.shape_cast %106 : vector<512xf32> to vector<1x512xf32>
    %cst_48 = arith.constant 8.000000e+00 : f32
    %108 = vector.broadcast %cst_48 : f32 to vector<1x512xf32>
    %109 = arith.divf %107, %108 : vector<1x512xf32>
    %110 = vector.broadcast %100 : vector<1x512xf32> to vector<8x512xf32>
    %111 = arith.subf %94, %110 : vector<8x512xf32>
    %cst_49 = arith.constant 9.99999974E-6 : f32
    %112 = vector.broadcast %cst_49 : f32 to vector<1x512xf32>
    %113 = arith.addf %109, %112 : vector<1x512xf32>
    %114 = math.rsqrt %113 : vector<1x512xf32>
    %115 = vector.broadcast %114 : vector<1x512xf32> to vector<8x512xf32>
    %116 = arith.mulf %111, %115 : vector<8x512xf32>
    %117 = vector.broadcast %95 : vector<1x512xf32> to vector<8x512xf32>
    %118 = arith.mulf %116, %117 : vector<8x512xf32>
    %119 = vector.broadcast %96 : vector<1x512xf32> to vector<8x512xf32>
    %120 = arith.addf %118, %119 : vector<8x512xf32>
    %cst_50 = arith.constant 5.000000e-01 : f32
    %121 = vector.broadcast %cst_50 : f32 to vector<8x512xf32>
    %122 = arith.mulf %121, %120 : vector<8x512xf32>
    %cst_51 = arith.constant 2.000000e+00 : f32
    %123 = math.sqrt %cst_51 : f32
    %cst_52 = arith.constant 1.000000e+00 : f32
    %124 = arith.divf %cst_52, %123 : f32
    %125 = vector.broadcast %124 : f32 to vector<8x512xf32>
    %126 = arith.mulf %120, %125 : vector<8x512xf32>
    %127 = math.erf %126 : vector<8x512xf32>
    %cst_53 = arith.constant 1.000000e+00 : f32
    %128 = vector.broadcast %cst_53 : f32 to vector<8x512xf32>
    %129 = arith.addf %128, %127 : vector<8x512xf32>
    %130 = arith.mulf %122, %129 : vector<8x512xf32>
    %c0_i32_54 = arith.constant 0 : i32
    %131 = tpu.memref_slice %arg22[%c0_i32_54] : memref<2x!tpu.dma_semaphore, #tpu.memory_space<semaphore_mem>> -> memref<1x!tpu.dma_semaphore, #tpu.memory_space<semaphore_mem>>
    %132 = tpu.memref_squeeze %131 : memref<1x!tpu.dma_semaphore, #tpu.memory_space<semaphore_mem>> -> memref<!tpu.dma_semaphore, #tpu.memory_space<semaphore_mem>>
    tpu.wait_dma2 semaphore(%132 : memref<!tpu.dma_semaphore, #tpu.memory_space<semaphore_mem>>) src(%arg13 : memref<512x1024xbf16, #tpu.memory_space<any>>) dst(%arg20 : memref<512x1024xbf16, #tpu.memory_space<vmem>>)
    %c0_55 = arith.constant 0 : index
    %c0_56 = arith.constant 0 : index
    %133 = vector.load %arg20[%c0_55, %c0_56] : memref<512x1024xbf16, #tpu.memory_space<vmem>>, vector<512x1024xbf16>
    %134 = arith.extf %133 : vector<512x1024xbf16> to vector<512x1024xf32>
    %cst_57 = arith.constant dense<0.000000e+00> : vector<8x1024xf32>
    %135 = tpu.matmul %130, %134, %cst_57 {dimension_numbers = #tpu.dot_dimension_numbers<[1], [0], [0], [1], [0, 0, 1, 1], [], []>} : vector<8x512xf32>, vector<512x1024xf32>, vector<8x1024xf32> -> vector<8x1024xf32>
    %c0_58 = arith.constant 0 : index
    %c0_59 = arith.constant 0 : index
    %136 = vector.load %arg14[%c0_58, %c0_59] : memref<1x1024xf32, #tpu.memory_space<vmem>>, vector<1x1024xf32>
    %137 = vector.broadcast %136 : vector<1x1024xf32> to vector<8x1024xf32>
    %138 = arith.addf %135, %137 : vector<8x1024xf32>
    %c0_60 = arith.constant 0 : index
    %c0_61 = arith.constant 0 : index
    %139 = vector.load %arg15[%c0_60, %c0_61] : memref<1x1024xf32, #tpu.memory_space<vmem>>, vector<1x1024xf32>
    %c0_62 = arith.constant 0 : index
    %c0_63 = arith.constant 0 : index
    %140 = vector.load %arg16[%c0_62, %c0_63] : memref<1x1024xf32, #tpu.memory_space<vmem>>, vector<1x1024xf32>
    %cst_64 = arith.constant dense<0.000000e+00> : vector<1024xf32>
    %141 = vector.multi_reduction <add>, %138, %cst_64 [0] : vector<8x1024xf32> to vector<1024xf32>
    %142 = vector.shape_cast %141 : vector<1024xf32> to vector<1x1024xf32>
    %cst_65 = arith.constant 8.000000e+00 : f32
    %143 = vector.broadcast %cst_65 : f32 to vector<1x1024xf32>
    %144 = arith.divf %142, %143 : vector<1x1024xf32>
    %145 = vector.broadcast %144 : vector<1x1024xf32> to vector<8x1024xf32>
    %146 = arith.subf %138, %145 : vector<8x1024xf32>
    %147 = vector.broadcast %144 : vector<1x1024xf32> to vector<8x1024xf32>
    %148 = arith.subf %138, %147 : vector<8x1024xf32>
    %149 = arith.mulf %146, %148 : vector<8x1024xf32>
    %cst_66 = arith.constant dense<0.000000e+00> : vector<1024xf32>
    %150 = vector.multi_reduction <add>, %149, %cst_66 [0] : vector<8x1024xf32> to vector<1024xf32>
    %151 = vector.shape_cast %150 : vector<1024xf32> to vector<1x1024xf32>
    %cst_67 = arith.constant 8.000000e+00 : f32
    %152 = vector.broadcast %cst_67 : f32 to vector<1x1024xf32>
    %153 = arith.divf %151, %152 : vector<1x1024xf32>
    %154 = vector.broadcast %144 : vector<1x1024xf32> to vector<8x1024xf32>
    %155 = arith.subf %138, %154 : vector<8x1024xf32>
    %cst_68 = arith.constant 9.99999974E-6 : f32
    %156 = vector.broadcast %cst_68 : f32 to vector<1x1024xf32>
    %157 = arith.addf %153, %156 : vector<1x1024xf32>
    %158 = math.rsqrt %157 : vector<1x1024xf32>
    %159 = vector.broadcast %158 : vector<1x1024xf32> to vector<8x1024xf32>
    %160 = arith.mulf %155, %159 : vector<8x1024xf32>
    %161 = vector.broadcast %139 : vector<1x1024xf32> to vector<8x1024xf32>
    %162 = arith.mulf %160, %161 : vector<8x1024xf32>
    %163 = vector.broadcast %140 : vector<1x1024xf32> to vector<8x1024xf32>
    %164 = arith.addf %162, %163 : vector<8x1024xf32>
    %cst_69 = arith.constant 5.000000e-01 : f32
    %165 = vector.broadcast %cst_69 : f32 to vector<8x1024xf32>
    %166 = arith.mulf %165, %164 : vector<8x1024xf32>
    %cst_70 = arith.constant 2.000000e+00 : f32
    %167 = math.sqrt %cst_70 : f32
    %cst_71 = arith.constant 1.000000e+00 : f32
    %168 = arith.divf %cst_71, %167 : f32
    %169 = vector.broadcast %168 : f32 to vector<8x1024xf32>
    %170 = arith.mulf %164, %169 : vector<8x1024xf32>
    %171 = math.erf %170 : vector<8x1024xf32>
    %cst_72 = arith.constant 1.000000e+00 : f32
    %172 = vector.broadcast %cst_72 : f32 to vector<8x1024xf32>
    %173 = arith.addf %172, %171 : vector<8x1024xf32>
    %174 = arith.mulf %166, %173 : vector<8x1024xf32>
    %c1_i32_73 = arith.constant 1 : i32
    %175 = tpu.memref_slice %arg22[%c1_i32_73] : memref<2x!tpu.dma_semaphore, #tpu.memory_space<semaphore_mem>> -> memref<1x!tpu.dma_semaphore, #tpu.memory_space<semaphore_mem>>
    %176 = tpu.memref_squeeze %175 : memref<1x!tpu.dma_semaphore, #tpu.memory_space<semaphore_mem>> -> memref<!tpu.dma_semaphore, #tpu.memory_space<semaphore_mem>>
    tpu.wait_dma2 semaphore(%176 : memref<!tpu.dma_semaphore, #tpu.memory_space<semaphore_mem>>) src(%arg17 : memref<1024x896xbf16, #tpu.memory_space<any>>) dst(%arg21 : memref<1024x896xbf16, #tpu.memory_space<vmem>>)
    %c0_74 = arith.constant 0 : index
    %c0_75 = arith.constant 0 : index
    %177 = vector.load %arg21[%c0_74, %c0_75] : memref<1024x896xbf16, #tpu.memory_space<vmem>>, vector<1024x896xbf16>
    %178 = arith.extf %177 : vector<1024x896xbf16> to vector<1024x896xf32>
    %cst_76 = arith.constant dense<0.000000e+00> : vector<8x896xf32>
    %179 = tpu.matmul %174, %178, %cst_76 {dimension_numbers = #tpu.dot_dimension_numbers<[1], [0], [0], [1], [0, 0, 1, 1], [], []>} : vector<8x1024xf32>, vector<1024x896xf32>, vector<8x896xf32> -> vector<8x896xf32>
    %c0_77 = arith.constant 0 : index
    %c0_78 = arith.constant 0 : index
    %180 = vector.load %arg18[%c0_77, %c0_78] : memref<1x896xf32, #tpu.memory_space<vmem>>, vector<1x896xf32>
    %181 = vector.broadcast %180 : vector<1x896xf32> to vector<8x896xf32>
    %182 = arith.addf %179, %181 : vector<8x896xf32>
    %183 = arith.negf %182 : vector<8x896xf32>
    %184 = math.exp %183 : vector<8x896xf32>
    %cst_79 = arith.constant 1.000000e+00 : f32
    %185 = vector.broadcast %cst_79 : f32 to vector<8x896xf32>
    %186 = arith.addf %185, %184 : vector<8x896xf32>
    %187 = arith.divf %185, %186 : vector<8x896xf32>
    %c0_80 = arith.constant 0 : index
    %c0_81 = arith.constant 0 : index
    %188 = vector.load %arg19[%c0_80, %c0_81] : memref<8x896xf32, #tpu.memory_space<vmem>>, vector<8x896xf32>
    tpu.vector_store %arg19[%c0_80, %c0_81], %187 {strides = array<i32>} : memref<8x896xf32, #tpu.memory_space<vmem>>, vector<8x896xf32>,
    return
  }
}

</mosaic_0001>

<bundles_post_ra>
// kernel: generator_forward.1
= control target key start
LH: loop header
LB: loop body
LE: loop exit
PB: predicated region body
PF: predicated region fallthrough
CT: control target
= control target key end

     0   :  { %s8628_s0 = inlined_call_operand.vmem [shape: f32[8,128], index: 0, kind: input, shape index: {}]   ;;  %s8629_s1 = inlined_call_operand.hbm [shape: bf16[128,128], index: 1, kind: input, shape index: {}]   ;;  %s8630_s2 = inlined_call_operand.hbm [shape: f32[1,128], index: 2, kind: input, shape index: {}]   ;;  %s8631_s3 = inlined_call_operand.hbm [shape: f32[1,128], index: 3, kind: input, shape index: {}]   ;;  %s8632_s4 = inlined_call_operand.hbm [shape: f32[1,128], index: 4, kind: input, shape index: {}]   ;;  %s8633_s5 = inlined_call_operand.hbm [shape: bf16[128,256], index: 5, kind: input, shape index: {}]   ;;  %s8634_s6 = inlined_call_operand.hbm [shape: f32[1,256], index: 6, kind: input, shape index: {}]   ;;  %s8635_s7 = inlined_call_operand.hbm [shape: f32[1,256], index: 7, kind: input, shape index: {}]   ;;  %s8636_s8 = inlined_call_operand.hbm [shape: f32[1,256], index: 8, kind: input, shape index: {}]   ;;  %s8637_s9 = inlined_call_operand.hbm [shape: bf16[256,512], index: 9, kind: input, shape index: {}]   ;;  %s8638_s10 = inlined_call_operand.hbm [shape: f32[1,512], index: 10, kind: input, shape index: {}]   ;;  %s8639_s11 = inlined_call_operand.hbm [shape: f32[1,512], index: 11, kind: input, shape index: {}]   ;;  %s8640_s12 = inlined_call_operand.hbm [shape: f32[1,512], index: 12, kind: input, shape index: {}]   ;;  %s8641_s13 = inlined_call_operand.hbm [shape: bf16[512,1024], index: 13, kind: input, shape index: {}]   ;;  %s8642_s14 = inlined_call_operand.hbm [shape: f32[1,1024], index: 14, kind: input, shape index: {}]   ;;  %s8643_s15 = inlined_call_operand.hbm [shape: f32[1,1024], index: 15, kind: input, shape index: {}]   ;;  %s8644_s16 = inlined_call_operand.hbm [shape: f32[1,1024], index: 16, kind: input, shape index: {}]   ;;  %s8645_s17 = inlined_call_operand.hbm [shape: bf16[1024,896], index: 17, kind: input, shape index: {}]   ;;  %s8646_s18 = inlined_call_operand.hbm [shape: f32[1,896], index: 18, kind: input, shape index: {}]   ;;  %s8647_s19 = inlined_call_operand.vmem [shape: f32[8,896], index: 19, kind: output, shape index: {}]  }
   0x1   :  { %8651 = sst [smem:[#allocation45_spill]] %s8628_s0 }
   0x2   :  { %8652 = sst [smem:[#allocation46_spill]] %s8629_s1 }
   0x3   :  { %8653 = sst [smem:[#allocation47_spill]] %s8630_s2 }
   0x4   :  { %8654 = sst [smem:[#allocation48_spill]] %s8631_s3 }
   0x5   :  { %24 = vsyncpa [#allocation6], 0 }
   0x6   :  { %25 = vsyncpa [#allocation8], 0 }
   0x7   :  { %26 = vsyncpa [#allocation11], 0 }
   0x8   :  { %27 = vsyncpa [#allocation14], 0 }
   0x9   :  { %28 = vsyncpa [#allocation17], 0 }
   0xa   :  { %29 = vsyncpa [#allocation20], 0 }
   0xb   :  { %30 = vsyncpa [#allocation23], 0 }
   0xc   :  { %31 = vsyncpa [#allocation26], 0 }
   0xd   :  { %32 = vsyncpa [#allocation29], 0  ;;  %s8025_s0 = smov [#allocation7]   ;;  %s8026_s20 = smov [#allocation10]  }
   0xe   :  { %s53_s30 = sshll.u32 %s8025_s0, 4  ;;  %s73_s21 = sshll.u32 %s8026_s20, 4  ;;  %s54_s30 = int_to_ptr.vmem [resolvable:$true] %s53_s30  ;;  %s74_s21 = int_to_ptr.vmem [resolvable:$true] %s73_s21 }
   0xf   :  { %s8655_s2 = sld [smem:[#allocation47_spill]] }
  0x15   :  { %s7651_s23 = scalar_lea.hbm %s8655_s2, 16 }
  0x16   :  { %p7652_p0 = scmp.ne.s32.totalorder %s8655_s2, %s7651_s23  ;;  %p7655_p1 = scmp.lt.u32.totalorder %s7651_s23, %s8655_s2 }
  0x18   :  { %p7657_p2 = pnand %p7655_p1, %p7652_p0 }
  0x1a   :  { %7660 = shalt.err (!%p7657_p2)
}
  0x1b   :  { %s7661_s27 = scalar_lea.vmem %s54_s30, 16  ;;  %s7665_s28 = scalar_lea.vmem %s54_s30, 32 }
  0x1c   :  { %p7662_p3 = scmp.ne.s32.totalorder %s54_s30, %s7661_s27  ;;  %p7666_p4 = scmp.lt.s32.totalorder %s54_s30, %s54_s30 }
  0x1d   :  { %p7667_p5 = scmp.lt.s32.totalorder %s7665_s28, %s7661_s27 }
  0x1f   :  { %p7668_p6 = por %p7667_p5, %p7666_p4 }
  0x21   :  { %p7669_p7 = pnand %p7668_p6, %p7662_p3 }
  0x23   :  { %7672 = shalt.err (!%p7669_p7)
}
  0x24   :  { %56 = dma.hbm_to_vmem [thread:$0]  %s8655_s2, 16, %s54_s30, [#allocation8]  }
  0x25   :  { %s7673_s22 = scalar_lea.hbm %s8632_s4, 16 }
  0x26   :  { %p7674_p8 = scmp.ne.s32.totalorder %s8632_s4, %s7673_s22  ;;  %p7677_p9 = scmp.lt.u32.totalorder %s7673_s22, %s8632_s4 }
  0x28   :  { %p7679_p10 = pnand %p7677_p9, %p7674_p8 }
  0x2a   :  { %7682 = shalt.err (!%p7679_p10)
}
  0x2b   :  { %s7683_s26 = scalar_lea.vmem %s74_s21, 16  ;;  %s7687_s27 = scalar_lea.vmem %s74_s21, 32 }
  0x2c   :  { %p7684_p11 = scmp.ne.s32.totalorder %s74_s21, %s7683_s26  ;;  %p7688_p12 = scmp.lt.s32.totalorder %s74_s21, %s74_s21 }
  0x2d   :  { %p7689_p13 = scmp.lt.s32.totalorder %s7687_s27, %s7683_s26 }
  0x2f   :  { %p7690_p0 = por %p7689_p13, %p7688_p12 }
  0x31   :  { %p7691_p1 = pnand %p7690_p0, %p7684_p11 }
  0x33   :  { %7694 = shalt.err (!%p7691_p1)
}
  0x34   :  { %76 = dma.hbm_to_vmem [thread:$0]  %s8632_s4, 16, %s74_s21, [#allocation11]  }
  0x35   :  { %s8027_s28 = smov [#allocation13]   ;;  %s8028_s0 = smov [#allocation16]  }
  0x36   :  { %s95_s29 = sshll.u32 %s8027_s28, 4  ;;  %s115_s20 = sshll.u32 %s8028_s0, 4  ;;  %s96_s29 = int_to_ptr.vmem [resolvable:$true] %s95_s29  ;;  %s116_s20 = int_to_ptr.vmem [resolvable:$true] %s115_s20 }
  0x37   :  { %s7695_s24 = scalar_lea.hbm %s8634_s6, 32 }
  0x38   :  { %p7696_p2 = scmp.ne.s32.totalorder %s8634_s6, %s7695_s24  ;;  %p7699_p3 = scmp.lt.u32.totalorder %s7695_s24, %s8634_s6 }
  0x3a   :  { %p7701_p4 = pnand %p7699_p3, %p7696_p2 }
  0x3c   :  { %7704 = shalt.err (!%p7701_p4)
}
  0x3d   :  { %s7705_s4 = scalar_lea.vmem %s96_s29, 32  ;;  %p7710_p6 = scmp.lt.s32.totalorder %s96_s29, %s96_s29 }
  0x3e   :  { %p7706_p5 = scmp.ne.s32.totalorder %s96_s29, %s7705_s4  ;;  %p7711_p7 = scmp.lt.s32.totalorder %s7705_s4, %s7705_s4 }
  0x40   :  { %p7712_p8 = por %p7711_p7, %p7710_p6 }
  0x42   :  { %p7713_p9 = pnand %p7712_p8, %p7706_p5 }
  0x44   :  { %7716 = shalt.err (!%p7713_p9)
}
  0x45   :  { %98 = dma.hbm_to_vmem [thread:$0]  %s8634_s6, 32, %s96_s29, [#allocation14]  }
  0x46   :  { %s7717_s28 = scalar_lea.hbm %s8636_s8, 32 }
  0x47   :  { %p7718_p10 = scmp.ne.s32.totalorder %s8636_s8, %s7717_s28  ;;  %p7721_p11 = scmp.lt.u32.totalorder %s7717_s28, %s8636_s8 }
  0x49   :  { %p7723_p12 = pnand %p7721_p11, %p7718_p10 }
  0x4b   :  { %7726 = shalt.err (!%p7723_p12)
}
  0x4c   :  { %s7727_s23 = scalar_lea.vmem %s116_s20, 32  ;;  %p7732_p0 = scmp.lt.s32.totalorder %s116_s20, %s116_s20 }
  0x4d   :  { %p7728_p13 = scmp.ne.s32.totalorder %s116_s20, %s7727_s23  ;;  %p7733_p1 = scmp.lt.s32.totalorder %s7727_s23, %s7727_s23 }
  0x4f   :  { %p7734_p2 = por %p7733_p1, %p7732_p0 }
  0x51   :  { %p7735_p3 = pnand %p7734_p2, %p7728_p13 }
  0x53   :  { %7738 = shalt.err (!%p7735_p3)
}
  0x54   :  { %118 = dma.hbm_to_vmem [thread:$0]  %s8636_s8, 32, %s116_s20, [#allocation17]  }
  0x55   :  { %s8029_s25 = smov [#allocation19]   ;;  %s8030_s26 = smov [#allocation22]  }
  0x56   :  { %s137_s3 = sshll.u32 %s8029_s25, 4  ;;  %s157_s4 = sshll.u32 %s8030_s26, 4  ;;  %s138_s3 = int_to_ptr.vmem [resolvable:$true] %s137_s3  ;;  %s158_s4 = int_to_ptr.vmem [resolvable:$true] %s157_s4 }
  0x57   :  { %s7739_s30 = scalar_lea.hbm %s8638_s10, 64 }
  0x58   :  { %p7740_p4 = scmp.ne.s32.totalorder %s8638_s10, %s7739_s30  ;;  %p7743_p5 = scmp.lt.u32.totalorder %s7739_s30, %s8638_s10 }
  0x5a   :  { %p7745_p6 = pnand %p7743_p5, %p7740_p4 }
  0x5c   :  { %7748 = shalt.err (!%p7745_p6)
}
  0x5d   :  { %s7749_s8 = scalar_lea.vmem %s138_s3, 64  ;;  %p7754_p8 = scmp.lt.s32.totalorder %s138_s3, %s138_s3 }
  0x5e   :  { %p7750_p7 = scmp.ne.s32.totalorder %s138_s3, %s7749_s8  ;;  %p7755_p9 = scmp.lt.s32.totalorder %s7749_s8, %s7749_s8 }
  0x60   :  { %p7756_p10 = por %p7755_p9, %p7754_p8 }
  0x62   :  { %p7757_p11 = pnand %p7756_p10, %p7750_p7 }
  0x64   :  { %7760 = shalt.err (!%p7757_p11)
}
  0x65   :  { %140 = dma.hbm_to_vmem [thread:$0]  %s8638_s10, 64, %s138_s3, [#allocation20]  }
  0x66   :  { %s7761_s6 = scalar_lea.hbm %s8640_s12, 64 }
  0x67   :  { %p7762_p12 = scmp.ne.s32.totalorder %s8640_s12, %s7761_s6  ;;  %p7765_p13 = scmp.lt.u32.totalorder %s7761_s6, %s8640_s12 }
  0x69   :  { %p7767_p0 = pnand %p7765_p13, %p7762_p12 }
  0x6b   :  { %7770 = shalt.err (!%p7767_p0)
}
  0x6c   :  { %s7771_s27 = scalar_lea.vmem %s158_s4, 64  ;;  %p7776_p2 = scmp.lt.s32.totalorder %s158_s4, %s158_s4 }
  0x6d   :  { %p7772_p1 = scmp.ne.s32.totalorder %s158_s4, %s7771_s27  ;;  %p7777_p3 = scmp.lt.s32.totalorder %s7771_s27, %s7771_s27 }
  0x6f   :  { %p7778_p4 = por %p7777_p3, %p7776_p2 }
  0x71   :  { %p7779_p5 = pnand %p7778_p4, %p7772_p1 }
  0x73   :  { %7782 = shalt.err (!%p7779_p5)
}
  0x74   :  { %160 = dma.hbm_to_vmem [thread:$0]  %s8640_s12, 64, %s158_s4, [#allocation23]  }
  0x75   :  { %s8031_s30 = smov [#allocation25]   ;;  %s8032_s28 = smov [#allocation5]  }
  0x76   :  { %s177_s2 = sshll.u32 %s8031_s30, 4  ;;  %s40_s0 = sshll.u32 %s8032_s28, 4  ;;  %s178_s2 = int_to_ptr.vmem [resolvable:$true] %s177_s2  ;;  %s8234_s0 = int_to_ptr.vmem [resolvable:$true] %s40_s0 }
  0x77   :  { %s7783_s20 = scalar_lea.hbm %s8643_s15, 128 }
  0x78   :  { %p7784_p6 = scmp.ne.s32.totalorder %s8643_s15, %s7783_s20  ;;  %p7787_p7 = scmp.lt.u32.totalorder %s7783_s20, %s8643_s15 }
  0x7a   :  { %p7789_p8 = pnand %p7787_p7, %p7784_p6 }
  0x7c   :  { %7792 = shalt.err (!%p7789_p8)
}
  0x7d   :  { %s7793_s12 = scalar_lea.vmem %s178_s2, 128  ;;  %p7798_p10 = scmp.lt.s32.totalorder %s178_s2, %s178_s2 }
  0x7e   :  { %p7794_p9 = scmp.ne.s32.totalorder %s178_s2, %s7793_s12  ;;  %p7799_p11 = scmp.lt.s32.totalorder %s7793_s12, %s7793_s12 }
  0x80   :  { %p7800_p12 = por %p7799_p11, %p7798_p10 }
  0x82   :  { %p7801_p13 = pnand %p7800_p12, %p7794_p9 }
  0x84   :  { %7804 = shalt.err (!%p7801_p13)
}
  0x85   :  { %180 = dma.hbm_to_vmem [thread:$0]  %s8643_s15, 128, %s178_s2, [#allocation26]  }
  0x86   :  { %s8656_s21 = sld [smem:[#allocation46_spill]] }
  0x8c   :  { %s7805_s27 = scalar_lea.hbm %s8656_s21, 1024 }
  0x8d   :  { %p7806_p0 = scmp.ne.s32.totalorder %s8656_s21, %s7805_s27  ;;  %p7809_p1 = scmp.lt.u32.totalorder %s7805_s27, %s8656_s21 }
  0x8f   :  { %p7811_p2 = pnand %p7809_p1, %p7806_p0 }
  0x91   :  { %7814 = shalt.err (!%p7811_p2)
}
  0x92   :  { %s7815_s1 = scalar_lea.vmem %s8234_s0, 1024  ;;  %p7820_p4 = scmp.lt.s32.totalorder %s8234_s0, %s8234_s0 }
  0x93   :  { %p7816_p3 = scmp.ne.s32.totalorder %s8234_s0, %s7815_s1  ;;  %p7821_p5 = scmp.lt.s32.totalorder %s7815_s1, %s7815_s1 }
  0x95   :  { %p7822_p6 = por %p7821_p5, %p7820_p4 }
  0x97   :  { %p7823_p7 = pnand %p7822_p6, %p7816_p3 }
  0x99   :  { %7826 = shalt.err (!%p7823_p7)
}
  0x9a   :  { %s8033_s15 = smov 64   ;;  %s8034_s2 = smov 4  }
  0x9b   :  { %46 = dma.hbm_to_vmem [thread:$0]  %s8656_s21, 1024, %s8234_s0, [#allocation6], %s8033_s15, %s8033_s15, %s8034_s2  }
  0x9c   :  { %s8035_s22 = smov [#allocation9]   ;;  %s8036_s23 = smov [#allocation12]  }
  0x9d   :  { %s63_s24 = sshll.u32 %s8035_s22, 4  ;;  %s82_s6 = sshll.u32 %s8036_s23, 4  ;;  %s64_s24 = int_to_ptr.vmem [resolvable:$true] %s63_s24  ;;  %s8268_s6 = int_to_ptr.vmem [resolvable:$true] %s82_s6 }
  0x9e   :  { %s8657_s29 = sld [smem:[#allocation48_spill]] }
  0xa4   :  { %s7827_s25 = scalar_lea.hbm %s8657_s29, 16 }
  0xa5   :  { %p7828_p8 = scmp.ne.s32.totalorder %s8657_s29, %s7827_s25  ;;  %p7831_p9 = scmp.lt.u32.totalorder %s7827_s25, %s8657_s29 }
  0xa7   :  { %p7833_p10 = pnand %p7831_p9, %p7828_p8 }
  0xa9   :  { %7836 = shalt.err (!%p7833_p10)
}
  0xaa   :  { %s7837_s0 = scalar_lea.vmem %s64_s24, 16  ;;  %s7841_s21 = scalar_lea.vmem %s64_s24, 32 }
  0xab   :  { %p7838_p11 = scmp.ne.s32.totalorder %s64_s24, %s7837_s0  ;;  %p7842_p12 = scmp.lt.s32.totalorder %s64_s24, %s64_s24 }
  0xac   :  { %p7843_p13 = scmp.lt.s32.totalorder %s7841_s21, %s7837_s0 }
  0xae   :  { %p7844_p0 = por %p7843_p13, %p7842_p12 }
  0xb0   :  { %p7845_p1 = pnand %p7844_p0, %p7838_p11 }
  0xb2   :  { %7848 = shalt.err (!%p7845_p1)
}
  0xb3   :  { %66 = dma.hbm_to_vmem [thread:$0]  %s8657_s29, 16, %s64_s24, [#allocation8]  }
  0xb4   :  { %s7849_s20 = scalar_lea.hbm %s8633_s5, 2048 }
  0xb5   :  { %p7850_p2 = scmp.ne.s32.totalorder %s8633_s5, %s7849_s20  ;;  %p7853_p3 = scmp.lt.u32.totalorder %s7849_s20, %s8633_s5 }
  0xb7   :  { %p7855_p4 = pnand %p7853_p3, %p7850_p2 }
  0xb9   :  { %7858 = shalt.err (!%p7855_p4)
}
  0xba   :  { %s7859_s25 = scalar_lea.vmem %s8268_s6, 2048  ;;  %p7864_p6 = scmp.lt.s32.totalorder %s8268_s6, %s8268_s6 }
  0xbb   :  { %p7860_p5 = scmp.ne.s32.totalorder %s8268_s6, %s7859_s25  ;;  %p7865_p7 = scmp.lt.s32.totalorder %s7859_s25, %s7859_s25 }
  0xbd   :  { %p7866_p8 = por %p7865_p7, %p7864_p6 }
  0xbf   :  { %p7867_p9 = pnand %p7866_p8, %p7860_p5 }
  0xc1   :  { %7870 = shalt.err (!%p7867_p9)
}
  0xc2   :  { %s8037_s24 = smov 128   ;;  %s8038_s29 = smov 8  }
  0xc3   :  { %88 = dma.hbm_to_vmem [thread:$0]  %s8633_s5, 2048, %s8268_s6, [#allocation11], %s8037_s24, %s8037_s24, %s8038_s29  }
  0xc4   :  { %s8039_s10 = smov [#allocation15]   ;;  %s8040_s0 = smov [#allocation18]  }
  0xc5   :  { %s105_s3 = sshll.u32 %s8039_s10, 4  ;;  %s124_s21 = sshll.u32 %s8040_s0, 4  ;;  %s106_s3 = int_to_ptr.vmem [resolvable:$true] %s105_s3  ;;  %s8302_s21 = int_to_ptr.vmem [resolvable:$true] %s124_s21 }
  0xc6   :  { %s7871_s1 = scalar_lea.hbm %s8635_s7, 32 }
  0xc7   :  { %p7872_p10 = scmp.ne.s32.totalorder %s8635_s7, %s7871_s1  ;;  %p7875_p11 = scmp.lt.u32.totalorder %s7871_s1, %s8635_s7 }
  0xc9   :  { %p7877_p12 = pnand %p7875_p11, %p7872_p10 }
  0xcb   :  { %7880 = shalt.err (!%p7877_p12)
}
  0xcc   :  { %s7881_s5 = scalar_lea.vmem %s106_s3, 32  ;;  %p7886_p0 = scmp.lt.s32.totalorder %s106_s3, %s106_s3 }
  0xcd   :  { %p7882_p13 = scmp.ne.s32.totalorder %s106_s3, %s7881_s5  ;;  %p7887_p1 = scmp.lt.s32.totalorder %s7881_s5, %s7881_s5 }
  0xcf   :  { %p7888_p2 = por %p7887_p1, %p7886_p0 }
  0xd1   :  { %p7889_p3 = pnand %p7888_p2, %p7882_p13 }
  0xd3   :  { %7892 = shalt.err (!%p7889_p3)
}
  0xd4   :  { %108 = dma.hbm_to_vmem [thread:$0]  %s8635_s7, 32, %s106_s3, [#allocation14]  }
  0xd5   :  { %s7893_s26 = scalar_lea.hbm %s8637_s9, 8192 }
  0xd6   :  { %p7894_p4 = scmp.ne.s32.totalorder %s8637_s9, %s7893_s26  ;;  %p7897_p5 = scmp.lt.u32.totalorder %s7893_s26, %s8637_s9 }
  0xd8   :  { %p7899_p6 = pnand %p7897_p5, %p7894_p4 }
  0xda   :  { %7902 = shalt.err (!%p7899_p6)
}
  0xdb   :  { %s7903_s28 = scalar_lea.vmem %s8302_s21, 8192  ;;  %p7908_p8 = scmp.lt.s32.totalorder %s8302_s21, %s8302_s21 }
  0xdc   :  { %p7904_p7 = scmp.ne.s32.totalorder %s8302_s21, %s7903_s28  ;;  %p7909_p9 = scmp.lt.s32.totalorder %s7903_s28, %s7903_s28 }
  0xde   :  { %p7910_p10 = por %p7909_p9, %p7908_p8 }
  0xe0   :  { %p7911_p11 = pnand %p7910_p10, %p7904_p7 }
  0xe2   :  { %7914 = shalt.err (!%p7911_p11)
}
  0xe3   :  { %s8041_s7 = smov 256   ;;  %s8042_s3 = smov 16  }
  0xe4   :  { %130 = dma.hbm_to_vmem [thread:$0]  %s8637_s9, 8192, %s8302_s21, [#allocation17], %s8041_s7, %s8041_s7, %s8042_s3  }
  0xe5   :  { %s8043_s20 = smov [#allocation21]   ;;  %s8044_s23 = smov [#allocation24]  }
  0xe6   :  { %s147_s22 = sshll.u32 %s8043_s20, 4  ;;  %s167_s5 = sshll.u32 %s8044_s23, 4  ;;  %s148_s22 = int_to_ptr.vmem [resolvable:$true] %s147_s22  ;;  %s168_s5 = int_to_ptr.vmem [resolvable:$true] %s167_s5 }
  0xe7   :  { %s7915_s4 = scalar_lea.hbm %s8639_s11, 64 }
  0xe8   :  { %p7916_p12 = scmp.ne.s32.totalorder %s8639_s11, %s7915_s4  ;;  %p7919_p13 = scmp.lt.u32.totalorder %s7915_s4, %s8639_s11 }
  0xea   :  { %p7921_p0 = pnand %p7919_p13, %p7916_p12 }
  0xec   :  { %7924 = shalt.err (!%p7921_p0)
}
  0xed   :  { %s7925_s9 = scalar_lea.vmem %s148_s22, 64  ;;  %p7930_p2 = scmp.lt.s32.totalorder %s148_s22, %s148_s22 }
  0xee   :  { %p7926_p1 = scmp.ne.s32.totalorder %s148_s22, %s7925_s9  ;;  %p7931_p3 = scmp.lt.s32.totalorder %s7925_s9, %s7925_s9 }
  0xf0   :  { %p7932_p4 = por %p7931_p3, %p7930_p2 }
  0xf2   :  { %p7933_p5 = pnand %p7932_p4, %p7926_p1 }
  0xf4   :  { %7936 = shalt.err (!%p7933_p5)
}
  0xf5   :  { %150 = dma.hbm_to_vmem [thread:$0]  %s8639_s11, 64, %s148_s22, [#allocation20]  }
  0xf6   :  { %s7937_s7 = scalar_lea.hbm %s8642_s14, 128 }
  0xf7   :  { %p7938_p6 = scmp.ne.s32.totalorder %s8642_s14, %s7937_s7  ;;  %p7941_p7 = scmp.lt.u32.totalorder %s7937_s7, %s8642_s14 }
  0xf9   :  { %p7943_p8 = pnand %p7941_p7, %p7938_p6 }
  0xfb   :  { %7946 = shalt.err (!%p7943_p8)
}
  0xfc   :  { %s7947_s23 = scalar_lea.vmem %s168_s5, 128  ;;  %p7952_p10 = scmp.lt.s32.totalorder %s168_s5, %s168_s5 }
  0xfd   :  { %p7948_p9 = scmp.ne.s32.totalorder %s168_s5, %s7947_s23  ;;  %p7953_p11 = scmp.lt.s32.totalorder %s7947_s23, %s7947_s23 }
  0xff   :  { %p7954_p12 = por %p7953_p11, %p7952_p10 }
 0x101   :  { %p7955_p13 = pnand %p7954_p12, %p7948_p9 }
 0x103   :  { %7958 = shalt.err (!%p7955_p13)
}
 0x104   :  { %170 = dma.hbm_to_vmem [thread:$0]  %s8642_s14, 128, %s168_s5, [#allocation23]  }
 0x105   :  { %s8045_s6 = smov [#allocation27]   ;;  %s8046_s4 = smov [#allocation28]  }
 0x106   :  { %s187_s12 = sshll.u32 %s8045_s6, 4  ;;  %s197_s25 = sshll.u32 %s8046_s4, 4  ;;  %s188_s12 = int_to_ptr.vmem [resolvable:$true] %s187_s12  ;;  %s198_s25 = int_to_ptr.vmem [resolvable:$true] %s197_s25 }
 0x107   :  { %s7959_s10 = scalar_lea.hbm %s8644_s16, 128 }
 0x108   :  { %p7960_p0 = scmp.ne.s32.totalorder %s8644_s16, %s7959_s10  ;;  %p7963_p1 = scmp.lt.u32.totalorder %s7959_s10, %s8644_s16 }
 0x10a   :  { %p7965_p2 = pnand %p7963_p1, %p7960_p0 }
 0x10c   :  { %7968 = shalt.err (!%p7965_p2)
}
 0x10d   :  { %s7969_s14 = scalar_lea.vmem %s188_s12, 128  ;;  %p7974_p4 = scmp.lt.s32.totalorder %s188_s12, %s188_s12 }
 0x10e   :  { %p7970_p3 = scmp.ne.s32.totalorder %s188_s12, %s7969_s14  ;;  %p7975_p5 = scmp.lt.s32.totalorder %s7969_s14, %s7969_s14 }
 0x110   :  { %p7976_p6 = por %p7975_p5, %p7974_p4 }
 0x112   :  { %p7977_p7 = pnand %p7976_p6, %p7970_p3 }
 0x114   :  { %7980 = shalt.err (!%p7977_p7)
}
 0x115   :  { %190 = dma.hbm_to_vmem [thread:$0]  %s8644_s16, 128, %s188_s12, [#allocation26]  }
 0x116   :  { %s7981_s1 = scalar_lea.hbm %s8646_s18, 112 }
 0x117   :  { %p7982_p8 = scmp.ne.s32.totalorder %s8646_s18, %s7981_s1  ;;  %p7985_p9 = scmp.lt.u32.totalorder %s7981_s1, %s8646_s18 }
 0x119   :  { %p7987_p10 = pnand %p7985_p9, %p7982_p8 }
 0x11b   :  { %7990 = shalt.err (!%p7987_p10)
}
 0x11c   :  { %s7991_s22 = scalar_lea.vmem %s198_s25, 112  ;;  %s7995_s6 = scalar_lea.vmem %s198_s25, 128 }
 0x11d   :  { %p7992_p11 = scmp.ne.s32.totalorder %s198_s25, %s7991_s22  ;;  %p7996_p12 = scmp.lt.s32.totalorder %s198_s25, %s198_s25 }
 0x11e   :  { %p7997_p13 = scmp.lt.s32.totalorder %s7995_s6, %s7991_s22 }
 0x120   :  { %p7998_p0 = por %p7997_p13, %p7996_p12 }
 0x122   :  { %p7999_p1 = pnand %p7998_p0, %p7992_p11 }
 0x124   :  { %8002 = shalt.err (!%p7999_p1)
}
 0x125   :  { %200 = dma.hbm_to_vmem [thread:$0]  %s8646_s18, 112, %s198_s25, [#allocation29]  }
 0x126   :  { %8003 = dma.done.wait [#allocation6], 1024  }
 0x127   :  { %8004 = vsyncadd [#allocation6], 4294966272 }
 0x128   :  { %8005 = dma.done.wait [#allocation8], 32  }
 0x129   :  { %8006 = vsyncadd [#allocation8], 4294967264 }
 0x12a   :  { %8007 = dma.done.wait [#allocation11], 2064  }
 0x12b   :  { %8008 = vsyncadd [#allocation11], 4294965232 }
 0x12c   :  { %8009 = dma.done.wait [#allocation14], 64  }
 0x12d   :  { %8010 = vsyncadd [#allocation14], 4294967232 }
 0x12e   :  { %8011 = dma.done.wait [#allocation17], 8224  }
 0x12f   :  { %8012 = vsyncadd [#allocation17], 4294959072 }
 0x130   :  { %8013 = dma.done.wait [#allocation20], 128  }
 0x131   :  { %8014 = vsyncadd [#allocation20], 4294967168 }
 0x132   :  { %8015 = dma.done.wait [#allocation23], 192  }
 0x133   :  { %8016 = vsyncadd [#allocation23], 4294967104 }
 0x134   :  { %8017 = dma.done.wait [#allocation26], 256  }
 0x135   :  { %8018 = vsyncadd [#allocation26], 4294967040 }
 0x136   :  { %8019 = dma.done.wait [#allocation29], 112  }
 0x137   :  { %8020 = vsyncadd [#allocation29], 4294967184  ;;  %s253_s4 = sld [smem:[#allocation0]]   ;;  %s8047_s18 = smov 1024   ;;  %v8048_v0 = vmov 0.0|0.0   ;;  %vm8049_vm0 = vmmov 0  }
 0x138   :  { %265 = sst [smem:[#allocation31]] %s8047_s18  ;;  %5694 = vmatprep.subr.bf16.mxu0 %v8048_v0  ;;  %v8050_v1 = vmov 0.0   ;;  %s8051_s25 = smov [#allocation2]  }
 0x139   :  { %267 = sst [smem:[#allocation31 + $0x1]] %s8047_s18  ;;  %5691 = vmatprep.mubr.msk.f32.mxu0 %vm8049_vm0, %v8050_v1  ;;  %594 = vmatprep.mubr.f32.mxu1 %v8050_v1  ;;  %s261_s26 = sshll.u32 %s8051_s25, 4  ;;  %s262_s26 = int_to_ptr.vmem [resolvable:$true] %s261_s26 }
 0x13a   :  { %269 = sst [smem:[#allocation31 + $0x2]] %s8038_s29  ;;  %s8052_s27 = smov 512  }
 0x13b   :  { %271 = sst [smem:[#allocation31 + $0x3]] %s8033_s15  ;;  %s8053_s21 = smov 2  }
 0x13c   :  { %273 = sst [smem:[#allocation31 + $0x4]] %s8037_s24  ;;  %s8054_s0 = smov [#allocation4]  }
 0x13d   :  { %277 = sst [smem:[#allocation31 + $0x6]] %s8052_s27  ;;  %s5447_s10 = sshll.u32 %s253_s4, 26 }
 0x13e   :  { %279 = sst [smem:[#allocation31 + $0x7]] %s8033_s15  ;;  %s5448_s9 = sadd.s32 134217728, %s5447_s10 }
 0x13f   :  { %281 = sst [smem:[#allocation31 + $0x8]] %s8034_s2  ;;  %s8055_s30 = smov [#allocation30]  }
 0x140   :  { %275 = sst [smem:[#allocation31 + $0x5]] %s8053_s21  ;;  %s8056_s5 = smov 896  }
 0x141   :  { %283 = dma.general %s8641_s13, 32768, %s262_s26, %s8054_s0, %s8055_s30, [#allocation31], %s5448_s9, 0  }
 0x142   :  { %300 = sst [smem:[#allocation33]] %s8056_s5  ;;  %s8057_s28 = smov 7  }
 0x143   :  { %302 = sst [smem:[#allocation33 + $0x1]] %s8056_s5  ;;  %s8058_s7 = smov [#allocation3]  }
 0x144   :  { %304 = sst [smem:[#allocation33 + $0x2]] %s8057_s28  ;;  %s296_s3 = sshll.u32 %s8058_s7, 4  ;;  %s297_s3 = int_to_ptr.vmem [resolvable:$true] %s296_s3 }
 0x145   :  { %306 = sst [smem:[#allocation33 + $0x3]] %s8033_s15  ;;  %s8059_s1 = smov 448  }
 0x146   :  { %308 = sst [smem:[#allocation33 + $0x4]] %s8037_s24  ;;  %s8060_s13 = smov [#allocation4 + $0x1]  }
 0x147   :  { %310 = sst [smem:[#allocation33 + $0x5]] %s8053_s21  ;;  %s8061_s8 = smov [#allocation32]  }
 0x148   :  { %312 = sst [smem:[#allocation33 + $0x6]] %s8059_s1 }
 0x149   :  { %314 = sst [smem:[#allocation33 + $0x7]] %s8033_s15 }
 0x14a   :  { %316 = sst [smem:[#allocation33 + $0x8]] %s8034_s2 }
 0x14b   :  { %318 = dma.general %s8645_s17, 57344, %s297_s3, %s8060_s13, %s8061_s8, [#allocation33], %s5448_s9, 0  }
 0x14c   :  { %v5464_v2 = vld [vmem:[#allocation5] sm:$0xff]   ;;  %v5495_v3 = vld [vmem:[#allocation5 + $0x8] sm:$0xff]   ;;  %v5496_v4 = vld [vmem:[#allocation5 + $0x10] sm:$0xff]   ;;  %s8658_s2 = sld [smem:[#allocation45_spill]] }
 0x14d   :  { %5696 = vmatpush3.bf16.msra.mxu0 %v5464_v2  ;;  %v5497_v5 = vld [vmem:[#allocation5 + $0x18] sm:$0xff]   ;;  %v5498_v6 = vld [vmem:[#allocation5 + $0x20] sm:$0xff]   ;;  %v5499_v7 = vld [vmem:[#allocation5 + $0x28] sm:$0xff]  }
 0x14e   :  { %5697 = vmatprep.subr.bf16.mxu0 %v8048_v0  ;;  %v5500_v8 = vld [vmem:[#allocation5 + $0x30] sm:$0xff]   ;;  %v5501_v9 = vld [vmem:[#allocation5 + $0x38] sm:$0xff]   ;;  %v5451_v27 = vld [vmem:[#allocation7] ss:$0 sm:$0xff] }
 0x14f   :  { %v7443_v11 = vld [vmem:[#allocation12 + $0x4] ss:$8 sps:$4 sm:$0xff]   ;;  %v7445_v12 = vld [vmem:[#allocation12] ss:$8 sps:$4 sm:$0xff]   ;;  %v7446_v13 = vld [vmem:[#allocation12 + $0x14] ss:$8 sps:$4 sm:$0xff]  }
 0x150   :  { %5719 = vmatprep.subr.bf16.mxu1 %v7443_v11  ;;  %v7448_v14 = vld [vmem:[#allocation12 + $0x10] ss:$8 sps:$4 sm:$0xff]   ;;  %v7449_v15 = vld [vmem:[#allocation12 + $0x24] ss:$8 sps:$4 sm:$0xff]   ;;  %v7451_v16 = vld [vmem:[#allocation12 + $0x20] ss:$8 sps:$4 sm:$0xff]  }
 0x151   :  { %5699 = vmatpush3.bf16.msra.mxu0 %v5495_v3  ;;  %5721 = vmatpush1.bf16.msra.mxu1 %v7445_v12  ;;  %v7452_v17 = vld [vmem:[#allocation12 + $0x34] ss:$8 sps:$4 sm:$0xff]   ;;  %v7454_v18 = vld [vmem:[#allocation12 + $0x30] ss:$8 sps:$4 sm:$0xff]   ;;  %v7455_v19 = vld [vmem:[#allocation12 + $0x44] ss:$8 sps:$4 sm:$0xff]  }
 0x152   :  { %5700 = vmatprep.subr.bf16.mxu0 %v8048_v0  ;;  %v319_v10 = vld [vmem:[%s8658_s2] sm:$0xff]  ;;  %5723 = vmatprep.subr.bf16.mxu1 %v7446_v13  ;;  %v7461_v23 = vld [vmem:[#allocation12 + $0x64] ss:$8 sps:$4 sm:$0xff]  }
 0x153   :  { %v7457_v20 = vld [vmem:[#allocation12 + $0x40] ss:$8 sps:$4 sm:$0xff]   ;;  %v7458_v21 = vld [vmem:[#allocation12 + $0x54] ss:$8 sps:$4 sm:$0xff]   ;;  %v7460_v22 = vld [vmem:[#allocation12 + $0x50] ss:$8 sps:$4 sm:$0xff]  }
 0x154   :  { %v7463_v24 = vld [vmem:[#allocation12 + $0x60] ss:$8 sps:$4 sm:$0xff]   ;;  %v7464_v25 = vld [vmem:[#allocation12 + $0x74] ss:$8 sps:$4 sm:$0xff]   ;;  %v7466_v26 = vld [vmem:[#allocation12 + $0x70] ss:$8 sps:$4 sm:$0xff]  }
 0x155   :  { %5702 = vmatpush3.bf16.msra.mxu0 %v5496_v4  ;;  %5725 = vmatpush1.bf16.msra.mxu1 %v7448_v14  ;;  %v5452_v49 = vld [vmem:[#allocation9] ss:$0 sm:$0xff]  ;;  %v5453_v51 = vld [vmem:[#allocation10] ss:$0 sm:$0xff]  ;;  %v7469_v60 = vld [vmem:[#allocation18] ss:$16 sps:$4 sm:$0xff]  }
 0x156   :  { %5703 = vmatprep.subr.bf16.mxu0 %v8048_v0  ;;  %5727 = vmatprep.subr.bf16.mxu1 %v7449_v15  ;;  %v7467_v59 = vld [vmem:[#allocation18 + $0x4] ss:$16 sps:$4 sm:$0xff]   ;;  %v7472_v62 = vld [vmem:[#allocation18 + $0x20] ss:$16 sps:$4 sm:$0xff]  }
 0x157   :  { %v7470_v61 = vld [vmem:[#allocation18 + $0x24] ss:$16 sps:$4 sm:$0xff]   ;;  %v7478_v2 = vld [vmem:[#allocation18 + $0x60] ss:$16 sps:$4 sm:$0xff]  }
 0x158   :  { %v7473_v63 = vld [vmem:[#allocation18 + $0x44] ss:$16 sps:$4 sm:$0xff]   ;;  %v7481_v4 = vld [vmem:[#allocation18 + $0x80] ss:$16 sps:$4 sm:$0xff]  }
 0x159   :  { %5705 = vmatpush3.bf16.msra.mxu0 %v5497_v5  ;;  %5729 = vmatpush1.bf16.msra.mxu1 %v7451_v16  ;;  %v7476_v1 = vld [vmem:[#allocation18 + $0x64] ss:$16 sps:$4 sm:$0xff]   ;;  %v7493_v12 = vld [vmem:[#allocation18 + $0x100] ss:$16 sps:$4 sm:$0xff]  }
 0x15a   :  { %5706 = vmatprep.subr.bf16.mxu0 %v8048_v0  ;;  %5731 = vmatprep.subr.bf16.mxu1 %v7452_v17  ;;  %v7479_v3 = vld [vmem:[#allocation18 + $0x84] ss:$16 sps:$4 sm:$0xff]   ;;  %v7496_v14 = vld [vmem:[#allocation18 + $0x120] ss:$16 sps:$4 sm:$0xff]  }
 0x15b   :  { %v7482_v5 = vld [vmem:[#allocation18 + $0xa4] ss:$16 sps:$4 sm:$0xff]   ;;  %v7499_v16 = vld [vmem:[#allocation18 + $0x140] ss:$16 sps:$4 sm:$0xff]  }
 0x15c   :  { %v7491_v11 = vld [vmem:[#allocation18 + $0x104] ss:$16 sps:$4 sm:$0xff]  }
 0x15d   :  { %5708 = vmatpush3.bf16.msra.mxu0 %v5498_v6  ;;  %5733 = vmatpush1.bf16.msra.mxu1 %v7454_v18  ;;  %v7484_v6 = vld [vmem:[#allocation18 + $0xa0] ss:$16 sps:$4 sm:$0xff]   ;;  %v7494_v13 = vld [vmem:[#allocation18 + $0x124] ss:$16 sps:$4 sm:$0xff]  }
 0x15e   :  { %5709 = vmatprep.subr.bf16.mxu0 %v8048_v0  ;;  %5735 = vmatprep.subr.bf16.mxu1 %v7455_v19  ;;  %v7497_v15 = vld [vmem:[#allocation18 + $0x144] ss:$16 sps:$4 sm:$0xff]   ;;  %v7502_v18 = vld [vmem:[#allocation18 + $0x160] ss:$16 sps:$4 sm:$0xff]  }
 0x15f   :  { %v7500_v17 = vld [vmem:[#allocation18 + $0x164] ss:$16 sps:$4 sm:$0xff]  }
 0x160   :  { %v7503_v19 = vld [vmem:[#allocation18 + $0x184] ss:$16 sps:$4 sm:$0xff]  }
 0x161   :  { %5711 = vmatpush3.bf16.msra.mxu0 %v5499_v7  ;;  %5737 = vmatpush1.bf16.msra.mxu1 %v7457_v20  ;;  %v7485_v7 = vld [vmem:[#allocation18 + $0xc4] ss:$16 sps:$4 sm:$0xff]   ;;  %v7505_v20 = vld [vmem:[#allocation18 + $0x180] ss:$16 sps:$4 sm:$0xff]  }
 0x162   :  { %5712 = vmatprep.subr.bf16.mxu0 %v8048_v0  ;;  %5739 = vmatprep.subr.bf16.mxu1 %v7458_v21  ;;  %v7506_v21 = vld [vmem:[#allocation18 + $0x1a4] ss:$16 sps:$4 sm:$0xff]  }
 0x165   :  { %5714 = vmatpush3.bf16.msra.mxu0 %v5500_v8  ;;  %5741 = vmatpush1.bf16.msra.mxu1 %v7460_v22  ;;  %v7487_v8 = vld [vmem:[#allocation18 + $0xc0] ss:$16 sps:$4 sm:$0xff]  }
 0x166   :  { %5715 = vmatprep.subr.bf16.mxu0 %v8048_v0  ;;  %5743 = vmatprep.subr.bf16.mxu1 %v7461_v23  ;;  %v7475_v0 = vld [vmem:[#allocation18 + $0x40] ss:$16 sps:$4 sm:$0xff]   ;;  %v7509_v23 = vld [vmem:[#allocation18 + $0x1c4] ss:$16 sps:$4 sm:$0xff]  }
 0x167   :  { %v7508_v22 = vld [vmem:[#allocation18 + $0x1a0] ss:$16 sps:$4 sm:$0xff]  }
 0x169   :  { %5717 = vmatpush3.bf16.msra.mxu0 %v5501_v9  ;;  %5745 = vmatpush1.bf16.msra.mxu1 %v7463_v24  ;;  %v7488_v9 = vld [vmem:[#allocation18 + $0xe4] ss:$16 sps:$4 sm:$0xff]   ;;  %v7511_v24 = vld [vmem:[#allocation18 + $0x1c0] ss:$16 sps:$4 sm:$0xff]  }
 0x16a   :  { %5747 = vmatprep.subr.bf16.mxu1 %v7464_v25  ;;  %v7512_v25 = vld [vmem:[#allocation18 + $0x1e4] ss:$16 sps:$4 sm:$0xff]  }
 0x16c   :  { %5692 = vmatmul.mubr.f32.vlgmr.msra.gmra.mrb[0].mxu0 %v319_v10  ;;  %v7490_v10 = vld [vmem:[#allocation18 + $0xe0] ss:$16 sps:$4 sm:$0xff]  }
 0x16d   :  { %5749 = vmatpush1.bf16.msra.mxu1 %v7466_v26  ;;  %v7514_v26 = vld [vmem:[#allocation18 + $0x1e0] ss:$16 sps:$4 sm:$0xff]  }
 0x16e   :  { %5751 = vmatprep.subr.bf16.mxu1 %v7467_v59 }
 0x23f   :  { %v425_v28 = vpop.f32.mrb[0].mxu0 }
 0x240   :  { %v426_v29 = vadd.f32 %v5451_v27, %v425_v28  ;;  %v5693_v30 = vpop.f32.mrb[1].mxu0  ;;  %v7515_v27 = vld [vmem:[#allocation18 + $0xc] ss:$16 sps:$4 sm:$0xff]   ;;  %v520_v28 = vlaneseq }
 0x242   :  { %v431_v31 = vrot.slane %v426_v29, 4 }
 0x244   :  { %v432_v32 = vadd.f32 %v431_v31, %v426_v29  ;;  %v518_v31 = vld [vmem:[#allocation13] sm:$0x3] }
 0x246   :  { %v433_v33 = vrot.slane %v432_v32, 2 }
 0x248   :  { %v434_v34 = vadd.f32 %v433_v33, %v432_v32 }
 0x24a   :  { %v435_v35 = vrot.slane %v434_v34, 1 }
 0x24c   :  { %v436_v36 = vadd.f32 %v435_v35, %v434_v34 }
 0x24e   :  { %v438_v37 = vmul.f32 0.125, %v436_v36 }
 0x250   :  { %v439_v38 = vsub.f32 %v426_v29, %v438_v37  ;;  %v8399_v29 = vshrl.u32 %v520_v28, 7 }
 0x252   :  { %v440_v39 = vmul.f32 %v439_v38, %v439_v38  ;;  %v8402_v30 = vsub.s32 0, %v8399_v29  ;;  %v8405_v32 = vsub.s32 1, %v8399_v29 }
 0x254   :  { %v441_v40 = vrot.slane %v440_v39, 4  ;;  %v523_v33 = vrot.slane %v518_v31, %v8402_v30  ;;  %v527_v34 = vrot.slane %v518_v31, %v8405_v32 }
 0x256   :  { %v442_v41 = vadd.f32 %v441_v40, %v440_v39 }
 0x258   :  { %v443_v42 = vrot.slane %v442_v41, 2 }
 0x25a   :  { %v444_v43 = vadd.f32 %v443_v42, %v442_v41 }
 0x25c   :  { %v445_v44 = vrot.slane %v444_v43, 1 }
 0x25e   :  { %v446_v45 = vadd.f32 %v445_v44, %v444_v43 }
 0x260   :  { %v447_v46 = vmul.f32 0.125, %v446_v45 }
 0x262   :  { %v448_v47 = vadd.f32 1e-05, %v447_v46 }
 0x264   :  { %7563 = vrsqrt.f32 %v448_v47 }
 0x26e   :  { %v7564_v48 = vpop.eup %7563 }
 0x26f   :  { %v450_v50 = vmul.f32 %v7564_v48, %v439_v38 }
 0x271   :  { %v457_v52 = vmul.f32 %v5452_v49, %v450_v50 }
 0x273   :  { %v464_v53 = vadd.f32 %v5453_v51, %v457_v52 }
 0x275   :  { %v466_v54 = vmul.f32 0.70710677, %v464_v53  ;;  %v465_v56 = vmul.f32 0.5, %v464_v53 }
 0x277   :  { %7565 = verf.f32 %v466_v54 }
 0x281   :  { %v7566_v55 = vpop.eup %7565 }
 0x282   :  { %v468_v57 = vadd.f32 1.0, %v7566_v55 }
 0x284   :  { %v469_v58 = vmul.f32 %v468_v57, %v465_v56 }
 0x286   :  { %595 = vmatmul.mubr.f32.vlgmr.msra.gmra.mrb[0].mxu1 %v469_v58 }
 0x287   :  { %5753 = vmatpush1.bf16.msra.mxu1 %v7469_v60 }
 0x288   :  { %5755 = vmatprep.subr.bf16.mxu1 %v7470_v61 }
 0x28b   :  { %5757 = vmatpush1.bf16.msra.mxu1 %v7472_v62 }
 0x28c   :  { %5759 = vmatprep.subr.bf16.mxu1 %v7473_v63 }
 0x28f   :  { %5761 = vmatpush1.bf16.msra.mxu1 %v7475_v0 }
 0x290   :  { %5763 = vmatprep.subr.bf16.mxu1 %v7476_v1 }
 0x293   :  { %5765 = vmatpush1.bf16.msra.mxu1 %v7478_v2 }
 0x294   :  { %5767 = vmatprep.subr.bf16.mxu1 %v7479_v3 }
 0x297   :  { %5769 = vmatpush1.bf16.msra.mxu1 %v7481_v4 }
 0x298   :  { %5771 = vmatprep.subr.bf16.mxu1 %v7482_v5 }
 0x29b   :  { %5773 = vmatpush1.bf16.msra.mxu1 %v7484_v6 }
 0x29c   :  { %5775 = vmatprep.subr.bf16.mxu1 %v7485_v7 }
 0x29f   :  { %5777 = vmatpush1.bf16.msra.mxu1 %v7487_v8 }
 0x2a0   :  { %5779 = vmatprep.subr.bf16.mxu1 %v7488_v9  ;;  %v601_v9 = vld [vmem:[#allocation15] sm:$0x3] }
 0x2a3   :  { %5781 = vmatpush1.bf16.msra.mxu1 %v7490_v10  ;;  %v602_v10 = vld [vmem:[#allocation16] sm:$0x3] }
 0x2a4   :  { %5783 = vmatprep.subr.bf16.mxu1 %v7491_v11  ;;  %v645_v11 = vrot.slane %v601_v9, %v8402_v30 }
 0x2a7   :  { %5785 = vmatpush1.bf16.msra.mxu1 %v7493_v12 }
 0x2a8   :  { %5787 = vmatprep.subr.bf16.mxu1 %v7494_v13  ;;  %v649_v13 = vrot.slane %v601_v9, %v8405_v32 }
 0x2ab   :  { %5789 = vmatpush1.bf16.msra.mxu1 %v7496_v14 }
 0x2ac   :  { %5791 = vmatprep.subr.bf16.mxu1 %v7497_v15 }
 0x2af   :  { %5793 = vmatpush1.bf16.msra.mxu1 %v7499_v16  ;;  %v658_v16 = vrot.slane %v602_v10, %v8402_v30 }
 0x2b0   :  { %5795 = vmatprep.subr.bf16.mxu1 %v7500_v17 }
 0x2b3   :  { %5797 = vmatpush1.bf16.msra.mxu1 %v7502_v18  ;;  %v662_v18 = vrot.slane %v602_v10, %v8405_v32 }
 0x2b4   :  { %5799 = vmatprep.subr.bf16.mxu1 %v7503_v19 }
 0x2b7   :  { %5801 = vmatpush1.bf16.msra.mxu1 %v7505_v20 }
 0x2b8   :  { %5803 = vmatprep.subr.bf16.mxu1 %v7506_v21 }
 0x2bb   :  { %5805 = vmatpush1.bf16.msra.mxu1 %v7508_v22 }
 0x2bc   :  { %5807 = vmatprep.subr.bf16.mxu1 %v7509_v23 }
 0x2bf   :  { %5809 = vmatpush1.bf16.msra.mxu1 %v7511_v24 }
 0x2c0   :  { %5811 = vmatprep.subr.bf16.mxu1 %v7512_v25 }
 0x2c3   :  { %5813 = vmatpush1.bf16.msra.mxu1 %v7514_v26 }
 0x2c4   :  { %5815 = vmatprep.subr.bf16.mxu1 %v7515_v27 }
 0x359   :  { %v596_v35 = vpop.f32.mrb[0].mxu1 }
 0x35a   :  { %v597_v36 = vadd.f32 %v596_v35, %v523_v33  ;;  %v598_v37 = vpop.f32.mrb[1].mxu1  ;;  %v7517_v35 = vld [vmem:[#allocation18 + $0x8] ss:$16 sps:$4 sm:$0xff]  }
 0x35b   :  { %v599_v38 = vadd.f32 %v598_v37, %v527_v34  ;;  %v7518_v37 = vld [vmem:[#allocation18 + $0x2c] ss:$16 sps:$4 sm:$0xff]  }
 0x35c   :  { %v603_v39 = vrot.slane %v597_v36, 4 }
 0x35d   :  { %v609_v40 = vrot.slane %v599_v38, 4 }
 0x35e   :  { %v604_v41 = vadd.f32 %v603_v39, %v597_v36  ;;  %v7521_v39 = vld [vmem:[#allocation18 + $0x4c] ss:$16 sps:$4 sm:$0xff]  }
 0x35f   :  { %v610_v42 = vadd.f32 %v609_v40, %v599_v38  ;;  %v7523_v40 = vld [vmem:[#allocation18 + $0x48] ss:$16 sps:$4 sm:$0xff]  }
 0x360   :  { %v605_v43 = vrot.slane %v604_v41, 2 }
 0x361   :  { %v611_v44 = vrot.slane %v610_v42, 2 }
 0x362   :  { %v606_v45 = vadd.f32 %v605_v43, %v604_v41  ;;  %v7524_v41 = vld [vmem:[#allocation18 + $0x6c] ss:$16 sps:$4 sm:$0xff]  }
 0x363   :  { %v612_v46 = vadd.f32 %v611_v44, %v610_v42  ;;  %v7526_v42 = vld [vmem:[#allocation18 + $0x68] ss:$16 sps:$4 sm:$0xff]   ;;  %v7527_v43 = vld [vmem:[#allocation18 + $0x8c] ss:$16 sps:$4 sm:$0xff]  }
 0x364   :  { %v607_v47 = vrot.slane %v606_v45, 1  ;;  %v7529_v44 = vld [vmem:[#allocation18 + $0x88] ss:$16 sps:$4 sm:$0xff]  }
 0x365   :  { %v613_v48 = vrot.slane %v612_v46, 1 }
 0x366   :  { %v608_v49 = vadd.f32 %v607_v47, %v606_v45  ;;  %v7530_v45 = vld [vmem:[#allocation18 + $0xac] ss:$16 sps:$4 sm:$0xff]  }
 0x367   :  { %v614_v50 = vadd.f32 %v613_v48, %v612_v46  ;;  %v7532_v46 = vld [vmem:[#allocation18 + $0xa8] ss:$16 sps:$4 sm:$0xff]   ;;  %v7533_v47 = vld [vmem:[#allocation18 + $0xcc] ss:$16 sps:$4 sm:$0xff]  }
 0x368   :  { %v615_v51 = vmul.f32 0.125, %v608_v49  ;;  %v7535_v48 = vld [vmem:[#allocation18 + $0xc8] ss:$16 sps:$4 sm:$0xff]   ;;  %v7536_v49 = vld [vmem:[#allocation18 + $0xec] ss:$16 sps:$4 sm:$0xff]  }
 0x369   :  { %v616_v52 = vmul.f32 0.125, %v614_v50  ;;  %v7538_v50 = vld [vmem:[#allocation18 + $0xe8] ss:$16 sps:$4 sm:$0xff]  }
 0x36a   :  { %v617_v53 = vsub.f32 %v597_v36, %v615_v51  ;;  %v7539_v51 = vld [vmem:[#allocation18 + $0x10c] ss:$16 sps:$4 sm:$0xff]  }
 0x36b   :  { %v618_v54 = vsub.f32 %v599_v38, %v616_v52  ;;  %v7520_v38 = vld [vmem:[#allocation18 + $0x28] ss:$16 sps:$4 sm:$0xff]  }
 0x36c   :  { %v619_v55 = vmul.f32 %v617_v53, %v617_v53  ;;  %v7541_v52 = vld [vmem:[#allocation18 + $0x108] ss:$16 sps:$4 sm:$0xff]  }
 0x36d   :  { %v620_v56 = vmul.f32 %v618_v54, %v618_v54 }
 0x36e   :  { %v621_v57 = vrot.slane %v619_v55, 4 }
 0x36f   :  { %v627_v58 = vrot.slane %v620_v56, 4 }
 0x370   :  { %v622_v59 = vadd.f32 %v621_v57, %v619_v55  ;;  %v7545_v55 = vld [vmem:[#allocation18 + $0x14c] ss:$16 sps:$4 sm:$0xff]  }
 0x371   :  { %v628_v60 = vadd.f32 %v627_v58, %v620_v56  ;;  %v7547_v56 = vld [vmem:[#allocation18 + $0x148] ss:$16 sps:$4 sm:$0xff]   ;;  %v7548_v57 = vld [vmem:[#allocation18 + $0x16c] ss:$16 sps:$4 sm:$0xff]  }
 0x372   :  { %v623_v61 = vrot.slane %v622_v59, 2  ;;  %v7550_v58 = vld [vmem:[#allocation18 + $0x168] ss:$16 sps:$4 sm:$0xff]  }
 0x373   :  { %v629_v62 = vrot.slane %v628_v60, 2 }
 0x374   :  { %v624_v63 = vadd.f32 %v623_v61, %v622_v59  ;;  %v7551_v59 = vld [vmem:[#allocation18 + $0x18c] ss:$16 sps:$4 sm:$0xff]  }
 0x375   :  { %v630_v0 = vadd.f32 %v629_v62, %v628_v60  ;;  %v7553_v60 = vld [vmem:[#allocation18 + $0x188] ss:$16 sps:$4 sm:$0xff]   ;;  %v7554_v61 = vld [vmem:[#allocation18 + $0x1ac] ss:$16 sps:$4 sm:$0xff]  }
 0x376   :  { %v625_v1 = vrot.slane %v624_v63, 1  ;;  %v7556_v62 = vld [vmem:[#allocation18 + $0x1a8] ss:$16 sps:$4 sm:$0xff]  }
 0x377   :  { %v631_v2 = vrot.slane %v630_v0, 1 }
 0x378   :  { %v626_v3 = vadd.f32 %v625_v1, %v624_v63  ;;  %v7557_v63 = vld [vmem:[#allocation18 + $0x1cc] ss:$16 sps:$4 sm:$0xff]  }
 0x379   :  { %v632_v4 = vadd.f32 %v631_v2, %v630_v0  ;;  %v7559_v0 = vld [vmem:[#allocation18 + $0x1c8] ss:$16 sps:$4 sm:$0xff]   ;;  %v7560_v1 = vld [vmem:[#allocation18 + $0x1ec] ss:$16 sps:$4 sm:$0xff]  }
 0x37a   :  { %v633_v5 = vmul.f32 0.125, %v626_v3  ;;  %v7562_v2 = vld [vmem:[#allocation18 + $0x1e8] ss:$16 sps:$4 sm:$0xff]   ;;  %v8417_v3 = vld [vmem:[#allocation19] sm:$0xf] }
 0x37b   :  { %v634_v6 = vmul.f32 0.125, %v632_v4  ;;  %v874_v4 = vrot.slane %v8417_v3, %v8402_v30 }
 0x37c   :  { %v635_v7 = vadd.f32 1e-05, %v633_v5  ;;  %v878_v5 = vrot.slane %v8417_v3, %v8405_v32 }
 0x37d   :  { %v636_v8 = vadd.f32 1e-05, %v634_v6 }
 0x37e   :  { %7567 = vrsqrt.f32 %v635_v7 }
 0x37f   :  { %7569 = vrsqrt.f32 %v636_v8 }
 0x388   :  { %v7568_v12 = vpop.eup %7567 }
 0x389   :  { %v7570_v14 = vpop.eup %7569  ;;  %v639_v15 = vmul.f32 %v7568_v12, %v617_v53  ;;  %v7542_v53 = vld [vmem:[#allocation18 + $0x12c] ss:$16 sps:$4 sm:$0xff]  }
 0x38a   :  { %v640_v17 = vmul.f32 %v7570_v14, %v618_v54  ;;  %v7544_v54 = vld [vmem:[#allocation18 + $0x128] ss:$16 sps:$4 sm:$0xff]  }
 0x38b   :  { %v652_v19 = vmul.f32 %v645_v11, %v639_v15 }
 0x38c   :  { %v653_v20 = vmul.f32 %v649_v13, %v640_v17 }
 0x38d   :  { %v665_v21 = vadd.f32 %v658_v16, %v652_v19 }
 0x38e   :  { %v666_v22 = vadd.f32 %v662_v18, %v653_v20 }
 0x38f   :  { %v669_v23 = vmul.f32 0.70710677, %v665_v21  ;;  %v667_v33 = vmul.f32 0.5, %v665_v21 }
 0x390   :  { %v670_v24 = vmul.f32 0.70710677, %v666_v22  ;;  %v668_v28 = vmul.f32 0.5, %v666_v22 }
 0x391   :  { %7571 = verf.f32 %v669_v23 }
 0x392   :  { %7573 = verf.f32 %v670_v24 }
 0x39b   :  { %v7572_v25 = vpop.eup %7571 }
 0x39c   :  { %v7574_v26 = vpop.eup %7573  ;;  %v673_v27 = vadd.f32 1.0, %v7572_v25 }
 0x39d   :  { %v674_v31 = vadd.f32 1.0, %v7574_v26 }
 0x39e   :  { %v8413_v36 = vmul.f32 %v673_v27, %v667_v33 }
 0x39f   :  { %v676_v34 = vmul.f32 %v674_v31, %v668_v28 }
 0x3a1   :  { %955 = vmatprep.mubr.f32.mxu1 %v676_v34 }
 0x3a2   :  { %956 = vmatmul.mubr.f32.vlgmr.msra.gmra.mrb[2].mxu1 %v8413_v36 }
 0x3a3   :  { %5817 = vmatpush1.bf16.msra.mxu1 %v7517_v35  ;;  %1026 = vmatprep.mubr.f32.mxu1 %v676_v34 }
 0x3a4   :  { %5819 = vmatprep.subr.bf16.mxu1 %v7518_v37 }
 0x3a7   :  { %5821 = vmatpush1.bf16.msra.mxu1 %v7520_v38 }
 0x3a8   :  { %5823 = vmatprep.subr.bf16.mxu1 %v7521_v39 }
 0x3ab   :  { %5825 = vmatpush1.bf16.msra.mxu1 %v7523_v40 }
 0x3ac   :  { %5827 = vmatprep.subr.bf16.mxu1 %v7524_v41 }
 0x3af   :  { %5829 = vmatpush1.bf16.msra.mxu1 %v7526_v42 }
 0x3b0   :  { %5831 = vmatprep.subr.bf16.mxu1 %v7527_v43 }
 0x3b3   :  { %5833 = vmatpush1.bf16.msra.mxu1 %v7529_v44 }
 0x3b4   :  { %5835 = vmatprep.subr.bf16.mxu1 %v7530_v45 }
 0x3b7   :  { %5837 = vmatpush1.bf16.msra.mxu1 %v7532_v46 }
 0x3b8   :  { %5839 = vmatprep.subr.bf16.mxu1 %v7533_v47  ;;  %v8423_v47 = vld [vmem:[#allocation21] sm:$0xf] }
 0x3bb   :  { %5841 = vmatpush1.bf16.msra.mxu1 %v7535_v48  ;;  %v8425_v48 = vld [vmem:[#allocation22] sm:$0xf] }
 0x3bc   :  { %5843 = vmatprep.subr.bf16.mxu1 %v7536_v49  ;;  %v1115_v49 = vrot.slane %v8423_v47, %v8402_v30 }
 0x3bf   :  { %5845 = vmatpush1.bf16.msra.mxu1 %v7538_v50 }
 0x3c0   :  { %5847 = vmatprep.subr.bf16.mxu1 %v7539_v51  ;;  %v1119_v51 = vrot.slane %v8423_v47, %v8405_v32 }
 0x3c3   :  { %5849 = vmatpush1.bf16.msra.mxu1 %v7541_v52 }
 0x3c4   :  { %5851 = vmatprep.subr.bf16.mxu1 %v7542_v53 }
 0x3c7   :  { %5853 = vmatpush1.bf16.msra.mxu1 %v7544_v54  ;;  %v1140_v54 = vrot.slane %v8425_v48, %v8402_v30 }
 0x3c8   :  { %5855 = vmatprep.subr.bf16.mxu1 %v7545_v55 }
 0x3cb   :  { %5857 = vmatpush1.bf16.msra.mxu1 %v7547_v56  ;;  %v1144_v56 = vrot.slane %v8425_v48, %v8405_v32 }
 0x3cc   :  { %5859 = vmatprep.subr.bf16.mxu1 %v7548_v57 }
 0x3cf   :  { %5861 = vmatpush1.bf16.msra.mxu1 %v7550_v58 }
 0x3d0   :  { %5863 = vmatprep.subr.bf16.mxu1 %v7551_v59 }
 0x3d3   :  { %5865 = vmatpush1.bf16.msra.mxu1 %v7553_v60 }
 0x3d4   :  { %5867 = vmatprep.subr.bf16.mxu1 %v7554_v61 }
 0x3d7   :  { %5869 = vmatpush1.bf16.msra.mxu1 %v7556_v62 }
 0x3d8   :  { %5871 = vmatprep.subr.bf16.mxu1 %v7557_v63  ;;  %v8436_v63 = vsub.s32 2, %v8399_v29 }
 0x3db   :  { %5873 = vmatpush1.bf16.msra.mxu1 %v7559_v0  ;;  %v8439_v0 = vsub.s32 3, %v8399_v29 }
 0x3dc   :  { %5875 = vmatprep.subr.bf16.mxu1 %v7560_v1  ;;  %v882_v1 = vrot.slane %v8417_v3, %v8436_v63 }
 0x3df   :  { %5877 = vmatpush1.bf16.msra.mxu1 %v7562_v2  ;;  %v886_v2 = vrot.slane %v8417_v3, %v8439_v0 }
 0x3e2   :  { %1027 = vmatmul.mubr.f32.vlgmr.msra.gmra.mrb[4].mxu1 %v8413_v36 }
 0x475   :  { %v957_v6 = vpop.f32.mrb[2].mxu1 }
 0x476   :  { %v958_v7 = vadd.f32 %v957_v6, %v874_v4  ;;  %v959_v8 = vpop.f32.mrb[3].mxu1 }
 0x477   :  { %v960_v9 = vadd.f32 %v959_v8, %v878_v5 }
 0x478   :  { %v1035_v10 = vrot.slane %v958_v7, 4 }
 0x479   :  { %v1041_v11 = vrot.slane %v960_v9, 4 }
 0x47a   :  { %v1036_v12 = vadd.f32 %v1035_v10, %v958_v7 }
 0x47b   :  { %v1042_v13 = vadd.f32 %v1041_v11, %v960_v9 }
 0x47c   :  { %v1037_v14 = vrot.slane %v1036_v12, 2 }
 0x47d   :  { %v1043_v15 = vrot.slane %v1042_v13, 2 }
 0x47e   :  { %v1038_v16 = vadd.f32 %v1037_v14, %v1036_v12 }
 0x47f   :  { %v1044_v17 = vadd.f32 %v1043_v15, %v1042_v13 }
 0x480   :  { %v1039_v18 = vrot.slane %v1038_v16, 1 }
 0x481   :  { %v1045_v19 = vrot.slane %v1044_v17, 1 }
 0x482   :  { %v1040_v20 = vadd.f32 %v1039_v18, %v1038_v16 }
 0x483   :  { %v1046_v21 = vadd.f32 %v1045_v19, %v1044_v17 }
 0x484   :  { %v1059_v22 = vmul.f32 0.125, %v1040_v20 }
 0x485   :  { %v1060_v23 = vmul.f32 0.125, %v1046_v21 }
 0x486   :  { %v1063_v24 = vsub.f32 %v958_v7, %v1059_v22 }
 0x487   :  { %v1064_v25 = vsub.f32 %v960_v9, %v1060_v23 }
 0x488   :  { %v1067_v26 = vmul.f32 %v1063_v24, %v1063_v24 }
 0x489   :  { %v1068_v27 = vmul.f32 %v1064_v25, %v1064_v25 }
 0x48a   :  { %v1071_v28 = vrot.slane %v1067_v26, 4 }
 0x48b   :  { %v1077_v31 = vrot.slane %v1068_v27, 4 }
 0x48c   :  { %v1072_v33 = vadd.f32 %v1071_v28, %v1067_v26 }
 0x48d   :  { %v1078_v34 = vadd.f32 %v1077_v31, %v1068_v27 }
 0x48e   :  { %v1073_v35 = vrot.slane %v1072_v33, 2 }
 0x48f   :  { %v1079_v36 = vrot.slane %v1078_v34, 2 }
 0x490   :  { %v1074_v37 = vadd.f32 %v1073_v35, %v1072_v33 }
 0x491   :  { %v1080_v38 = vadd.f32 %v1079_v36, %v1078_v34 }
 0x492   :  { %v1075_v39 = vrot.slane %v1074_v37, 1 }
 0x493   :  { %v1081_v40 = vrot.slane %v1080_v38, 1 }
 0x494   :  { %v1076_v41 = vadd.f32 %v1075_v39, %v1074_v37 }
 0x495   :  { %v1082_v42 = vadd.f32 %v1081_v40, %v1080_v38 }
 0x496   :  { %v1095_v43 = vmul.f32 0.125, %v1076_v41 }
 0x497   :  { %v1096_v44 = vmul.f32 0.125, %v1082_v42 }
 0x498   :  { %v1099_v45 = vadd.f32 1e-05, %v1095_v43 }
 0x499   :  { %v1100_v46 = vadd.f32 1e-05, %v1096_v44 }
 0x49a   :  { %7575 = vrsqrt.f32 %v1099_v45 }
 0x49b   :  { %7577 = vrsqrt.f32 %v1100_v46 }
 0x4a4   :  { %v7576_v50 = vpop.eup %7575 }
 0x4a5   :  { %v7578_v52 = vpop.eup %7577  ;;  %v1107_v53 = vmul.f32 %v7576_v50, %v1063_v24 }
 0x4a6   :  { %v1108_v55 = vmul.f32 %v7578_v52, %v1064_v25 }
 0x4a7   :  { %v1132_v57 = vmul.f32 %v1115_v49, %v1107_v53 }
 0x4a8   :  { %v1133_v58 = vmul.f32 %v1119_v51, %v1108_v55 }
 0x4a9   :  { %v1157_v59 = vadd.f32 %v1140_v54, %v1132_v57  ;;  %v1123_v54 = vrot.slane %v8423_v47, %v8436_v63 }
 0x4aa   :  { %v1158_v60 = vadd.f32 %v1144_v56, %v1133_v58  ;;  %v1127_v56 = vrot.slane %v8423_v47, %v8439_v0 }
 0x4ab   :  { %v1165_v61 = vmul.f32 0.70710677, %v1157_v59  ;;  %v1161_v10 = vmul.f32 0.5, %v1157_v59  ;;  %v1148_v59 = vrot.slane %v8425_v48, %v8436_v63 }
 0x4ac   :  { %v1166_v62 = vmul.f32 0.70710677, %v1158_v60  ;;  %v1162_v13 = vmul.f32 0.5, %v1158_v60 }
 0x4ad   :  { %7579 = verf.f32 %v1165_v61  ;;  %v1152_v61 = vrot.slane %v8425_v48, %v8439_v0 }
 0x4ae   :  { %7581 = verf.f32 %v1166_v62 }
 0x4b5   :  { %v1028_v4 = vpop.f32.mrb[4].mxu1 }
 0x4b6   :  { %v1029_v5 = vadd.f32 %v1028_v4, %v882_v1  ;;  %v1030_v6 = vpop.f32.mrb[5].mxu1 }
 0x4b7   :  { %v7580_v7 = vpop.eup %7579  ;;  %v1031_v8 = vadd.f32 %v1030_v6, %v886_v2 }
 0x4b8   :  { %v7582_v9 = vpop.eup %7581  ;;  %v1173_v11 = vadd.f32 1.0, %v7580_v7  ;;  %v1047_v12 = vrot.slane %v1029_v5, 4 }
 0x4b9   :  { %v1174_v14 = vadd.f32 1.0, %v7582_v9  ;;  %v1053_v15 = vrot.slane %v1031_v8, 4 }
 0x4ba   :  { %v8445_v16 = vmul.f32 %v1173_v11, %v1161_v10  ;;  %v1048_v17 = vadd.f32 %v1047_v12, %v1029_v5 }
 0x4bb   :  { %v8447_v18 = vmul.f32 %v1174_v14, %v1162_v13  ;;  %v1054_v19 = vadd.f32 %v1053_v15, %v1031_v8 }
 0x4bc   :  { %v1049_v20 = vrot.slane %v1048_v17, 2 }
 0x4bd   :  { %v1055_v3 = vrot.slane %v1054_v19, 2 }
 0x4be   :  { %v1050_v21 = vadd.f32 %v1049_v20, %v1048_v17 }
 0x4bf   :  { %v1056_v22 = vadd.f32 %v1055_v3, %v1054_v19 }
 0x4c0   :  { %v1051_v23 = vrot.slane %v1050_v21, 1 }
 0x4c1   :  { %v1057_v24 = vrot.slane %v1056_v22, 1 }
 0x4c2   :  { %v1052_v25 = vadd.f32 %v1051_v23, %v1050_v21 }
 0x4c3   :  { %v1058_v26 = vadd.f32 %v1057_v24, %v1056_v22 }
 0x4c4   :  { %v1061_v27 = vmul.f32 0.125, %v1052_v25 }
 0x4c5   :  { %v1062_v28 = vmul.f32 0.125, %v1058_v26 }
 0x4c6   :  { %v1065_v31 = vsub.f32 %v1029_v5, %v1061_v27 }
 0x4c7   :  { %v1066_v33 = vsub.f32 %v1031_v8, %v1062_v28 }
 0x4c8   :  { %v1069_v34 = vmul.f32 %v1065_v31, %v1065_v31 }
 0x4c9   :  { %v1070_v35 = vmul.f32 %v1066_v33, %v1066_v33 }
 0x4ca   :  { %v1083_v36 = vrot.slane %v1069_v34, 4 }
 0x4cb   :  { %v1089_v37 = vrot.slane %v1070_v35, 4 }
 0x4cc   :  { %v1084_v38 = vadd.f32 %v1083_v36, %v1069_v34 }
 0x4cd   :  { %v1090_v39 = vadd.f32 %v1089_v37, %v1070_v35 }
 0x4ce   :  { %v1085_v40 = vrot.slane %v1084_v38, 2 }
 0x4cf   :  { %v1091_v41 = vrot.slane %v1090_v39, 2 }
 0x4d0   :  { %v1086_v42 = vadd.f32 %v1085_v40, %v1084_v38 }
 0x4d1   :  { %v1092_v43 = vadd.f32 %v1091_v41, %v1090_v39 }
 0x4d2   :  { %v1087_v44 = vrot.slane %v1086_v42, 1 }
 0x4d3   :  { %v1093_v45 = vrot.slane %v1092_v43, 1 }
 0x4d4   :  { %v1088_v46 = vadd.f32 %v1087_v44, %v1086_v42 }
 0x4d5   :  { %v1094_v49 = vadd.f32 %v1093_v45, %v1092_v43 }
 0x4d6   :  { %v1097_v50 = vmul.f32 0.125, %v1088_v46 }
 0x4d7   :  { %v1098_v51 = vmul.f32 0.125, %v1094_v49 }
 0x4d8   :  { %v1101_v52 = vadd.f32 1e-05, %v1097_v50 }
 0x4d9   :  { %v1102_v53 = vadd.f32 1e-05, %v1098_v51 }
 0x4da   :  { %7583 = vrsqrt.f32 %v1101_v52 }
 0x4db   :  { %7585 = vrsqrt.f32 %v1102_v53 }
 0x4e4   :  { %v7584_v55 = vpop.eup %7583 }
 0x4e5   :  { %v7586_v57 = vpop.eup %7585  ;;  %v1109_v58 = vmul.f32 %v7584_v55, %v1065_v31 }
 0x4e6   :  { %v1110_v60 = vmul.f32 %v7586_v57, %v1066_v33 }
 0x4e7   :  { %v1134_v62 = vmul.f32 %v1123_v54, %v1109_v58 }
 0x4e8   :  { %v1135_v1 = vmul.f32 %v1127_v56, %v1110_v60 }
 0x4e9   :  { %v1159_v2 = vadd.f32 %v1148_v59, %v1134_v62 }
 0x4ea   :  { %v1160_v4 = vadd.f32 %v1152_v61, %v1135_v1 }
 0x4eb   :  { %v1167_v5 = vmul.f32 0.70710677, %v1159_v2  ;;  %v1163_v47 = vmul.f32 0.5, %v1159_v2 }
 0x4ec   :  { %v1168_v6 = vmul.f32 0.70710677, %v1160_v4  ;;  %v1164_v10 = vmul.f32 0.5, %v1160_v4 }
 0x4ed   :  { %7587 = verf.f32 %v1167_v5 }
 0x4ee   :  { %7589 = verf.f32 %v1168_v6 }
 0x4f7   :  { %v7588_v7 = vpop.eup %7587 }
 0x4f8   :  { %v7590_v8 = vpop.eup %7589  ;;  %v1175_v9 = vadd.f32 1.0, %v7588_v7 }
 0x4f9   :  { %v1176_v11 = vadd.f32 1.0, %v7590_v8 }
 0x4fa   :  { %v8457_v12 = vmul.f32 %v1175_v9, %v1163_v47 }
 0x4fb   :  { %v8459_v13 = vmul.f32 %v1176_v11, %v1164_v10 }
 0x4fc   :  { %8021 = dma.done.wait [#allocation4], 32768 }
 0x4fd   :  { %8022 = vsyncadd [#allocation4], 4294934528  ;;  %2059 = vmatprep.mubr.f32.mxu0 %v8447_v18  ;;  %2201 = vmatprep.mubr.f32.mxu1 %v8447_v18  ;;  %v1186_v48 = vld [vmem:[#allocation2 + $0x8] sm:$0xff]  ;;  %v1188_v14 = vld [vmem:[#allocation2 + $0x18] sm:$0xff] }
 0x4fe   :  { %v1185_v15 = vld [vmem:[#allocation2] sm:$0xff]  ;;  %5879 = vmatprep.subr.bf16.mxu0 %v1186_v48  ;;  %6007 = vmatprep.subr.bf16.mxu1 %v1188_v14  ;;  %v1187_v17 = vld [vmem:[#allocation2 + $0x10] sm:$0xff]  ;;  %v1194_v19 = vld [vmem:[#allocation2 + $0x48] sm:$0xff] }
 0x4ff   :  { %v1196_v20 = vld [vmem:[#allocation2 + $0x58] sm:$0xff]  ;;  %5881 = vmatpush1.bf16.msra.mxu0 %v1185_v15  ;;  %6009 = vmatpush1.bf16.msra.mxu1 %v1187_v17  ;;  %v1193_v3 = vld [vmem:[#allocation2 + $0x40] sm:$0xff]  ;;  %v1195_v21 = vld [vmem:[#allocation2 + $0x50] sm:$0xff] }
 0x500   :  { %5883 = vmatprep.subr.bf16.mxu0 %v1194_v19  ;;  %6011 = vmatprep.subr.bf16.mxu1 %v1196_v20  ;;  %v1202_v22 = vld [vmem:[#allocation2 + $0x88] sm:$0xff]  ;;  %v1204_v23 = vld [vmem:[#allocation2 + $0x98] sm:$0xff]  ;;  %v1201_v24 = vld [vmem:[#allocation2 + $0x80] sm:$0xff] }
 0x501   :  { %v1203_v25 = vld [vmem:[#allocation2 + $0x90] sm:$0xff]  ;;  %v1210_v26 = vld [vmem:[#allocation2 + $0xc8] sm:$0xff]  ;;  %v1212_v27 = vld [vmem:[#allocation2 + $0xd8] sm:$0xff] }
 0x502   :  { %v1209_v28 = vld [vmem:[#allocation2 + $0xc0] sm:$0xff]  ;;  %v1211_v31 = vld [vmem:[#allocation2 + $0xd0] sm:$0xff]  ;;  %v1218_v33 = vld [vmem:[#allocation2 + $0x108] sm:$0xff] }
 0x503   :  { %5885 = vmatpush1.bf16.msra.mxu0 %v1193_v3  ;;  %6013 = vmatpush1.bf16.msra.mxu1 %v1195_v21  ;;  %v1220_v34 = vld [vmem:[#allocation2 + $0x118] sm:$0xff]  ;;  %v1217_v35 = vld [vmem:[#allocation2 + $0x100] sm:$0xff]  ;;  %v1219_v36 = vld [vmem:[#allocation2 + $0x110] sm:$0xff] }
 0x504   :  { %5887 = vmatprep.subr.bf16.mxu0 %v1202_v22  ;;  %6015 = vmatprep.subr.bf16.mxu1 %v1204_v23  ;;  %v1226_v37 = vld [vmem:[#allocation2 + $0x148] sm:$0xff]  ;;  %v1228_v38 = vld [vmem:[#allocation2 + $0x158] sm:$0xff]  ;;  %v1225_v39 = vld [vmem:[#allocation2 + $0x140] sm:$0xff] }
 0x505   :  { %v1227_v40 = vld [vmem:[#allocation2 + $0x150] sm:$0xff]  ;;  %v1234_v41 = vld [vmem:[#allocation2 + $0x188] sm:$0xff]  ;;  %v1236_v42 = vld [vmem:[#allocation2 + $0x198] sm:$0xff] }
 0x506   :  { %v1233_v43 = vld [vmem:[#allocation2 + $0x180] sm:$0xff]  ;;  %v1235_v44 = vld [vmem:[#allocation2 + $0x190] sm:$0xff]  ;;  %v1242_v45 = vld [vmem:[#allocation2 + $0x1c8] sm:$0xff] }
 0x507   :  { %5889 = vmatpush1.bf16.msra.mxu0 %v1201_v24  ;;  %6017 = vmatpush1.bf16.msra.mxu1 %v1203_v25  ;;  %v1244_v46 = vld [vmem:[#allocation2 + $0x1d8] sm:$0xff]  ;;  %v1241_v49 = vld [vmem:[#allocation2 + $0x1c0] sm:$0xff]  ;;  %v1243_v50 = vld [vmem:[#allocation2 + $0x1d0] sm:$0xff] }
 0x508   :  { %5891 = vmatprep.subr.bf16.mxu0 %v1210_v26  ;;  %6019 = vmatprep.subr.bf16.mxu1 %v1212_v27  ;;  %v1250_v51 = vld [vmem:[#allocation2 + $0x208] sm:$0xff]  ;;  %v1252_v52 = vld [vmem:[#allocation2 + $0x218] sm:$0xff]  ;;  %v1249_v53 = vld [vmem:[#allocation2 + $0x200] sm:$0xff] }
 0x509   :  { %v1251_v54 = vld [vmem:[#allocation2 + $0x210] sm:$0xff]  ;;  %v1258_v55 = vld [vmem:[#allocation2 + $0x248] sm:$0xff]  ;;  %v1260_v56 = vld [vmem:[#allocation2 + $0x258] sm:$0xff] }
 0x50a   :  { %v1257_v57 = vld [vmem:[#allocation2 + $0x240] sm:$0xff]  ;;  %v1259_v58 = vld [vmem:[#allocation2 + $0x250] sm:$0xff]  ;;  %v1266_v59 = vld [vmem:[#allocation2 + $0x288] sm:$0xff] }
 0x50b   :  { %5893 = vmatpush1.bf16.msra.mxu0 %v1209_v28  ;;  %6021 = vmatpush1.bf16.msra.mxu1 %v1211_v31  ;;  %v1268_v60 = vld [vmem:[#allocation2 + $0x298] sm:$0xff]  ;;  %v1265_v61 = vld [vmem:[#allocation2 + $0x280] sm:$0xff]  ;;  %v1267_v62 = vld [vmem:[#allocation2 + $0x290] sm:$0xff] }
 0x50c   :  { %5895 = vmatprep.subr.bf16.mxu0 %v1218_v33  ;;  %6023 = vmatprep.subr.bf16.mxu1 %v1220_v34  ;;  %v1274_v1 = vld [vmem:[#allocation2 + $0x2c8] sm:$0xff]  ;;  %v1276_v2 = vld [vmem:[#allocation2 + $0x2d8] sm:$0xff]  ;;  %v1273_v4 = vld [vmem:[#allocation2 + $0x2c0] sm:$0xff] }
 0x50d   :  { %v1275_v5 = vld [vmem:[#allocation2 + $0x2d0] sm:$0xff]  ;;  %v1282_v6 = vld [vmem:[#allocation2 + $0x308] sm:$0xff]  ;;  %v1284_v7 = vld [vmem:[#allocation2 + $0x318] sm:$0xff] }
 0x50e   :  { %v1281_v8 = vld [vmem:[#allocation2 + $0x300] sm:$0xff]  ;;  %v1283_v47 = vld [vmem:[#allocation2 + $0x310] sm:$0xff]  ;;  %v1290_v9 = vld [vmem:[#allocation2 + $0x348] sm:$0xff] }
 0x50f   :  { %5897 = vmatpush1.bf16.msra.mxu0 %v1217_v35  ;;  %6025 = vmatpush1.bf16.msra.mxu1 %v1219_v36  ;;  %v1292_v10 = vld [vmem:[#allocation2 + $0x358] sm:$0xff]  ;;  %v1289_v11 = vld [vmem:[#allocation2 + $0x340] sm:$0xff]  ;;  %v1291_v48 = vld [vmem:[#allocation2 + $0x350] sm:$0xff] }
 0x510   :  { %5899 = vmatprep.subr.bf16.mxu0 %v1226_v37  ;;  %6027 = vmatprep.subr.bf16.mxu1 %v1228_v38  ;;  %v1298_v14 = vld [vmem:[#allocation2 + $0x388] sm:$0xff]  ;;  %v1300_v15 = vld [vmem:[#allocation2 + $0x398] sm:$0xff]  ;;  %v1297_v17 = vld [vmem:[#allocation2 + $0x380] sm:$0xff] }
 0x511   :  { %v1299_v19 = vld [vmem:[#allocation2 + $0x390] sm:$0xff]  ;;  %v1306_v20 = vld [vmem:[#allocation2 + $0x3c8] sm:$0xff]  ;;  %v1308_v3 = vld [vmem:[#allocation2 + $0x3d8] sm:$0xff] }
 0x512   :  { %v1305_v21 = vld [vmem:[#allocation2 + $0x3c0] sm:$0xff]  ;;  %v1307_v22 = vld [vmem:[#allocation2 + $0x3d0] sm:$0xff]  ;;  %v1314_v23 = vld [vmem:[#allocation2 + $0x408] sm:$0xff] }
 0x513   :  { %5901 = vmatpush1.bf16.msra.mxu0 %v1225_v39  ;;  %6029 = vmatpush1.bf16.msra.mxu1 %v1227_v40  ;;  %v1316_v24 = vld [vmem:[#allocation2 + $0x418] sm:$0xff]  ;;  %v1313_v25 = vld [vmem:[#allocation2 + $0x400] sm:$0xff]  ;;  %v1315_v26 = vld [vmem:[#allocation2 + $0x410] sm:$0xff] }
 0x514   :  { %5903 = vmatprep.subr.bf16.mxu0 %v1234_v41  ;;  %6031 = vmatprep.subr.bf16.mxu1 %v1236_v42  ;;  %v1322_v27 = vld [vmem:[#allocation2 + $0x448] sm:$0xff]  ;;  %v1324_v28 = vld [vmem:[#allocation2 + $0x458] sm:$0xff]  ;;  %v1321_v31 = vld [vmem:[#allocation2 + $0x440] sm:$0xff] }
 0x515   :  { %v1323_v33 = vld [vmem:[#allocation2 + $0x450] sm:$0xff]  ;;  %v1330_v34 = vld [vmem:[#allocation2 + $0x488] sm:$0xff]  ;;  %v1332_v35 = vld [vmem:[#allocation2 + $0x498] sm:$0xff] }
 0x516   :  { %v1329_v36 = vld [vmem:[#allocation2 + $0x480] sm:$0xff]  ;;  %v1331_v37 = vld [vmem:[#allocation2 + $0x490] sm:$0xff]  ;;  %v1338_v38 = vld [vmem:[#allocation2 + $0x4c8] sm:$0xff] }
 0x517   :  { %5905 = vmatpush1.bf16.msra.mxu0 %v1233_v43  ;;  %6033 = vmatpush1.bf16.msra.mxu1 %v1235_v44  ;;  %v1340_v39 = vld [vmem:[#allocation2 + $0x4d8] sm:$0xff]  ;;  %v1337_v40 = vld [vmem:[#allocation2 + $0x4c0] sm:$0xff]  ;;  %v1339_v41 = vld [vmem:[#allocation2 + $0x4d0] sm:$0xff] }
 0x518   :  { %5907 = vmatprep.subr.bf16.mxu0 %v1242_v45  ;;  %6035 = vmatprep.subr.bf16.mxu1 %v1244_v46  ;;  %v1346_v42 = vld [vmem:[#allocation2 + $0x508] sm:$0xff]  ;;  %v1348_v43 = vld [vmem:[#allocation2 + $0x518] sm:$0xff]  ;;  %v1345_v44 = vld [vmem:[#allocation2 + $0x500] sm:$0xff] }
 0x519   :  { %v1347_v45 = vld [vmem:[#allocation2 + $0x510] sm:$0xff]  ;;  %v1354_v46 = vld [vmem:[#allocation2 + $0x548] sm:$0xff] }
 0x51b   :  { %5909 = vmatpush1.bf16.msra.mxu0 %v1241_v49  ;;  %6037 = vmatpush1.bf16.msra.mxu1 %v1243_v50  ;;  %v1356_v49 = vld [vmem:[#allocation2 + $0x558] sm:$0xff]  ;;  %v1353_v50 = vld [vmem:[#allocation2 + $0x540] sm:$0xff] }
 0x51c   :  { %5911 = vmatprep.subr.bf16.mxu0 %v1250_v51  ;;  %6039 = vmatprep.subr.bf16.mxu1 %v1252_v52  ;;  %v1355_v51 = vld [vmem:[#allocation2 + $0x550] sm:$0xff]  ;;  %v1362_v52 = vld [vmem:[#allocation2 + $0x588] sm:$0xff] }
 0x51f   :  { %5913 = vmatpush1.bf16.msra.mxu0 %v1249_v53  ;;  %6041 = vmatpush1.bf16.msra.mxu1 %v1251_v54  ;;  %v1364_v53 = vld [vmem:[#allocation2 + $0x598] sm:$0xff]  ;;  %v1361_v54 = vld [vmem:[#allocation2 + $0x580] sm:$0xff] }
 0x520   :  { %5915 = vmatprep.subr.bf16.mxu0 %v1258_v55  ;;  %6043 = vmatprep.subr.bf16.mxu1 %v1260_v56  ;;  %v1363_v55 = vld [vmem:[#allocation2 + $0x590] sm:$0xff]  ;;  %v1370_v56 = vld [vmem:[#allocation2 + $0x5c8] sm:$0xff] }
 0x523   :  { %5917 = vmatpush1.bf16.msra.mxu0 %v1257_v57  ;;  %6045 = vmatpush1.bf16.msra.mxu1 %v1259_v58  ;;  %v1372_v57 = vld [vmem:[#allocation2 + $0x5d8] sm:$0xff]  ;;  %v1369_v58 = vld [vmem:[#allocation2 + $0x5c0] sm:$0xff] }
 0x524   :  { %5919 = vmatprep.subr.bf16.mxu0 %v1266_v59  ;;  %6047 = vmatprep.subr.bf16.mxu1 %v1268_v60  ;;  %v1371_v59 = vld [vmem:[#allocation2 + $0x5d0] sm:$0xff]  ;;  %v1378_v60 = vld [vmem:[#allocation2 + $0x608] sm:$0xff] }
 0x527   :  { %5921 = vmatpush1.bf16.msra.mxu0 %v1265_v61  ;;  %6049 = vmatpush1.bf16.msra.mxu1 %v1267_v62  ;;  %v1380_v61 = vld [vmem:[#allocation2 + $0x618] sm:$0xff]  ;;  %v1377_v62 = vld [vmem:[#allocation2 + $0x600] sm:$0xff] }
 0x528   :  { %5923 = vmatprep.subr.bf16.mxu0 %v1274_v1  ;;  %6051 = vmatprep.subr.bf16.mxu1 %v1276_v2  ;;  %v1379_v1 = vld [vmem:[#allocation2 + $0x610] sm:$0xff]  ;;  %v1386_v2 = vld [vmem:[#allocation2 + $0x648] sm:$0xff] }
 0x52b   :  { %5925 = vmatpush1.bf16.msra.mxu0 %v1273_v4  ;;  %6053 = vmatpush1.bf16.msra.mxu1 %v1275_v5  ;;  %v1388_v4 = vld [vmem:[#allocation2 + $0x658] sm:$0xff]  ;;  %v1385_v5 = vld [vmem:[#allocation2 + $0x640] sm:$0xff] }
 0x52c   :  { %5927 = vmatprep.subr.bf16.mxu0 %v1282_v6  ;;  %6055 = vmatprep.subr.bf16.mxu1 %v1284_v7  ;;  %v1387_v6 = vld [vmem:[#allocation2 + $0x650] sm:$0xff]  ;;  %v1394_v7 = vld [vmem:[#allocation2 + $0x688] sm:$0xff] }
 0x52f   :  { %5929 = vmatpush1.bf16.msra.mxu0 %v1281_v8  ;;  %6057 = vmatpush1.bf16.msra.mxu1 %v1283_v47  ;;  %v1396_v8 = vld [vmem:[#allocation2 + $0x698] sm:$0xff]  ;;  %v1393_v47 = vld [vmem:[#allocation2 + $0x680] sm:$0xff] }
 0x530   :  { %5931 = vmatprep.subr.bf16.mxu0 %v1290_v9  ;;  %6059 = vmatprep.subr.bf16.mxu1 %v1292_v10  ;;  %v1395_v9 = vld [vmem:[#allocation2 + $0x690] sm:$0xff]  ;;  %v1402_v10 = vld [vmem:[#allocation2 + $0x6c8] sm:$0xff] }
 0x533   :  { %5933 = vmatpush1.bf16.msra.mxu0 %v1289_v11  ;;  %6061 = vmatpush1.bf16.msra.mxu1 %v1291_v48  ;;  %v1404_v11 = vld [vmem:[#allocation2 + $0x6d8] sm:$0xff]  ;;  %v1401_v48 = vld [vmem:[#allocation2 + $0x6c0] sm:$0xff] }
 0x534   :  { %5935 = vmatprep.subr.bf16.mxu0 %v1298_v14  ;;  %6063 = vmatprep.subr.bf16.mxu1 %v1300_v15  ;;  %v1403_v14 = vld [vmem:[#allocation2 + $0x6d0] sm:$0xff]  ;;  %v1410_v15 = vld [vmem:[#allocation2 + $0x708] sm:$0xff] }
 0x537   :  { %5937 = vmatpush1.bf16.msra.mxu0 %v1297_v17  ;;  %6065 = vmatpush1.bf16.msra.mxu1 %v1299_v19  ;;  %v1412_v17 = vld [vmem:[#allocation2 + $0x718] sm:$0xff]  ;;  %v1409_v19 = vld [vmem:[#allocation2 + $0x700] sm:$0xff] }
 0x538   :  { %5939 = vmatprep.subr.bf16.mxu0 %v1306_v20  ;;  %6067 = vmatprep.subr.bf16.mxu1 %v1308_v3  ;;  %v1411_v20 = vld [vmem:[#allocation2 + $0x710] sm:$0xff]  ;;  %v1418_v3 = vld [vmem:[#allocation2 + $0x748] sm:$0xff] }
 0x53b   :  { %5941 = vmatpush1.bf16.msra.mxu0 %v1305_v21  ;;  %6069 = vmatpush1.bf16.msra.mxu1 %v1307_v22  ;;  %v1420_v21 = vld [vmem:[#allocation2 + $0x758] sm:$0xff]  ;;  %v1417_v22 = vld [vmem:[#allocation2 + $0x740] sm:$0xff] }
 0x53c   :  { %5943 = vmatprep.subr.bf16.mxu0 %v1314_v23  ;;  %6071 = vmatprep.subr.bf16.mxu1 %v1316_v24  ;;  %v1419_v23 = vld [vmem:[#allocation2 + $0x750] sm:$0xff]  ;;  %v1426_v24 = vld [vmem:[#allocation2 + $0x788] sm:$0xff] }
 0x53e   :  { %2060 = vmatmul.mubr.f32.vlgmr.msra.gmra.mrb[2].mxu0 %v8445_v16  ;;  %2202 = vmatmul.mubr.f32.vlgmr.msra.gmra.mrb[6].mxu1 %v8445_v16 }
 0x53f   :  { %5945 = vmatpush1.bf16.msra.mxu0 %v1313_v25  ;;  %6073 = vmatpush1.bf16.msra.mxu1 %v1315_v26  ;;  %v1428_v25 = vld [vmem:[#allocation2 + $0x798] sm:$0xff]  ;;  %v1425_v26 = vld [vmem:[#allocation2 + $0x780] sm:$0xff] }
 0x540   :  { %5947 = vmatprep.subr.bf16.mxu0 %v1322_v27  ;;  %6075 = vmatprep.subr.bf16.mxu1 %v1324_v28  ;;  %v1427_v27 = vld [vmem:[#allocation2 + $0x790] sm:$0xff]  ;;  %v1434_v28 = vld [vmem:[#allocation2 + $0x7c8] sm:$0xff] }
 0x541   :  { %2130 = vmatprep.mubr.f32.mxu0 %v8459_v13  ;;  %2272 = vmatprep.mubr.f32.mxu1 %v8459_v13 }
 0x543   :  { %5949 = vmatpush1.bf16.msra.mxu0 %v1321_v31  ;;  %6077 = vmatpush1.bf16.msra.mxu1 %v1323_v33  ;;  %v1436_v31 = vld [vmem:[#allocation2 + $0x7d8] sm:$0xff]  ;;  %v1433_v33 = vld [vmem:[#allocation2 + $0x7c0] sm:$0xff] }
 0x544   :  { %5951 = vmatprep.subr.bf16.mxu0 %v1330_v34  ;;  %6079 = vmatprep.subr.bf16.mxu1 %v1332_v35  ;;  %v1435_v34 = vld [vmem:[#allocation2 + $0x7d0] sm:$0xff]  ;;  %v1190_v35 = vld [vmem:[#allocation2 + $0x28] sm:$0xff] }
 0x547   :  { %5953 = vmatpush1.bf16.msra.mxu0 %v1329_v36  ;;  %6081 = vmatpush1.bf16.msra.mxu1 %v1331_v37  ;;  %v1192_v36 = vld [vmem:[#allocation2 + $0x38] sm:$0xff]  ;;  %v1189_v37 = vld [vmem:[#allocation2 + $0x20] sm:$0xff] }
 0x548   :  { %5955 = vmatprep.subr.bf16.mxu0 %v1338_v38  ;;  %6083 = vmatprep.subr.bf16.mxu1 %v1340_v39  ;;  %v1191_v38 = vld [vmem:[#allocation2 + $0x30] sm:$0xff]  ;;  %v1198_v39 = vld [vmem:[#allocation2 + $0x68] sm:$0xff] }
 0x54b   :  { %5957 = vmatpush1.bf16.msra.mxu0 %v1337_v40  ;;  %6085 = vmatpush1.bf16.msra.mxu1 %v1339_v41  ;;  %v1200_v40 = vld [vmem:[#allocation2 + $0x78] sm:$0xff]  ;;  %v1197_v41 = vld [vmem:[#allocation2 + $0x60] sm:$0xff] }
 0x54c   :  { %5959 = vmatprep.subr.bf16.mxu0 %v1346_v42  ;;  %6087 = vmatprep.subr.bf16.mxu1 %v1348_v43  ;;  %v1199_v42 = vld [vmem:[#allocation2 + $0x70] sm:$0xff]  ;;  %v1206_v43 = vld [vmem:[#allocation2 + $0xa8] sm:$0xff] }
 0x54f   :  { %5961 = vmatpush1.bf16.msra.mxu0 %v1345_v44  ;;  %6089 = vmatpush1.bf16.msra.mxu1 %v1347_v45  ;;  %v1208_v44 = vld [vmem:[#allocation2 + $0xb8] sm:$0xff]  ;;  %v1205_v45 = vld [vmem:[#allocation2 + $0xa0] sm:$0xff] }
 0x550   :  { %5963 = vmatprep.subr.bf16.mxu0 %v1354_v46  ;;  %6091 = vmatprep.subr.bf16.mxu1 %v1356_v49  ;;  %v1207_v46 = vld [vmem:[#allocation2 + $0xb0] sm:$0xff]  ;;  %v1214_v49 = vld [vmem:[#allocation2 + $0xe8] sm:$0xff] }
 0x553   :  { %5965 = vmatpush1.bf16.msra.mxu0 %v1353_v50  ;;  %6093 = vmatpush1.bf16.msra.mxu1 %v1355_v51  ;;  %v1216_v50 = vld [vmem:[#allocation2 + $0xf8] sm:$0xff]  ;;  %v1213_v51 = vld [vmem:[#allocation2 + $0xe0] sm:$0xff] }
 0x554   :  { %5967 = vmatprep.subr.bf16.mxu0 %v1362_v52  ;;  %6095 = vmatprep.subr.bf16.mxu1 %v1364_v53  ;;  %v1215_v52 = vld [vmem:[#allocation2 + $0xf0] sm:$0xff]  ;;  %v1222_v53 = vld [vmem:[#allocation2 + $0x128] sm:$0xff] }
 0x557   :  { %5969 = vmatpush1.bf16.msra.mxu0 %v1361_v54  ;;  %6097 = vmatpush1.bf16.msra.mxu1 %v1363_v55  ;;  %v1224_v54 = vld [vmem:[#allocation2 + $0x138] sm:$0xff]  ;;  %v1223_v55 = vld [vmem:[#allocation2 + $0x130] sm:$0xff] }
 0x558   :  { %5971 = vmatprep.subr.bf16.mxu0 %v1370_v56  ;;  %6099 = vmatprep.subr.bf16.mxu1 %v1372_v57  ;;  %v1230_v56 = vld [vmem:[#allocation2 + $0x168] sm:$0xff]  ;;  %v1232_v57 = vld [vmem:[#allocation2 + $0x178] sm:$0xff] }
 0x55b   :  { %5973 = vmatpush1.bf16.msra.mxu0 %v1369_v58  ;;  %6101 = vmatpush1.bf16.msra.mxu1 %v1371_v59  ;;  %v1229_v58 = vld [vmem:[#allocation2 + $0x160] sm:$0xff]  ;;  %v1231_v59 = vld [vmem:[#allocation2 + $0x170] sm:$0xff] }
 0x55c   :  { %5975 = vmatprep.subr.bf16.mxu0 %v1378_v60  ;;  %6103 = vmatprep.subr.bf16.mxu1 %v1380_v61  ;;  %v1238_v60 = vld [vmem:[#allocation2 + $0x1a8] sm:$0xff]  ;;  %v1240_v61 = vld [vmem:[#allocation2 + $0x1b8] sm:$0xff] }
 0x55f   :  { %5977 = vmatpush1.bf16.msra.mxu0 %v1377_v62  ;;  %6105 = vmatpush1.bf16.msra.mxu1 %v1379_v1  ;;  %v1237_v62 = vld [vmem:[#allocation2 + $0x1a0] sm:$0xff]  ;;  %v1239_v1 = vld [vmem:[#allocation2 + $0x1b0] sm:$0xff] }
 0x560   :  { %5979 = vmatprep.subr.bf16.mxu0 %v1386_v2  ;;  %6107 = vmatprep.subr.bf16.mxu1 %v1388_v4  ;;  %v1246_v2 = vld [vmem:[#allocation2 + $0x1e8] sm:$0xff]  ;;  %v1248_v4 = vld [vmem:[#allocation2 + $0x1f8] sm:$0xff] }
 0x563   :  { %5981 = vmatpush1.bf16.msra.mxu0 %v1385_v5  ;;  %6109 = vmatpush1.bf16.msra.mxu1 %v1387_v6  ;;  %v1245_v5 = vld [vmem:[#allocation2 + $0x1e0] sm:$0xff]  ;;  %v1247_v6 = vld [vmem:[#allocation2 + $0x1f0] sm:$0xff] }
 0x564   :  { %5983 = vmatprep.subr.bf16.mxu0 %v1394_v7  ;;  %6111 = vmatprep.subr.bf16.mxu1 %v1396_v8  ;;  %v1254_v7 = vld [vmem:[#allocation2 + $0x228] sm:$0xff]  ;;  %v1256_v8 = vld [vmem:[#allocation2 + $0x238] sm:$0xff] }
 0x567   :  { %5985 = vmatpush1.bf16.msra.mxu0 %v1393_v47  ;;  %6113 = vmatpush1.bf16.msra.mxu1 %v1395_v9  ;;  %v1253_v47 = vld [vmem:[#allocation2 + $0x220] sm:$0xff]  ;;  %v1255_v9 = vld [vmem:[#allocation2 + $0x230] sm:$0xff] }
 0x568   :  { %5987 = vmatprep.subr.bf16.mxu0 %v1402_v10  ;;  %6115 = vmatprep.subr.bf16.mxu1 %v1404_v11  ;;  %v1262_v10 = vld [vmem:[#allocation2 + $0x268] sm:$0xff]  ;;  %v1264_v11 = vld [vmem:[#allocation2 + $0x278] sm:$0xff] }
 0x56b   :  { %5989 = vmatpush1.bf16.msra.mxu0 %v1401_v48  ;;  %6117 = vmatpush1.bf16.msra.mxu1 %v1403_v14  ;;  %v1261_v48 = vld [vmem:[#allocation2 + $0x260] sm:$0xff]  ;;  %v1263_v14 = vld [vmem:[#allocation2 + $0x270] sm:$0xff] }
 0x56c   :  { %5991 = vmatprep.subr.bf16.mxu0 %v1410_v15  ;;  %6119 = vmatprep.subr.bf16.mxu1 %v1412_v17  ;;  %v1270_v15 = vld [vmem:[#allocation2 + $0x2a8] sm:$0xff]  ;;  %v1272_v17 = vld [vmem:[#allocation2 + $0x2b8] sm:$0xff] }
 0x56f   :  { %5993 = vmatpush1.bf16.msra.mxu0 %v1409_v19  ;;  %6121 = vmatpush1.bf16.msra.mxu1 %v1411_v20  ;;  %v1269_v19 = vld [vmem:[#allocation2 + $0x2a0] sm:$0xff]  ;;  %v1271_v20 = vld [vmem:[#allocation2 + $0x2b0] sm:$0xff] }
 0x570   :  { %5995 = vmatprep.subr.bf16.mxu0 %v1418_v3  ;;  %6123 = vmatprep.subr.bf16.mxu1 %v1420_v21  ;;  %v1278_v3 = vld [vmem:[#allocation2 + $0x2e8] sm:$0xff]  ;;  %v1280_v21 = vld [vmem:[#allocation2 + $0x2f8] sm:$0xff] }
 0x573   :  { %5997 = vmatpush1.bf16.msra.mxu0 %v1417_v22  ;;  %6125 = vmatpush1.bf16.msra.mxu1 %v1419_v23  ;;  %v1277_v22 = vld [vmem:[#allocation2 + $0x2e0] sm:$0xff]  ;;  %v1279_v23 = vld [vmem:[#allocation2 + $0x2f0] sm:$0xff] }
 0x574   :  { %5999 = vmatprep.subr.bf16.mxu0 %v1426_v24  ;;  %6127 = vmatprep.subr.bf16.mxu1 %v1428_v25  ;;  %v1286_v24 = vld [vmem:[#allocation2 + $0x328] sm:$0xff]  ;;  %v1288_v25 = vld [vmem:[#allocation2 + $0x338] sm:$0xff] }
 0x577   :  { %6001 = vmatpush1.bf16.msra.mxu0 %v1425_v26  ;;  %6129 = vmatpush1.bf16.msra.mxu1 %v1427_v27  ;;  %v1285_v26 = vld [vmem:[#allocation2 + $0x320] sm:$0xff]  ;;  %v1287_v27 = vld [vmem:[#allocation2 + $0x330] sm:$0xff] }
 0x578   :  { %6003 = vmatprep.subr.bf16.mxu0 %v1434_v28  ;;  %6131 = vmatprep.subr.bf16.mxu1 %v1436_v31  ;;  %v1294_v28 = vld [vmem:[#allocation2 + $0x368] sm:$0xff]  ;;  %v1296_v31 = vld [vmem:[#allocation2 + $0x378] sm:$0xff] }
 0x57b   :  { %6005 = vmatpush1.bf16.msra.mxu0 %v1433_v33  ;;  %6133 = vmatpush1.bf16.msra.mxu1 %v1435_v34  ;;  %v1293_v33 = vld [vmem:[#allocation2 + $0x360] sm:$0xff]  ;;  %v1295_v34 = vld [vmem:[#allocation2 + $0x370] sm:$0xff] }
 0x57c   :  { %6135 = vmatprep.subr.bf16.mxu0 %v1190_v35  ;;  %6263 = vmatprep.subr.bf16.mxu1 %v1192_v36  ;;  %v1302_v35 = vld [vmem:[#allocation2 + $0x3a8] sm:$0xff]  ;;  %v1304_v36 = vld [vmem:[#allocation2 + $0x3b8] sm:$0xff] }
 0x57e   :  { %2131 = vmatmul.mubr.f32.vlgmr.msra.gmra.mrb[2].mxu0 %v8457_v12  ;;  %2273 = vmatmul.mubr.f32.vlgmr.msra.gmra.mrb[6].mxu1 %v8457_v12 }
 0x57f   :  { %6137 = vmatpush1.bf16.msra.mxu0 %v1189_v37  ;;  %6265 = vmatpush1.bf16.msra.mxu1 %v1191_v38  ;;  %v1301_v37 = vld [vmem:[#allocation2 + $0x3a0] sm:$0xff]  ;;  %v1303_v38 = vld [vmem:[#allocation2 + $0x3b0] sm:$0xff] }
 0x580   :  { %6139 = vmatprep.subr.bf16.mxu0 %v1198_v39  ;;  %6267 = vmatprep.subr.bf16.mxu1 %v1200_v40  ;;  %v1310_v39 = vld [vmem:[#allocation2 + $0x3e8] sm:$0xff]  ;;  %v1312_v40 = vld [vmem:[#allocation2 + $0x3f8] sm:$0xff] }
 0x581   :  { %2343 = vmatprep.mubr.f32.mxu0 %v8447_v18  ;;  %2485 = vmatprep.mubr.f32.mxu1 %v8447_v18  ;;  %v1221_v18 = vld [vmem:[#allocation2 + $0x120] sm:$0xff] }
 0x583   :  { %6141 = vmatpush1.bf16.msra.mxu0 %v1197_v41  ;;  %6269 = vmatpush1.bf16.msra.mxu1 %v1199_v42  ;;  %v1309_v41 = vld [vmem:[#allocation2 + $0x3e0] sm:$0xff]  ;;  %v1311_v42 = vld [vmem:[#allocation2 + $0x3f0] sm:$0xff] }
 0x584   :  { %6143 = vmatprep.subr.bf16.mxu0 %v1206_v43  ;;  %6271 = vmatprep.subr.bf16.mxu1 %v1208_v44  ;;  %v1318_v43 = vld [vmem:[#allocation2 + $0x428] sm:$0xff]  ;;  %v1320_v44 = vld [vmem:[#allocation2 + $0x438] sm:$0xff] }
 0x587   :  { %6145 = vmatpush1.bf16.msra.mxu0 %v1205_v45  ;;  %6273 = vmatpush1.bf16.msra.mxu1 %v1207_v46  ;;  %v1317_v45 = vld [vmem:[#allocation2 + $0x420] sm:$0xff]  ;;  %v1319_v46 = vld [vmem:[#allocation2 + $0x430] sm:$0xff] }
 0x588   :  { %6147 = vmatprep.subr.bf16.mxu0 %v1214_v49  ;;  %6275 = vmatprep.subr.bf16.mxu1 %v1216_v50  ;;  %v1326_v49 = vld [vmem:[#allocation2 + $0x468] sm:$0xff]  ;;  %v1328_v50 = vld [vmem:[#allocation2 + $0x478] sm:$0xff] }
 0x58b   :  { %6149 = vmatpush1.bf16.msra.mxu0 %v1213_v51  ;;  %6277 = vmatpush1.bf16.msra.mxu1 %v1215_v52  ;;  %v1325_v51 = vld [vmem:[#allocation2 + $0x460] sm:$0xff]  ;;  %v1327_v52 = vld [vmem:[#allocation2 + $0x470] sm:$0xff] }
 0x58c   :  { %6151 = vmatprep.subr.bf16.mxu0 %v1222_v53  ;;  %6279 = vmatprep.subr.bf16.mxu1 %v1224_v54  ;;  %v1334_v53 = vld [vmem:[#allocation2 + $0x4a8] sm:$0xff]  ;;  %v1336_v54 = vld [vmem:[#allocation2 + $0x4b8] sm:$0xff] }
 0x58f   :  { %6153 = vmatpush1.bf16.msra.mxu0 %v1221_v18  ;;  %6281 = vmatpush1.bf16.msra.mxu1 %v1223_v55  ;;  %v1333_v18 = vld [vmem:[#allocation2 + $0x4a0] sm:$0xff]  ;;  %v1335_v55 = vld [vmem:[#allocation2 + $0x4b0] sm:$0xff] }
 0x590   :  { %6155 = vmatprep.subr.bf16.mxu0 %v1230_v56  ;;  %6283 = vmatprep.subr.bf16.mxu1 %v1232_v57  ;;  %v1342_v56 = vld [vmem:[#allocation2 + $0x4e8] sm:$0xff]  ;;  %v1341_v57 = vld [vmem:[#allocation2 + $0x4e0] sm:$0xff] }
 0x593   :  { %6157 = vmatpush1.bf16.msra.mxu0 %v1229_v58  ;;  %6285 = vmatpush1.bf16.msra.mxu1 %v1231_v59  ;;  %v1343_v58 = vld [vmem:[#allocation2 + $0x4f0] sm:$0xff]  ;;  %v1350_v59 = vld [vmem:[#allocation2 + $0x528] sm:$0xff] }
 0x594   :  { %6159 = vmatprep.subr.bf16.mxu0 %v1238_v60  ;;  %6287 = vmatprep.subr.bf16.mxu1 %v1240_v61  ;;  %v1352_v60 = vld [vmem:[#allocation2 + $0x538] sm:$0xff]  ;;  %v1351_v61 = vld [vmem:[#allocation2 + $0x530] sm:$0xff] }
 0x597   :  { %6161 = vmatpush1.bf16.msra.mxu0 %v1237_v62  ;;  %6289 = vmatpush1.bf16.msra.mxu1 %v1239_v1  ;;  %v1358_v62 = vld [vmem:[#allocation2 + $0x568] sm:$0xff]  ;;  %v1360_v1 = vld [vmem:[#allocation2 + $0x578] sm:$0xff] }
 0x598   :  { %6163 = vmatprep.subr.bf16.mxu0 %v1246_v2  ;;  %6291 = vmatprep.subr.bf16.mxu1 %v1248_v4  ;;  %v1357_v2 = vld [vmem:[#allocation2 + $0x560] sm:$0xff]  ;;  %v1359_v4 = vld [vmem:[#allocation2 + $0x570] sm:$0xff] }
 0x59b   :  { %6165 = vmatpush1.bf16.msra.mxu0 %v1245_v5  ;;  %6293 = vmatpush1.bf16.msra.mxu1 %v1247_v6  ;;  %v1366_v5 = vld [vmem:[#allocation2 + $0x5a8] sm:$0xff]  ;;  %v1368_v6 = vld [vmem:[#allocation2 + $0x5b8] sm:$0xff] }
 0x59c   :  { %6167 = vmatprep.subr.bf16.mxu0 %v1254_v7  ;;  %6295 = vmatprep.subr.bf16.mxu1 %v1256_v8  ;;  %v1365_v7 = vld [vmem:[#allocation2 + $0x5a0] sm:$0xff]  ;;  %v1367_v8 = vld [vmem:[#allocation2 + $0x5b0] sm:$0xff] }
 0x59f   :  { %6169 = vmatpush1.bf16.msra.mxu0 %v1253_v47  ;;  %6297 = vmatpush1.bf16.msra.mxu1 %v1255_v9  ;;  %v1374_v47 = vld [vmem:[#allocation2 + $0x5e8] sm:$0xff]  ;;  %v1376_v9 = vld [vmem:[#allocation2 + $0x5f8] sm:$0xff] }
 0x5a0   :  { %6171 = vmatprep.subr.bf16.mxu0 %v1262_v10  ;;  %6299 = vmatprep.subr.bf16.mxu1 %v1264_v11  ;;  %v1373_v10 = vld [vmem:[#allocation2 + $0x5e0] sm:$0xff]  ;;  %v1375_v11 = vld [vmem:[#allocation2 + $0x5f0] sm:$0xff] }
 0x5a3   :  { %6173 = vmatpush1.bf16.msra.mxu0 %v1261_v48  ;;  %6301 = vmatpush1.bf16.msra.mxu1 %v1263_v14  ;;  %v1382_v48 = vld [vmem:[#allocation2 + $0x628] sm:$0xff]  ;;  %v1384_v14 = vld [vmem:[#allocation2 + $0x638] sm:$0xff] }
 0x5a4   :  { %6175 = vmatprep.subr.bf16.mxu0 %v1270_v15  ;;  %6303 = vmatprep.subr.bf16.mxu1 %v1272_v17  ;;  %v1381_v15 = vld [vmem:[#allocation2 + $0x620] sm:$0xff]  ;;  %v1383_v17 = vld [vmem:[#allocation2 + $0x630] sm:$0xff] }
 0x5a7   :  { %6177 = vmatpush1.bf16.msra.mxu0 %v1269_v19  ;;  %6305 = vmatpush1.bf16.msra.mxu1 %v1271_v20  ;;  %v1390_v19 = vld [vmem:[#allocation2 + $0x668] sm:$0xff]  ;;  %v1392_v20 = vld [vmem:[#allocation2 + $0x678] sm:$0xff] }
 0x5a8   :  { %6179 = vmatprep.subr.bf16.mxu0 %v1278_v3  ;;  %6307 = vmatprep.subr.bf16.mxu1 %v1280_v21  ;;  %v1389_v3 = vld [vmem:[#allocation2 + $0x660] sm:$0xff]  ;;  %v1391_v21 = vld [vmem:[#allocation2 + $0x670] sm:$0xff] }
 0x5ab   :  { %6181 = vmatpush1.bf16.msra.mxu0 %v1277_v22  ;;  %6309 = vmatpush1.bf16.msra.mxu1 %v1279_v23  ;;  %v1398_v22 = vld [vmem:[#allocation2 + $0x6a8] sm:$0xff]  ;;  %v1400_v23 = vld [vmem:[#allocation2 + $0x6b8] sm:$0xff] }
 0x5ac   :  { %6183 = vmatprep.subr.bf16.mxu0 %v1286_v24  ;;  %6311 = vmatprep.subr.bf16.mxu1 %v1288_v25  ;;  %v1397_v24 = vld [vmem:[#allocation2 + $0x6a0] sm:$0xff]  ;;  %v1399_v25 = vld [vmem:[#allocation2 + $0x6b0] sm:$0xff] }
 0x5af   :  { %6185 = vmatpush1.bf16.msra.mxu0 %v1285_v26  ;;  %6313 = vmatpush1.bf16.msra.mxu1 %v1287_v27  ;;  %v1406_v26 = vld [vmem:[#allocation2 + $0x6e8] sm:$0xff]  ;;  %v1408_v27 = vld [vmem:[#allocation2 + $0x6f8] sm:$0xff] }
 0x5b0   :  { %6187 = vmatprep.subr.bf16.mxu0 %v1294_v28  ;;  %6315 = vmatprep.subr.bf16.mxu1 %v1296_v31  ;;  %v1405_v28 = vld [vmem:[#allocation2 + $0x6e0] sm:$0xff]  ;;  %v1407_v31 = vld [vmem:[#allocation2 + $0x6f0] sm:$0xff] }
 0x5b3   :  { %6189 = vmatpush1.bf16.msra.mxu0 %v1293_v33  ;;  %6317 = vmatpush1.bf16.msra.mxu1 %v1295_v34  ;;  %v1414_v33 = vld [vmem:[#allocation2 + $0x728] sm:$0xff]  ;;  %v1416_v34 = vld [vmem:[#allocation2 + $0x738] sm:$0xff] }
 0x5b4   :  { %6191 = vmatprep.subr.bf16.mxu0 %v1302_v35  ;;  %6319 = vmatprep.subr.bf16.mxu1 %v1304_v36  ;;  %v1413_v35 = vld [vmem:[#allocation2 + $0x720] sm:$0xff]  ;;  %v1415_v36 = vld [vmem:[#allocation2 + $0x730] sm:$0xff] }
 0x5b7   :  { %6193 = vmatpush1.bf16.msra.mxu0 %v1301_v37  ;;  %6321 = vmatpush1.bf16.msra.mxu1 %v1303_v38  ;;  %v1422_v37 = vld [vmem:[#allocation2 + $0x768] sm:$0xff]  ;;  %v1424_v38 = vld [vmem:[#allocation2 + $0x778] sm:$0xff] }
 0x5b8   :  { %6195 = vmatprep.subr.bf16.mxu0 %v1310_v39  ;;  %6323 = vmatprep.subr.bf16.mxu1 %v1312_v40  ;;  %v1421_v39 = vld [vmem:[#allocation2 + $0x760] sm:$0xff]  ;;  %v1423_v40 = vld [vmem:[#allocation2 + $0x770] sm:$0xff] }
 0x5bb   :  { %6197 = vmatpush1.bf16.msra.mxu0 %v1309_v41  ;;  %6325 = vmatpush1.bf16.msra.mxu1 %v1311_v42  ;;  %v1430_v41 = vld [vmem:[#allocation2 + $0x7a8] sm:$0xff]  ;;  %v1432_v42 = vld [vmem:[#allocation2 + $0x7b8] sm:$0xff] }
 0x5bc   :  { %6199 = vmatprep.subr.bf16.mxu0 %v1318_v43  ;;  %6327 = vmatprep.subr.bf16.mxu1 %v1320_v44  ;;  %v1429_v43 = vld [vmem:[#allocation2 + $0x7a0] sm:$0xff]  ;;  %v1431_v44 = vld [vmem:[#allocation2 + $0x7b0] sm:$0xff] }
 0x5be   :  { %2344 = vmatmul.mubr.f32.vlgmr.msra.gmra.mrb[4].mxu0 %v8445_v16  ;;  %2486 = vmatmul.mubr.f32.vlgmr.msra.gmra.mrb[8].mxu1 %v8445_v16  ;;  %v1344_v16 = vld [vmem:[#allocation2 + $0x4f8] sm:$0xff] }
 0x5bf   :  { %6201 = vmatpush1.bf16.msra.mxu0 %v1317_v45  ;;  %6329 = vmatpush1.bf16.msra.mxu1 %v1319_v46  ;;  %v1438_v45 = vld [vmem:[#allocation2 + $0x7e8] sm:$0xff]  ;;  %v1440_v46 = vld [vmem:[#allocation2 + $0x7f8] sm:$0xff] }
 0x5c0   :  { %6203 = vmatprep.subr.bf16.mxu0 %v1326_v49  ;;  %6331 = vmatprep.subr.bf16.mxu1 %v1328_v50  ;;  %v1437_v49 = vld [vmem:[#allocation2 + $0x7e0] sm:$0xff]  ;;  %v1439_v50 = vld [vmem:[#allocation2 + $0x7f0] sm:$0xff] }
 0x5c1   :  { %2414 = vmatprep.mubr.f32.mxu0 %v8459_v13  ;;  %2556 = vmatprep.mubr.f32.mxu1 %v8459_v13  ;;  %v1349_v13 = vld [vmem:[#allocation2 + $0x520] sm:$0xff] }
 0x5c3   :  { %6205 = vmatpush1.bf16.msra.mxu0 %v1325_v51  ;;  %6333 = vmatpush1.bf16.msra.mxu1 %v1327_v52  ;;  %v8477_v51 = vld [vmem:[#allocation24] sm:$0xff] }
 0x5c4   :  { %6207 = vmatprep.subr.bf16.mxu0 %v1334_v53  ;;  %6335 = vmatprep.subr.bf16.mxu1 %v1336_v54  ;;  %v1958_v52 = vrot.slane %v8477_v51, %v8402_v30  ;;  %v1966_v53 = vrot.slane %v8477_v51, %v8436_v63  ;;  %v1962_v54 = vrot.slane %v8477_v51, %v8405_v32 }
 0x5c7   :  { %6209 = vmatpush1.bf16.msra.mxu0 %v1333_v18  ;;  %6337 = vmatpush1.bf16.msra.mxu1 %v1335_v55  ;;  %v1970_v18 = vrot.slane %v8477_v51, %v8439_v0 }
 0x5c8   :  { %6211 = vmatprep.subr.bf16.mxu0 %v1342_v56  ;;  %6339 = vmatprep.subr.bf16.mxu1 %v1344_v16 }
 0x5cb   :  { %6213 = vmatpush1.bf16.msra.mxu0 %v1341_v57  ;;  %6341 = vmatpush1.bf16.msra.mxu1 %v1343_v58 }
 0x5cc   :  { %6215 = vmatprep.subr.bf16.mxu0 %v1350_v59  ;;  %6343 = vmatprep.subr.bf16.mxu1 %v1352_v60 }
 0x5cf   :  { %6217 = vmatpush1.bf16.msra.mxu0 %v1349_v13  ;;  %6345 = vmatpush1.bf16.msra.mxu1 %v1351_v61 }
 0x5d0   :  { %6219 = vmatprep.subr.bf16.mxu0 %v1358_v62  ;;  %6347 = vmatprep.subr.bf16.mxu1 %v1360_v1 }
 0x5d3   :  { %6221 = vmatpush1.bf16.msra.mxu0 %v1357_v2  ;;  %6349 = vmatpush1.bf16.msra.mxu1 %v1359_v4 }
 0x5d4   :  { %6223 = vmatprep.subr.bf16.mxu0 %v1366_v5  ;;  %6351 = vmatprep.subr.bf16.mxu1 %v1368_v6 }
 0x5d7   :  { %6225 = vmatpush1.bf16.msra.mxu0 %v1365_v7  ;;  %6353 = vmatpush1.bf16.msra.mxu1 %v1367_v8 }
 0x5d8   :  { %6227 = vmatprep.subr.bf16.mxu0 %v1374_v47  ;;  %6355 = vmatprep.subr.bf16.mxu1 %v1376_v9 }
 0x5db   :  { %6229 = vmatpush1.bf16.msra.mxu0 %v1373_v10  ;;  %6357 = vmatpush1.bf16.msra.mxu1 %v1375_v11 }
 0x5dc   :  { %6231 = vmatprep.subr.bf16.mxu0 %v1382_v48  ;;  %6359 = vmatprep.subr.bf16.mxu1 %v1384_v14 }
 0x5df   :  { %6233 = vmatpush1.bf16.msra.mxu0 %v1381_v15  ;;  %6361 = vmatpush1.bf16.msra.mxu1 %v1383_v17 }
 0x5e0   :  { %6235 = vmatprep.subr.bf16.mxu0 %v1390_v19  ;;  %6363 = vmatprep.subr.bf16.mxu1 %v1392_v20 }
 0x5e3   :  { %6237 = vmatpush1.bf16.msra.mxu0 %v1389_v3  ;;  %6365 = vmatpush1.bf16.msra.mxu1 %v1391_v21 }
 0x5e4   :  { %6239 = vmatprep.subr.bf16.mxu0 %v1398_v22  ;;  %6367 = vmatprep.subr.bf16.mxu1 %v1400_v23 }
 0x5e7   :  { %6241 = vmatpush1.bf16.msra.mxu0 %v1397_v24  ;;  %6369 = vmatpush1.bf16.msra.mxu1 %v1399_v25 }
 0x5e8   :  { %6243 = vmatprep.subr.bf16.mxu0 %v1406_v26  ;;  %6371 = vmatprep.subr.bf16.mxu1 %v1408_v27 }
 0x5eb   :  { %6245 = vmatpush1.bf16.msra.mxu0 %v1405_v28  ;;  %6373 = vmatpush1.bf16.msra.mxu1 %v1407_v31 }
 0x5ec   :  { %6247 = vmatprep.subr.bf16.mxu0 %v1414_v33  ;;  %6375 = vmatprep.subr.bf16.mxu1 %v1416_v34 }
 0x5ef   :  { %6249 = vmatpush1.bf16.msra.mxu0 %v1413_v35  ;;  %6377 = vmatpush1.bf16.msra.mxu1 %v1415_v36 }
 0x5f0   :  { %6251 = vmatprep.subr.bf16.mxu0 %v1422_v37  ;;  %6379 = vmatprep.subr.bf16.mxu1 %v1424_v38 }
 0x5f3   :  { %6253 = vmatpush1.bf16.msra.mxu0 %v1421_v39  ;;  %6381 = vmatpush1.bf16.msra.mxu1 %v1423_v40 }
 0x5f4   :  { %6255 = vmatprep.subr.bf16.mxu0 %v1430_v41  ;;  %6383 = vmatprep.subr.bf16.mxu1 %v1432_v42 }
 0x5f7   :  { %6257 = vmatpush1.bf16.msra.mxu0 %v1429_v43  ;;  %6385 = vmatpush1.bf16.msra.mxu1 %v1431_v44 }
 0x5f8   :  { %6259 = vmatprep.subr.bf16.mxu0 %v1438_v45  ;;  %6387 = vmatprep.subr.bf16.mxu1 %v1440_v46 }
 0x5fb   :  { %6261 = vmatpush1.bf16.msra.mxu0 %v1437_v49  ;;  %6389 = vmatpush1.bf16.msra.mxu1 %v1439_v50 }
 0x5fe   :  { %2415 = vmatmul.mubr.f32.vlgmr.msra.gmra.mrb[4].mxu0 %v8457_v12  ;;  %2557 = vmatmul.mubr.f32.vlgmr.msra.gmra.mrb[8].mxu1 %v8457_v12 }
 0x651   :  { %v2132_v55 = vpop.f32.mrb[2].mxu0  ;;  %v2274_v56 = vpop.f32.mrb[6].mxu1 }
 0x652   :  { %v7286_v16 = vadd.f32 %v2132_v55, %v1958_v52  ;;  %v7288_v57 = vadd.f32 %v2274_v56, %v1966_v53  ;;  %v2134_v58 = vpop.f32.mrb[3].mxu0  ;;  %v2276_v12 = vpop.f32.mrb[7].mxu1 }
 0x653   :  { %v7287_v59 = vadd.f32 %v2134_v58, %v1962_v54  ;;  %v7289_v60 = vadd.f32 %v2276_v12, %v1970_v18 }
 0x654   :  { %v2565_v13 = vrot.slane %v7286_v16, 4  ;;  %v2577_v61 = vrot.slane %v7288_v57, 4 }
 0x655   :  { %v2571_v62 = vrot.slane %v7287_v59, 4  ;;  %v2583_v1 = vrot.slane %v7289_v60, 4 }
 0x656   :  { %v2566_v2 = vadd.f32 %v7286_v16, %v2565_v13  ;;  %v2578_v4 = vadd.f32 %v7288_v57, %v2577_v61 }
 0x657   :  { %v2572_v5 = vadd.f32 %v7287_v59, %v2571_v62  ;;  %v2584_v6 = vadd.f32 %v7289_v60, %v2583_v1 }
 0x658   :  { %v2567_v7 = vrot.slane %v2566_v2, 2  ;;  %v2579_v8 = vrot.slane %v2578_v4, 2 }
 0x659   :  { %v2573_v47 = vrot.slane %v2572_v5, 2  ;;  %v2585_v9 = vrot.slane %v2584_v6, 2 }
 0x65a   :  { %v2568_v10 = vadd.f32 %v2567_v7, %v2566_v2  ;;  %v2580_v11 = vadd.f32 %v2579_v8, %v2578_v4 }
 0x65b   :  { %v2574_v48 = vadd.f32 %v2573_v47, %v2572_v5  ;;  %v2586_v14 = vadd.f32 %v2585_v9, %v2584_v6  ;;  %v8487_v47 = vld [vmem:[#allocation25] sm:$0xff]  ;;  %v8489_v9 = vld [vmem:[#allocation27] sm:$0xff] }
 0x65c   :  { %v2569_v15 = vrot.slane %v2568_v10, 1  ;;  %v2581_v17 = vrot.slane %v2580_v11, 1 }
 0x65d   :  { %v2575_v19 = vrot.slane %v2574_v48, 1  ;;  %v2587_v20 = vrot.slane %v2586_v14, 1 }
 0x65e   :  { %v2570_v3 = vadd.f32 %v2569_v15, %v2568_v10  ;;  %v2582_v21 = vadd.f32 %v2581_v17, %v2580_v11  ;;  %v2721_v10 = vrot.slane %v8487_v47, %v8402_v30  ;;  %v2770_v17 = vrot.slane %v8489_v9, %v8402_v30 }
 0x65f   :  { %v2576_v22 = vadd.f32 %v2575_v19, %v2574_v48  ;;  %v2588_v23 = vadd.f32 %v2587_v20, %v2586_v14  ;;  %v2729_v48 = vrot.slane %v8487_v47, %v8436_v63  ;;  %v2725_v19 = vrot.slane %v8487_v47, %v8405_v32 }
 0x660   :  { %v2613_v24 = vmul.f32 0.125, %v2570_v3  ;;  %v2615_v25 = vmul.f32 0.125, %v2582_v21  ;;  %v2778_v21 = vrot.slane %v8489_v9, %v8436_v63 }
 0x661   :  { %v2614_v26 = vmul.f32 0.125, %v2576_v22  ;;  %v2616_v27 = vmul.f32 0.125, %v2588_v23  ;;  %v2733_v22 = vrot.slane %v8487_v47, %v8439_v0 }
 0x662   :  { %v2621_v28 = vsub.f32 %v7286_v16, %v2613_v24  ;;  %v2623_v31 = vsub.f32 %v7288_v57, %v2615_v25 }
 0x663   :  { %v2622_v33 = vsub.f32 %v7287_v59, %v2614_v26  ;;  %v2624_v34 = vsub.f32 %v7289_v60, %v2616_v27  ;;  %v2774_v26 = vrot.slane %v8489_v9, %v8405_v32 }
 0x664   :  { %v2629_v35 = vmul.f32 %v2621_v28, %v2621_v28  ;;  %v2631_v36 = vmul.f32 %v2623_v31, %v2623_v31 }
 0x665   :  { %v2630_v37 = vmul.f32 %v2622_v33, %v2622_v33  ;;  %v2632_v38 = vmul.f32 %v2624_v34, %v2624_v34 }
 0x666   :  { %v2637_v39 = vrot.slane %v2629_v35, 4  ;;  %v2649_v40 = vrot.slane %v2631_v36, 4 }
 0x667   :  { %v2643_v41 = vrot.slane %v2630_v37, 4  ;;  %v2655_v42 = vrot.slane %v2632_v38, 4 }
 0x668   :  { %v2638_v43 = vadd.f32 %v2637_v39, %v2629_v35  ;;  %v2650_v44 = vadd.f32 %v2649_v40, %v2631_v36  ;;  %v2782_v35 = vrot.slane %v8489_v9, %v8439_v0 }
 0x669   :  { %v2644_v45 = vadd.f32 %v2643_v41, %v2630_v37  ;;  %v2656_v46 = vadd.f32 %v2655_v42, %v2632_v38 }
 0x66a   :  { %v2639_v49 = vrot.slane %v2638_v43, 2  ;;  %v2651_v50 = vrot.slane %v2650_v44, 2 }
 0x66b   :  { %v2645_v52 = vrot.slane %v2644_v45, 2  ;;  %v2657_v53 = vrot.slane %v2656_v46, 2 }
 0x66c   :  { %v2640_v54 = vadd.f32 %v2639_v49, %v2638_v43  ;;  %v2652_v18 = vadd.f32 %v2651_v50, %v2650_v44 }
 0x66d   :  { %v2646_v55 = vadd.f32 %v2645_v52, %v2644_v45  ;;  %v2658_v56 = vadd.f32 %v2657_v53, %v2656_v46 }
 0x66e   :  { %v2641_v16 = vrot.slane %v2640_v54, 1  ;;  %v2653_v57 = vrot.slane %v2652_v18, 1 }
 0x66f   :  { %v2647_v58 = vrot.slane %v2646_v55, 1  ;;  %v2659_v12 = vrot.slane %v2658_v56, 1 }
 0x670   :  { %v2642_v59 = vadd.f32 %v2641_v16, %v2640_v54  ;;  %v2654_v60 = vadd.f32 %v2653_v57, %v2652_v18 }
 0x671   :  { %v2648_v13 = vadd.f32 %v2647_v58, %v2646_v55  ;;  %v2660_v61 = vadd.f32 %v2659_v12, %v2658_v56 }
 0x672   :  { %v2685_v62 = vmul.f32 0.125, %v2642_v59  ;;  %v2687_v1 = vmul.f32 0.125, %v2654_v60  ;;  %v8516_v59 = vsub.s32 4, %v8399_v29  ;;  %v8519_v60 = vsub.s32 6, %v8399_v29 }
 0x673   :  { %v2686_v2 = vmul.f32 0.125, %v2648_v13  ;;  %v2688_v4 = vmul.f32 0.125, %v2660_v61  ;;  %v8522_v13 = vsub.s32 5, %v8399_v29  ;;  %v8525_v61 = vsub.s32 7, %v8399_v29 }
 0x674   :  { %v2693_v5 = vadd.f32 1e-05, %v2685_v62  ;;  %v2695_v6 = vadd.f32 1e-05, %v2687_v1  ;;  %v1974_v62 = vrot.slane %v8477_v51, %v8516_v59  ;;  %v1982_v1 = vrot.slane %v8477_v51, %v8519_v60 }
 0x675   :  { %v2694_v7 = vadd.f32 1e-05, %v2686_v2  ;;  %v2696_v8 = vadd.f32 1e-05, %v2688_v4  ;;  %v1978_v2 = vrot.slane %v8477_v51, %v8522_v13  ;;  %v1986_v4 = vrot.slane %v8477_v51, %v8525_v61 }
 0x676   :  { %7591 = vrsqrt.f32 %v2693_v5 }
 0x677   :  { %7593 = vrsqrt.f32 %v2695_v6 }
 0x678   :  { %7595 = vrsqrt.f32 %v2694_v7 }
 0x679   :  { %7597 = vrsqrt.f32 %v2696_v8 }
 0x680   :  { %v7592_v11 = vpop.eup %7591 }
 0x681   :  { %v7594_v14 = vpop.eup %7593  ;;  %v2709_v15 = vmul.f32 %v7592_v11, %v2621_v28 }
 0x682   :  { %v7596_v20 = vpop.eup %7595  ;;  %v2711_v3 = vmul.f32 %v7594_v14, %v2623_v31 }
 0x683   :  { %v7598_v23 = vpop.eup %7597  ;;  %v2758_v24 = vmul.f32 %v2721_v10, %v2709_v15  ;;  %v2710_v25 = vmul.f32 %v7596_v20, %v2622_v33 }
 0x684   :  { %v2760_v27 = vmul.f32 %v2729_v48, %v2711_v3  ;;  %v2712_v28 = vmul.f32 %v7598_v23, %v2624_v34 }
 0x685   :  { %v2807_v36 = vadd.f32 %v2770_v17, %v2758_v24  ;;  %v2759_v37 = vmul.f32 %v2725_v19, %v2710_v25 }
 0x686   :  { %v2809_v31 = vadd.f32 %v2778_v21, %v2760_v27  ;;  %v2761_v38 = vmul.f32 %v2733_v22, %v2712_v28 }
 0x687   :  { %v2823_v39 = vmul.f32 0.70710677, %v2807_v36  ;;  %v2808_v40 = vadd.f32 %v2774_v26, %v2759_v37  ;;  %v2815_v34 = vmul.f32 0.5, %v2807_v36 }
 0x688   :  { %v2825_v41 = vmul.f32 0.70710677, %v2809_v31  ;;  %v2810_v42 = vadd.f32 %v2782_v35, %v2761_v38  ;;  %v2817_v50 = vmul.f32 0.5, %v2809_v31 }
 0x689   :  { %7599 = verf.f32 %v2823_v39  ;;  %v2824_v43 = vmul.f32 0.70710677, %v2808_v40  ;;  %v2816_v18 = vmul.f32 0.5, %v2808_v40 }
 0x68a   :  { %7601 = verf.f32 %v2825_v41  ;;  %v2826_v33 = vmul.f32 0.70710677, %v2810_v42  ;;  %v2818_v16 = vmul.f32 0.5, %v2810_v42 }
 0x68b   :  { %7603 = verf.f32 %v2824_v43 }
 0x68c   :  { %7605 = verf.f32 %v2826_v33 }
 0x693   :  { %v7600_v44 = vpop.eup %7599 }
 0x694   :  { %v7602_v45 = vpop.eup %7601  ;;  %v2839_v46 = vadd.f32 1.0, %v7600_v44 }
 0x695   :  { %v7604_v49 = vpop.eup %7603  ;;  %v2841_v52 = vadd.f32 1.0, %v7602_v45 }
 0x696   :  { %v7606_v53 = vpop.eup %7605  ;;  %v8507_v54 = vmul.f32 %v2839_v46, %v2815_v34  ;;  %v2840_v55 = vadd.f32 1.0, %v7604_v49 }
 0x697   :  { %v8509_v56 = vmul.f32 %v2841_v52, %v2817_v50  ;;  %v2842_v57 = vadd.f32 1.0, %v7606_v53 }
 0x698   :  { %v8511_v58 = vmul.f32 %v2840_v55, %v2816_v18 }
 0x699   :  { %v8513_v12 = vmul.f32 %v2842_v57, %v2818_v16 }
 0x6d1   :  { %v2416_v5 = vpop.f32.mrb[4].mxu0  ;;  %v2558_v6 = vpop.f32.mrb[8].mxu1 }
 0x6d2   :  { %v7290_v7 = vadd.f32 %v2416_v5, %v1974_v62  ;;  %v7292_v8 = vadd.f32 %v2558_v6, %v1982_v1  ;;  %v2418_v10 = vpop.f32.mrb[5].mxu0  ;;  %v2560_v11 = vpop.f32.mrb[9].mxu1 }
 0x6d3   :  { %v7291_v29 = vadd.f32 %v2418_v10, %v1978_v2  ;;  %v7293_v48 = vadd.f32 %v2560_v11, %v1986_v4 }
 0x6d4   :  { %v2589_v14 = vrot.slane %v7290_v7, 4  ;;  %v2601_v15 = vrot.slane %v7292_v8, 4 }
 0x6d5   :  { %v2595_v17 = vrot.slane %v7291_v29, 4  ;;  %v2607_v19 = vrot.slane %v7293_v48, 4 }
 0x6d6   :  { %v2590_v20 = vadd.f32 %v7290_v7, %v2589_v14  ;;  %v2602_v3 = vadd.f32 %v7292_v8, %v2601_v15 }
 0x6d7   :  { %v2596_v21 = vadd.f32 %v7291_v29, %v2595_v17  ;;  %v2608_v22 = vadd.f32 %v7293_v48, %v2607_v19 }
 0x6d8   :  { %v2591_v23 = vrot.slane %v2590_v20, 2  ;;  %v2603_v24 = vrot.slane %v2602_v3, 2 }
 0x6d9   :  { %v2597_v25 = vrot.slane %v2596_v21, 2  ;;  %v2609_v51 = vrot.slane %v2608_v22, 2 }
 0x6da   :  { %v2592_v26 = vadd.f32 %v2591_v23, %v2590_v20  ;;  %v2604_v27 = vadd.f32 %v2603_v24, %v2602_v3 }
 0x6db   :  { %v2598_v28 = vadd.f32 %v2597_v25, %v2596_v21  ;;  %v2610_v35 = vadd.f32 %v2609_v51, %v2608_v22 }
 0x6dc   :  { %v2593_v36 = vrot.slane %v2592_v26, 1  ;;  %v2605_v37 = vrot.slane %v2604_v27, 1 }
 0x6dd   :  { %v2599_v31 = vrot.slane %v2598_v28, 1  ;;  %v2611_v38 = vrot.slane %v2610_v35, 1 }
 0x6de   :  { %v2594_v39 = vadd.f32 %v2593_v36, %v2592_v26  ;;  %v2606_v40 = vadd.f32 %v2605_v37, %v2604_v27 }
 0x6df   :  { %v2600_v41 = vadd.f32 %v2599_v31, %v2598_v28  ;;  %v2612_v42 = vadd.f32 %v2611_v38, %v2610_v35  ;;  %v2737_v31 = vrot.slane %v8487_v47, %v8516_v59 }
 0x6e0   :  { %v2617_v43 = vmul.f32 0.125, %v2594_v39  ;;  %v2619_v33 = vmul.f32 0.125, %v2606_v40  ;;  %v2745_v39 = vrot.slane %v8487_v47, %v8519_v60 }
 0x6e1   :  { %v2618_v44 = vmul.f32 0.125, %v2600_v41  ;;  %v2620_v45 = vmul.f32 0.125, %v2612_v42  ;;  %v2786_v42 = vrot.slane %v8489_v9, %v8516_v59 }
 0x6e2   :  { %v2625_v34 = vsub.f32 %v7290_v7, %v2617_v43  ;;  %v2627_v46 = vsub.f32 %v7292_v8, %v2619_v33  ;;  %v2741_v43 = vrot.slane %v8487_v47, %v8522_v13 }
 0x6e3   :  { %v2626_v49 = vsub.f32 %v7291_v29, %v2618_v44  ;;  %v2628_v50 = vsub.f32 %v7293_v48, %v2620_v45  ;;  %v2794_v45 = vrot.slane %v8489_v9, %v8519_v60 }
 0x6e4   :  { %v2633_v52 = vmul.f32 %v2625_v34, %v2625_v34  ;;  %v2635_v53 = vmul.f32 %v2627_v46, %v2627_v46 }
 0x6e5   :  { %v2634_v18 = vmul.f32 %v2626_v49, %v2626_v49  ;;  %v2636_v55 = vmul.f32 %v2628_v50, %v2628_v50 }
 0x6e6   :  { %v2661_v16 = vrot.slane %v2633_v52, 4  ;;  %v2673_v57 = vrot.slane %v2635_v53, 4 }
 0x6e7   :  { %v2667_v62 = vrot.slane %v2634_v18, 4  ;;  %v2679_v1 = vrot.slane %v2636_v55, 4 }
 0x6e8   :  { %v2662_v2 = vadd.f32 %v2661_v16, %v2633_v52  ;;  %v2674_v4 = vadd.f32 %v2673_v57, %v2635_v53  ;;  %v2749_v52 = vrot.slane %v8487_v47, %v8525_v61 }
 0x6e9   :  { %v2668_v5 = vadd.f32 %v2667_v62, %v2634_v18  ;;  %v2680_v6 = vadd.f32 %v2679_v1, %v2636_v55  ;;  %v2798_v62 = vrot.slane %v8489_v9, %v8525_v61 }
 0x6ea   :  { %v2663_v10 = vrot.slane %v2662_v2, 2  ;;  %v2675_v11 = vrot.slane %v2674_v4, 2 }
 0x6eb   :  { %v2669_v14 = vrot.slane %v2668_v5, 2  ;;  %v2681_v15 = vrot.slane %v2680_v6, 2 }
 0x6ec   :  { %v2664_v7 = vadd.f32 %v2663_v10, %v2662_v2  ;;  %v2676_v8 = vadd.f32 %v2675_v11, %v2674_v4 }
 0x6ed   :  { %v2670_v29 = vadd.f32 %v2669_v14, %v2668_v5  ;;  %v2682_v48 = vadd.f32 %v2681_v15, %v2680_v6 }
 0x6ee   :  { %v2665_v17 = vrot.slane %v2664_v7, 1  ;;  %v2677_v19 = vrot.slane %v2676_v8, 1 }
 0x6ef   :  { %v2671_v20 = vrot.slane %v2670_v29, 1  ;;  %v2683_v3 = vrot.slane %v2682_v48, 1 }
 0x6f0   :  { %v2666_v21 = vadd.f32 %v2665_v17, %v2664_v7  ;;  %v2678_v22 = vadd.f32 %v2677_v19, %v2676_v8 }
 0x6f1   :  { %v2672_v23 = vadd.f32 %v2671_v20, %v2670_v29  ;;  %v2684_v24 = vadd.f32 %v2683_v3, %v2682_v48 }
 0x6f2   :  { %v2689_v25 = vmul.f32 0.125, %v2666_v21  ;;  %v2691_v51 = vmul.f32 0.125, %v2678_v22 }
 0x6f3   :  { %v2690_v26 = vmul.f32 0.125, %v2672_v23  ;;  %v2692_v27 = vmul.f32 0.125, %v2684_v24 }
 0x6f4   :  { %v2697_v28 = vadd.f32 1e-05, %v2689_v25  ;;  %v2699_v35 = vadd.f32 1e-05, %v2691_v51 }
 0x6f5   :  { %v2698_v36 = vadd.f32 1e-05, %v2690_v26  ;;  %v2700_v37 = vadd.f32 1e-05, %v2692_v27 }
 0x6f6   :  { %7607 = vrsqrt.f32 %v2697_v28 }
 0x6f7   :  { %7609 = vrsqrt.f32 %v2699_v35 }
 0x6f8   :  { %7611 = vrsqrt.f32 %v2698_v36 }
 0x6f9   :  { %7613 = vrsqrt.f32 %v2700_v37 }
 0x700   :  { %v7608_v38 = vpop.eup %7607 }
 0x701   :  { %v7610_v40 = vpop.eup %7609  ;;  %v2713_v41 = vmul.f32 %v7608_v38, %v2625_v34  ;;  %v2790_v34 = vrot.slane %v8489_v9, %v8522_v13 }
 0x702   :  { %v7612_v33 = vpop.eup %7611  ;;  %v2715_v44 = vmul.f32 %v7610_v40, %v2627_v46 }
 0x703   :  { %v7614_v53 = vpop.eup %7613  ;;  %v2762_v18 = vmul.f32 %v2737_v31, %v2713_v41  ;;  %v2714_v55 = vmul.f32 %v7612_v33, %v2626_v49 }
 0x704   :  { %v2764_v16 = vmul.f32 %v2745_v39, %v2715_v44  ;;  %v2716_v57 = vmul.f32 %v7614_v53, %v2628_v50 }
 0x705   :  { %v2811_v1 = vadd.f32 %v2786_v42, %v2762_v18  ;;  %v2763_v2 = vmul.f32 %v2741_v43, %v2714_v55 }
 0x706   :  { %v2813_v46 = vadd.f32 %v2794_v45, %v2764_v16  ;;  %v2765_v4 = vmul.f32 %v2749_v52, %v2716_v57 }
 0x707   :  { %v2827_v5 = vmul.f32 0.70710677, %v2811_v1  ;;  %v2812_v6 = vadd.f32 %v2790_v34, %v2763_v2  ;;  %v2819_v50 = vmul.f32 0.5, %v2811_v1 }
 0x708   :  { %v2829_v10 = vmul.f32 0.70710677, %v2813_v46  ;;  %v2814_v11 = vadd.f32 %v2798_v62, %v2765_v4  ;;  %v2821_v9 = vmul.f32 0.5, %v2813_v46 }
 0x709   :  { %7615 = verf.f32 %v2827_v5  ;;  %v2828_v47 = vmul.f32 0.70710677, %v2812_v6  ;;  %v2820_v17 = vmul.f32 0.5, %v2812_v6 }
 0x70a   :  { %7617 = verf.f32 %v2829_v10  ;;  %v2830_v49 = vmul.f32 0.70710677, %v2814_v11  ;;  %v2822_v3 = vmul.f32 0.5, %v2814_v11 }
 0x70b   :  { %7619 = verf.f32 %v2828_v47 }
 0x70c   :  { %7621 = verf.f32 %v2830_v49 }
 0x713   :  { %v7616_v14 = vpop.eup %7615 }
 0x714   :  { %v7618_v15 = vpop.eup %7617  ;;  %v2843_v7 = vadd.f32 1.0, %v7616_v14 }
 0x715   :  { %v7620_v8 = vpop.eup %7619  ;;  %v2845_v61 = vadd.f32 1.0, %v7618_v15 }
 0x716   :  { %v7622_v29 = vpop.eup %7621  ;;  %v8551_v48 = vmul.f32 %v2843_v7, %v2819_v50  ;;  %v2844_v19 = vadd.f32 1.0, %v7620_v8 }
 0x717   :  { %v8553_v20 = vmul.f32 %v2845_v61, %v2821_v9  ;;  %v2846_v21 = vadd.f32 1.0, %v7622_v29 }
 0x718   :  { %v8555_v22 = vmul.f32 %v2844_v19, %v2820_v17 }
 0x719   :  { %v8557_v23 = vmul.f32 %v2846_v21, %v2822_v3 }
 0x71a   :  { %8023 = dma.done.wait [#allocation4 + $0x1], 57344 }
 0x71b   :  { %8024 = vsyncadd [#allocation4 + $0x1], 4294909952  ;;  %4304 = vmatprep.mubr.f32.mxu0 %v8511_v58  ;;  %4588 = vmatprep.mubr.f32.mxu1 %v8511_v58  ;;  %v2860_v24 = vld [vmem:[#allocation3 + $0x8] sm:$0xff]  ;;  %v2862_v25 = vld [vmem:[#allocation3 + $0x18] sm:$0xff] }
 0x71c   :  { %v2859_v51 = vld [vmem:[#allocation3] sm:$0xff]  ;;  %6391 = vmatprep.subr.bf16.mxu0 %v2860_v24  ;;  %6647 = vmatprep.subr.bf16.mxu1 %v2862_v25  ;;  %v2861_v26 = vld [vmem:[#allocation3 + $0x10] sm:$0xff]  ;;  %v2866_v35 = vld [vmem:[#allocation3 + $0x38] sm:$0xff] }
 0x71d   :  { %v2867_v27 = vld [vmem:[#allocation3 + $0x40] sm:$0xff]  ;;  %v2869_v28 = vld [vmem:[#allocation3 + $0x50] sm:$0xff]  ;;  %6393 = vmatpush1.bf16.msra.mxu0 %v2859_v51  ;;  %6649 = vmatpush1.bf16.msra.mxu1 %v2861_v26  ;;  %v2868_v36 = vld [vmem:[#allocation3 + $0x48] sm:$0xff] }
 0x71e   :  { %6395 = vmatprep.subr.bf16.mxu0 %v2867_v27  ;;  %6651 = vmatprep.subr.bf16.mxu1 %v2869_v28  ;;  %v2874_v37 = vld [vmem:[#allocation3 + $0x78] sm:$0xff]  ;;  %v2876_v31 = vld [vmem:[#allocation3 + $0x88] sm:$0xff]  ;;  %v2873_v38 = vld [vmem:[#allocation3 + $0x70] sm:$0xff] }
 0x71f   :  { %v2875_v39 = vld [vmem:[#allocation3 + $0x80] sm:$0xff]  ;;  %v2881_v40 = vld [vmem:[#allocation3 + $0xb0] sm:$0xff]  ;;  %v2880_v42 = vld [vmem:[#allocation3 + $0xa8] sm:$0xff] }
 0x720   :  { %v2883_v41 = vld [vmem:[#allocation3 + $0xc0] sm:$0xff]  ;;  %v2882_v43 = vld [vmem:[#allocation3 + $0xb8] sm:$0xff]  ;;  %v2888_v33 = vld [vmem:[#allocation3 + $0xe8] sm:$0xff] }
 0x721   :  { %6397 = vmatpush1.bf16.msra.mxu0 %v2866_v35  ;;  %6653 = vmatpush1.bf16.msra.mxu1 %v2868_v36  ;;  %v2890_v44 = vld [vmem:[#allocation3 + $0xf8] sm:$0xff]  ;;  %v2887_v45 = vld [vmem:[#allocation3 + $0xe0] sm:$0xff]  ;;  %v2889_v52 = vld [vmem:[#allocation3 + $0xf0] sm:$0xff] }
 0x722   :  { %6399 = vmatprep.subr.bf16.mxu0 %v2874_v37  ;;  %6655 = vmatprep.subr.bf16.mxu1 %v2876_v31  ;;  %v2895_v53 = vld [vmem:[#allocation3 + $0x120] sm:$0xff]  ;;  %v2897_v18 = vld [vmem:[#allocation3 + $0x130] sm:$0xff]  ;;  %v2894_v55 = vld [vmem:[#allocation3 + $0x118] sm:$0xff] }
 0x723   :  { %v2896_v34 = vld [vmem:[#allocation3 + $0x128] sm:$0xff]  ;;  %v2902_v16 = vld [vmem:[#allocation3 + $0x158] sm:$0xff]  ;;  %v2901_v62 = vld [vmem:[#allocation3 + $0x150] sm:$0xff] }
 0x724   :  { %v2904_v57 = vld [vmem:[#allocation3 + $0x168] sm:$0xff]  ;;  %v2903_v1 = vld [vmem:[#allocation3 + $0x160] sm:$0xff]  ;;  %v2909_v2 = vld [vmem:[#allocation3 + $0x190] sm:$0xff] }
 0x725   :  { %6401 = vmatpush1.bf16.msra.mxu0 %v2873_v38  ;;  %6657 = vmatpush1.bf16.msra.mxu1 %v2875_v39  ;;  %v2911_v46 = vld [vmem:[#allocation3 + $0x1a0] sm:$0xff]  ;;  %v2908_v4 = vld [vmem:[#allocation3 + $0x188] sm:$0xff]  ;;  %v2910_v5 = vld [vmem:[#allocation3 + $0x198] sm:$0xff] }
 0x726   :  { %6403 = vmatprep.subr.bf16.mxu0 %v2881_v40  ;;  %6659 = vmatprep.subr.bf16.mxu1 %v2883_v41  ;;  %v2916_v6 = vld [vmem:[#allocation3 + $0x1c8] sm:$0xff]  ;;  %v2918_v10 = vld [vmem:[#allocation3 + $0x1d8] sm:$0xff]  ;;  %v2915_v11 = vld [vmem:[#allocation3 + $0x1c0] sm:$0xff] }
 0x727   :  { %v2917_v47 = vld [vmem:[#allocation3 + $0x1d0] sm:$0xff]  ;;  %v2923_v49 = vld [vmem:[#allocation3 + $0x200] sm:$0xff]  ;;  %v2922_v15 = vld [vmem:[#allocation3 + $0x1f8] sm:$0xff] }
 0x728   :  { %v2925_v14 = vld [vmem:[#allocation3 + $0x210] sm:$0xff]  ;;  %v2924_v50 = vld [vmem:[#allocation3 + $0x208] sm:$0xff]  ;;  %v2930_v7 = vld [vmem:[#allocation3 + $0x238] sm:$0xff] }
 0x729   :  { %6405 = vmatpush1.bf16.msra.mxu0 %v2880_v42  ;;  %6661 = vmatpush1.bf16.msra.mxu1 %v2882_v43  ;;  %v2932_v8 = vld [vmem:[#allocation3 + $0x248] sm:$0xff]  ;;  %v2929_v9 = vld [vmem:[#allocation3 + $0x230] sm:$0xff]  ;;  %v2931_v61 = vld [vmem:[#allocation3 + $0x240] sm:$0xff] }
 0x72a   :  { %6407 = vmatprep.subr.bf16.mxu0 %v2888_v33  ;;  %6663 = vmatprep.subr.bf16.mxu1 %v2890_v44  ;;  %v2937_v29 = vld [vmem:[#allocation3 + $0x270] sm:$0xff]  ;;  %v2939_v17 = vld [vmem:[#allocation3 + $0x280] sm:$0xff]  ;;  %v2936_v19 = vld [vmem:[#allocation3 + $0x268] sm:$0xff] }
 0x72b   :  { %v2938_v3 = vld [vmem:[#allocation3 + $0x278] sm:$0xff]  ;;  %v2944_v21 = vld [vmem:[#allocation3 + $0x2a8] sm:$0xff]  ;;  %v2943_v25 = vld [vmem:[#allocation3 + $0x2a0] sm:$0xff] }
 0x72c   :  { %v2946_v24 = vld [vmem:[#allocation3 + $0x2b8] sm:$0xff]  ;;  %v2945_v51 = vld [vmem:[#allocation3 + $0x2b0] sm:$0xff]  ;;  %v2951_v26 = vld [vmem:[#allocation3 + $0x2e0] sm:$0xff] }
 0x72d   :  { %6409 = vmatpush1.bf16.msra.mxu0 %v2887_v45  ;;  %6665 = vmatpush1.bf16.msra.mxu1 %v2889_v52  ;;  %v2953_v27 = vld [vmem:[#allocation3 + $0x2f0] sm:$0xff]  ;;  %v2950_v28 = vld [vmem:[#allocation3 + $0x2d8] sm:$0xff]  ;;  %v2952_v35 = vld [vmem:[#allocation3 + $0x2e8] sm:$0xff] }
 0x72e   :  { %6411 = vmatprep.subr.bf16.mxu0 %v2895_v53  ;;  %6667 = vmatprep.subr.bf16.mxu1 %v2897_v18  ;;  %v2958_v36 = vld [vmem:[#allocation3 + $0x318] sm:$0xff]  ;;  %v2960_v37 = vld [vmem:[#allocation3 + $0x328] sm:$0xff]  ;;  %v2957_v31 = vld [vmem:[#allocation3 + $0x310] sm:$0xff] }
 0x72f   :  { %v2959_v38 = vld [vmem:[#allocation3 + $0x320] sm:$0xff]  ;;  %v2965_v39 = vld [vmem:[#allocation3 + $0x350] sm:$0xff]  ;;  %v2964_v41 = vld [vmem:[#allocation3 + $0x348] sm:$0xff] }
 0x730   :  { %v2967_v40 = vld [vmem:[#allocation3 + $0x360] sm:$0xff]  ;;  %v2966_v42 = vld [vmem:[#allocation3 + $0x358] sm:$0xff]  ;;  %v2972_v43 = vld [vmem:[#allocation3 + $0x388] sm:$0xff] }
 0x731   :  { %6413 = vmatpush1.bf16.msra.mxu0 %v2894_v55  ;;  %6669 = vmatpush1.bf16.msra.mxu1 %v2896_v34  ;;  %v2974_v33 = vld [vmem:[#allocation3 + $0x398] sm:$0xff]  ;;  %v2971_v44 = vld [vmem:[#allocation3 + $0x380] sm:$0xff]  ;;  %v2973_v45 = vld [vmem:[#allocation3 + $0x390] sm:$0xff] }
 0x732   :  { %6415 = vmatprep.subr.bf16.mxu0 %v2902_v16  ;;  %6671 = vmatprep.subr.bf16.mxu1 %v2904_v57  ;;  %v2979_v52 = vld [vmem:[#allocation3 + $0x3c0] sm:$0xff]  ;;  %v2981_v53 = vld [vmem:[#allocation3 + $0x3d0] sm:$0xff]  ;;  %v2978_v18 = vld [vmem:[#allocation3 + $0x3b8] sm:$0xff] }
 0x733   :  { %v2980_v55 = vld [vmem:[#allocation3 + $0x3c8] sm:$0xff]  ;;  %v2986_v34 = vld [vmem:[#allocation3 + $0x3f8] sm:$0xff]  ;;  %v2985_v57 = vld [vmem:[#allocation3 + $0x3f0] sm:$0xff] }
 0x734   :  { %v2988_v16 = vld [vmem:[#allocation3 + $0x408] sm:$0xff] }
 0x735   :  { %6417 = vmatpush1.bf16.msra.mxu0 %v2901_v62  ;;  %6673 = vmatpush1.bf16.msra.mxu1 %v2903_v1  ;;  %v2987_v62 = vld [vmem:[#allocation3 + $0x400] sm:$0xff]  ;;  %v2993_v1 = vld [vmem:[#allocation3 + $0x430] sm:$0xff] }
 0x736   :  { %6419 = vmatprep.subr.bf16.mxu0 %v2909_v2  ;;  %6675 = vmatprep.subr.bf16.mxu1 %v2911_v46  ;;  %v2995_v2 = vld [vmem:[#allocation3 + $0x440] sm:$0xff]  ;;  %v2992_v46 = vld [vmem:[#allocation3 + $0x428] sm:$0xff] }
 0x739   :  { %6421 = vmatpush1.bf16.msra.mxu0 %v2908_v4  ;;  %6677 = vmatpush1.bf16.msra.mxu1 %v2910_v5  ;;  %v2994_v4 = vld [vmem:[#allocation3 + $0x438] sm:$0xff]  ;;  %v3000_v5 = vld [vmem:[#allocation3 + $0x468] sm:$0xff] }
 0x73a   :  { %6423 = vmatprep.subr.bf16.mxu0 %v2916_v6  ;;  %6679 = vmatprep.subr.bf16.mxu1 %v2918_v10  ;;  %v3002_v6 = vld [vmem:[#allocation3 + $0x478] sm:$0xff]  ;;  %v2999_v10 = vld [vmem:[#allocation3 + $0x460] sm:$0xff] }
 0x73d   :  { %6425 = vmatpush1.bf16.msra.mxu0 %v2915_v11  ;;  %6681 = vmatpush1.bf16.msra.mxu1 %v2917_v47  ;;  %v3001_v11 = vld [vmem:[#allocation3 + $0x470] sm:$0xff]  ;;  %v3007_v47 = vld [vmem:[#allocation3 + $0x4a0] sm:$0xff] }
 0x73e   :  { %6427 = vmatprep.subr.bf16.mxu0 %v2923_v49  ;;  %6683 = vmatprep.subr.bf16.mxu1 %v2925_v14  ;;  %v3009_v49 = vld [vmem:[#allocation3 + $0x4b0] sm:$0xff]  ;;  %v3006_v14 = vld [vmem:[#allocation3 + $0x498] sm:$0xff] }
 0x741   :  { %6429 = vmatpush1.bf16.msra.mxu0 %v2922_v15  ;;  %6685 = vmatpush1.bf16.msra.mxu1 %v2924_v50  ;;  %v3008_v15 = vld [vmem:[#allocation3 + $0x4a8] sm:$0xff]  ;;  %v3014_v50 = vld [vmem:[#allocation3 + $0x4d8] sm:$0xff] }
 0x742   :  { %6431 = vmatprep.subr.bf16.mxu0 %v2930_v7  ;;  %6687 = vmatprep.subr.bf16.mxu1 %v2932_v8  ;;  %v3016_v7 = vld [vmem:[#allocation3 + $0x4e8] sm:$0xff]  ;;  %v3013_v8 = vld [vmem:[#allocation3 + $0x4d0] sm:$0xff] }
 0x745   :  { %6433 = vmatpush1.bf16.msra.mxu0 %v2929_v9  ;;  %6689 = vmatpush1.bf16.msra.mxu1 %v2931_v61  ;;  %v3015_v9 = vld [vmem:[#allocation3 + $0x4e0] sm:$0xff]  ;;  %v3021_v61 = vld [vmem:[#allocation3 + $0x510] sm:$0xff] }
 0x746   :  { %6435 = vmatprep.subr.bf16.mxu0 %v2937_v29  ;;  %6691 = vmatprep.subr.bf16.mxu1 %v2939_v17  ;;  %v3023_v29 = vld [vmem:[#allocation3 + $0x520] sm:$0xff]  ;;  %v3020_v17 = vld [vmem:[#allocation3 + $0x508] sm:$0xff] }
 0x749   :  { %6437 = vmatpush1.bf16.msra.mxu0 %v2936_v19  ;;  %6693 = vmatpush1.bf16.msra.mxu1 %v2938_v3  ;;  %v3022_v19 = vld [vmem:[#allocation3 + $0x518] sm:$0xff]  ;;  %v3028_v3 = vld [vmem:[#allocation3 + $0x548] sm:$0xff] }
 0x74a   :  { %6439 = vmatprep.subr.bf16.mxu0 %v2944_v21  ;;  %6695 = vmatprep.subr.bf16.mxu1 %v2946_v24  ;;  %v3030_v21 = vld [vmem:[#allocation3 + $0x558] sm:$0xff]  ;;  %v3027_v24 = vld [vmem:[#allocation3 + $0x540] sm:$0xff] }
 0x74d   :  { %6441 = vmatpush1.bf16.msra.mxu0 %v2943_v25  ;;  %6697 = vmatpush1.bf16.msra.mxu1 %v2945_v51  ;;  %v3029_v25 = vld [vmem:[#allocation3 + $0x550] sm:$0xff]  ;;  %v3035_v51 = vld [vmem:[#allocation3 + $0x580] sm:$0xff] }
 0x74e   :  { %6443 = vmatprep.subr.bf16.mxu0 %v2951_v26  ;;  %6699 = vmatprep.subr.bf16.mxu1 %v2953_v27  ;;  %v3037_v26 = vld [vmem:[#allocation3 + $0x590] sm:$0xff]  ;;  %v3034_v27 = vld [vmem:[#allocation3 + $0x578] sm:$0xff] }
 0x751   :  { %6445 = vmatpush1.bf16.msra.mxu0 %v2950_v28  ;;  %6701 = vmatpush1.bf16.msra.mxu1 %v2952_v35  ;;  %v3036_v28 = vld [vmem:[#allocation3 + $0x588] sm:$0xff]  ;;  %v3042_v35 = vld [vmem:[#allocation3 + $0x5b8] sm:$0xff] }
 0x752   :  { %6447 = vmatprep.subr.bf16.mxu0 %v2958_v36  ;;  %6703 = vmatprep.subr.bf16.mxu1 %v2960_v37  ;;  %v3044_v36 = vld [vmem:[#allocation3 + $0x5c8] sm:$0xff]  ;;  %v3041_v37 = vld [vmem:[#allocation3 + $0x5b0] sm:$0xff] }
 0x755   :  { %6449 = vmatpush1.bf16.msra.mxu0 %v2957_v31  ;;  %6705 = vmatpush1.bf16.msra.mxu1 %v2959_v38  ;;  %v3043_v31 = vld [vmem:[#allocation3 + $0x5c0] sm:$0xff]  ;;  %v3049_v38 = vld [vmem:[#allocation3 + $0x5f0] sm:$0xff] }
 0x756   :  { %6451 = vmatprep.subr.bf16.mxu0 %v2965_v39  ;;  %6707 = vmatprep.subr.bf16.mxu1 %v2967_v40  ;;  %v3051_v39 = vld [vmem:[#allocation3 + $0x600] sm:$0xff]  ;;  %v3048_v40 = vld [vmem:[#allocation3 + $0x5e8] sm:$0xff] }
 0x759   :  { %6453 = vmatpush1.bf16.msra.mxu0 %v2964_v41  ;;  %6709 = vmatpush1.bf16.msra.mxu1 %v2966_v42  ;;  %v3050_v41 = vld [vmem:[#allocation3 + $0x5f8] sm:$0xff]  ;;  %v3056_v42 = vld [vmem:[#allocation3 + $0x628] sm:$0xff] }
 0x75a   :  { %6455 = vmatprep.subr.bf16.mxu0 %v2972_v43  ;;  %6711 = vmatprep.subr.bf16.mxu1 %v2974_v33  ;;  %v3058_v43 = vld [vmem:[#allocation3 + $0x638] sm:$0xff]  ;;  %v3055_v33 = vld [vmem:[#allocation3 + $0x620] sm:$0xff] }
 0x75c   :  { %4305 = vmatmul.mubr.f32.vlgmr.msra.gmra.mrb[6].mxu0 %v8507_v54  ;;  %4589 = vmatmul.mubr.f32.vlgmr.msra.gmra.mrb[10].mxu1 %v8507_v54 }
 0x75d   :  { %6457 = vmatpush1.bf16.msra.mxu0 %v2971_v44  ;;  %6713 = vmatpush1.bf16.msra.mxu1 %v2973_v45  ;;  %v3057_v44 = vld [vmem:[#allocation3 + $0x630] sm:$0xff]  ;;  %v3063_v45 = vld [vmem:[#allocation3 + $0x660] sm:$0xff] }
 0x75e   :  { %6459 = vmatprep.subr.bf16.mxu0 %v2979_v52  ;;  %6715 = vmatprep.subr.bf16.mxu1 %v2981_v53  ;;  %v3065_v52 = vld [vmem:[#allocation3 + $0x670] sm:$0xff]  ;;  %v3062_v53 = vld [vmem:[#allocation3 + $0x658] sm:$0xff] }
 0x75f   :  { %4375 = vmatprep.mubr.f32.mxu0 %v8513_v12  ;;  %4659 = vmatprep.mubr.f32.mxu1 %v8513_v12 }
 0x761   :  { %6461 = vmatpush1.bf16.msra.mxu0 %v2978_v18  ;;  %6717 = vmatpush1.bf16.msra.mxu1 %v2980_v55  ;;  %v3064_v18 = vld [vmem:[#allocation3 + $0x668] sm:$0xff]  ;;  %v3070_v55 = vld [vmem:[#allocation3 + $0x698] sm:$0xff] }
 0x762   :  { %6463 = vmatprep.subr.bf16.mxu0 %v2986_v34  ;;  %6719 = vmatprep.subr.bf16.mxu1 %v2988_v16  ;;  %v3072_v34 = vld [vmem:[#allocation3 + $0x6a8] sm:$0xff]  ;;  %v3069_v16 = vld [vmem:[#allocation3 + $0x690] sm:$0xff] }
 0x765   :  { %6465 = vmatpush1.bf16.msra.mxu0 %v2985_v57  ;;  %6721 = vmatpush1.bf16.msra.mxu1 %v2987_v62  ;;  %v3071_v57 = vld [vmem:[#allocation3 + $0x6a0] sm:$0xff]  ;;  %v3077_v62 = vld [vmem:[#allocation3 + $0x6d0] sm:$0xff] }
 0x766   :  { %6467 = vmatprep.subr.bf16.mxu0 %v2993_v1  ;;  %6723 = vmatprep.subr.bf16.mxu1 %v2995_v2  ;;  %v3079_v1 = vld [vmem:[#allocation3 + $0x6e0] sm:$0xff]  ;;  %v3076_v2 = vld [vmem:[#allocation3 + $0x6c8] sm:$0xff] }
 0x769   :  { %6469 = vmatpush1.bf16.msra.mxu0 %v2992_v46  ;;  %6725 = vmatpush1.bf16.msra.mxu1 %v2994_v4  ;;  %v3078_v46 = vld [vmem:[#allocation3 + $0x6d8] sm:$0xff]  ;;  %v3084_v4 = vld [vmem:[#allocation3 + $0x708] sm:$0xff] }
 0x76a   :  { %6471 = vmatprep.subr.bf16.mxu0 %v3000_v5  ;;  %6727 = vmatprep.subr.bf16.mxu1 %v3002_v6  ;;  %v3086_v5 = vld [vmem:[#allocation3 + $0x718] sm:$0xff]  ;;  %v3083_v6 = vld [vmem:[#allocation3 + $0x700] sm:$0xff] }
 0x76d   :  { %6473 = vmatpush1.bf16.msra.mxu0 %v2999_v10  ;;  %6729 = vmatpush1.bf16.msra.mxu1 %v3001_v11  ;;  %v3085_v10 = vld [vmem:[#allocation3 + $0x710] sm:$0xff]  ;;  %v3091_v11 = vld [vmem:[#allocation3 + $0x740] sm:$0xff] }
 0x76e   :  { %6475 = vmatprep.subr.bf16.mxu0 %v3007_v47  ;;  %6731 = vmatprep.subr.bf16.mxu1 %v3009_v49  ;;  %v3093_v47 = vld [vmem:[#allocation3 + $0x750] sm:$0xff]  ;;  %v3090_v49 = vld [vmem:[#allocation3 + $0x738] sm:$0xff] }
 0x771   :  { %6477 = vmatpush1.bf16.msra.mxu0 %v3006_v14  ;;  %6733 = vmatpush1.bf16.msra.mxu1 %v3008_v15  ;;  %v3092_v14 = vld [vmem:[#allocation3 + $0x748] sm:$0xff]  ;;  %v3098_v15 = vld [vmem:[#allocation3 + $0x778] sm:$0xff] }
 0x772   :  { %6479 = vmatprep.subr.bf16.mxu0 %v3014_v50  ;;  %6735 = vmatprep.subr.bf16.mxu1 %v3016_v7  ;;  %v3100_v50 = vld [vmem:[#allocation3 + $0x788] sm:$0xff]  ;;  %v3097_v7 = vld [vmem:[#allocation3 + $0x770] sm:$0xff] }
 0x775   :  { %6481 = vmatpush1.bf16.msra.mxu0 %v3013_v8  ;;  %6737 = vmatpush1.bf16.msra.mxu1 %v3015_v9  ;;  %v3099_v8 = vld [vmem:[#allocation3 + $0x780] sm:$0xff]  ;;  %v3105_v9 = vld [vmem:[#allocation3 + $0x7b0] sm:$0xff] }
 0x776   :  { %6483 = vmatprep.subr.bf16.mxu0 %v3021_v61  ;;  %6739 = vmatprep.subr.bf16.mxu1 %v3023_v29  ;;  %v3107_v61 = vld [vmem:[#allocation3 + $0x7c0] sm:$0xff]  ;;  %v3104_v29 = vld [vmem:[#allocation3 + $0x7a8] sm:$0xff] }
 0x779   :  { %6485 = vmatpush1.bf16.msra.mxu0 %v3020_v17  ;;  %6741 = vmatpush1.bf16.msra.mxu1 %v3022_v19  ;;  %v3106_v17 = vld [vmem:[#allocation3 + $0x7b8] sm:$0xff]  ;;  %v3112_v19 = vld [vmem:[#allocation3 + $0x7e8] sm:$0xff] }
 0x77a   :  { %6487 = vmatprep.subr.bf16.mxu0 %v3028_v3  ;;  %6743 = vmatprep.subr.bf16.mxu1 %v3030_v21  ;;  %v3114_v3 = vld [vmem:[#allocation3 + $0x7f8] sm:$0xff]  ;;  %v3111_v21 = vld [vmem:[#allocation3 + $0x7e0] sm:$0xff] }
 0x77d   :  { %6489 = vmatpush1.bf16.msra.mxu0 %v3027_v24  ;;  %6745 = vmatpush1.bf16.msra.mxu1 %v3029_v25  ;;  %v3113_v24 = vld [vmem:[#allocation3 + $0x7f0] sm:$0xff]  ;;  %v3119_v25 = vld [vmem:[#allocation3 + $0x820] sm:$0xff] }
 0x77e   :  { %6491 = vmatprep.subr.bf16.mxu0 %v3035_v51  ;;  %6747 = vmatprep.subr.bf16.mxu1 %v3037_v26  ;;  %v3121_v51 = vld [vmem:[#allocation3 + $0x830] sm:$0xff]  ;;  %v3118_v26 = vld [vmem:[#allocation3 + $0x818] sm:$0xff] }
 0x781   :  { %6493 = vmatpush1.bf16.msra.mxu0 %v3034_v27  ;;  %6749 = vmatpush1.bf16.msra.mxu1 %v3036_v28  ;;  %v3120_v27 = vld [vmem:[#allocation3 + $0x828] sm:$0xff]  ;;  %v3126_v28 = vld [vmem:[#allocation3 + $0x858] sm:$0xff] }
 0x782   :  { %6495 = vmatprep.subr.bf16.mxu0 %v3042_v35  ;;  %6751 = vmatprep.subr.bf16.mxu1 %v3044_v36  ;;  %v3128_v35 = vld [vmem:[#allocation3 + $0x868] sm:$0xff]  ;;  %v3125_v36 = vld [vmem:[#allocation3 + $0x850] sm:$0xff] }
 0x785   :  { %6497 = vmatpush1.bf16.msra.mxu0 %v3041_v37  ;;  %6753 = vmatpush1.bf16.msra.mxu1 %v3043_v31  ;;  %v3127_v37 = vld [vmem:[#allocation3 + $0x860] sm:$0xff]  ;;  %v3133_v31 = vld [vmem:[#allocation3 + $0x890] sm:$0xff] }
 0x786   :  { %6499 = vmatprep.subr.bf16.mxu0 %v3049_v38  ;;  %6755 = vmatprep.subr.bf16.mxu1 %v3051_v39  ;;  %v3135_v38 = vld [vmem:[#allocation3 + $0x8a0] sm:$0xff]  ;;  %v3132_v39 = vld [vmem:[#allocation3 + $0x888] sm:$0xff] }
 0x789   :  { %6501 = vmatpush1.bf16.msra.mxu0 %v3048_v40  ;;  %6757 = vmatpush1.bf16.msra.mxu1 %v3050_v41  ;;  %v3134_v40 = vld [vmem:[#allocation3 + $0x898] sm:$0xff]  ;;  %v3140_v41 = vld [vmem:[#allocation3 + $0x8c8] sm:$0xff] }
 0x78a   :  { %6503 = vmatprep.subr.bf16.mxu0 %v3056_v42  ;;  %6759 = vmatprep.subr.bf16.mxu1 %v3058_v43  ;;  %v3142_v42 = vld [vmem:[#allocation3 + $0x8d8] sm:$0xff]  ;;  %v3139_v43 = vld [vmem:[#allocation3 + $0x8c0] sm:$0xff] }
 0x78d   :  { %6505 = vmatpush1.bf16.msra.mxu0 %v3055_v33  ;;  %6761 = vmatpush1.bf16.msra.mxu1 %v3057_v44  ;;  %v3141_v33 = vld [vmem:[#allocation3 + $0x8d0] sm:$0xff]  ;;  %v3147_v44 = vld [vmem:[#allocation3 + $0x900] sm:$0xff] }
 0x78e   :  { %6507 = vmatprep.subr.bf16.mxu0 %v3063_v45  ;;  %6763 = vmatprep.subr.bf16.mxu1 %v3065_v52  ;;  %v3149_v45 = vld [vmem:[#allocation3 + $0x910] sm:$0xff]  ;;  %v3146_v52 = vld [vmem:[#allocation3 + $0x8f8] sm:$0xff] }
 0x791   :  { %6509 = vmatpush1.bf16.msra.mxu0 %v3062_v53  ;;  %6765 = vmatpush1.bf16.msra.mxu1 %v3064_v18  ;;  %v3148_v53 = vld [vmem:[#allocation3 + $0x908] sm:$0xff]  ;;  %v3154_v18 = vld [vmem:[#allocation3 + $0x938] sm:$0xff] }
 0x792   :  { %6511 = vmatprep.subr.bf16.mxu0 %v3070_v55  ;;  %6767 = vmatprep.subr.bf16.mxu1 %v3072_v34  ;;  %v3156_v55 = vld [vmem:[#allocation3 + $0x948] sm:$0xff]  ;;  %v3153_v34 = vld [vmem:[#allocation3 + $0x930] sm:$0xff] }
 0x795   :  { %6513 = vmatpush1.bf16.msra.mxu0 %v3069_v16  ;;  %6769 = vmatpush1.bf16.msra.mxu1 %v3071_v57  ;;  %v3155_v16 = vld [vmem:[#allocation3 + $0x940] sm:$0xff]  ;;  %v3161_v57 = vld [vmem:[#allocation3 + $0x970] sm:$0xff] }
 0x796   :  { %6515 = vmatprep.subr.bf16.mxu0 %v3077_v62  ;;  %6771 = vmatprep.subr.bf16.mxu1 %v3079_v1  ;;  %v3163_v62 = vld [vmem:[#allocation3 + $0x980] sm:$0xff]  ;;  %v3160_v1 = vld [vmem:[#allocation3 + $0x968] sm:$0xff] }
 0x799   :  { %6517 = vmatpush1.bf16.msra.mxu0 %v3076_v2  ;;  %6773 = vmatpush1.bf16.msra.mxu1 %v3078_v46  ;;  %v3162_v2 = vld [vmem:[#allocation3 + $0x978] sm:$0xff]  ;;  %v3168_v46 = vld [vmem:[#allocation3 + $0x9a8] sm:$0xff] }
 0x79a   :  { %6519 = vmatprep.subr.bf16.mxu0 %v3084_v4  ;;  %6775 = vmatprep.subr.bf16.mxu1 %v3086_v5  ;;  %v3170_v4 = vld [vmem:[#allocation3 + $0x9b8] sm:$0xff]  ;;  %v3167_v5 = vld [vmem:[#allocation3 + $0x9a0] sm:$0xff] }
 0x79c   :  { %4376 = vmatmul.mubr.f32.vlgmr.msra.gmra.mrb[6].mxu0 %v8509_v56  ;;  %4660 = vmatmul.mubr.f32.vlgmr.msra.gmra.mrb[10].mxu1 %v8509_v56 }
 0x79d   :  { %6521 = vmatpush1.bf16.msra.mxu0 %v3083_v6  ;;  %6777 = vmatpush1.bf16.msra.mxu1 %v3085_v10  ;;  %v3169_v6 = vld [vmem:[#allocation3 + $0x9b0] sm:$0xff]  ;;  %v3175_v10 = vld [vmem:[#allocation3 + $0x9e0] sm:$0xff] }
 0x79e   :  { %6523 = vmatprep.subr.bf16.mxu0 %v3091_v11  ;;  %6779 = vmatprep.subr.bf16.mxu1 %v3093_v47  ;;  %v3177_v11 = vld [vmem:[#allocation3 + $0x9f0] sm:$0xff]  ;;  %v3174_v47 = vld [vmem:[#allocation3 + $0x9d8] sm:$0xff] }
 0x79f   :  { %4446 = vmatprep.mubr.f32.mxu0 %v8555_v22  ;;  %4730 = vmatprep.mubr.f32.mxu1 %v8555_v22 }
 0x7a1   :  { %6525 = vmatpush1.bf16.msra.mxu0 %v3090_v49  ;;  %6781 = vmatpush1.bf16.msra.mxu1 %v3092_v14  ;;  %v3176_v49 = vld [vmem:[#allocation3 + $0x9e8] sm:$0xff]  ;;  %v3182_v14 = vld [vmem:[#allocation3 + $0xa18] sm:$0xff] }
 0x7a2   :  { %6527 = vmatprep.subr.bf16.mxu0 %v3098_v15  ;;  %6783 = vmatprep.subr.bf16.mxu1 %v3100_v50  ;;  %v3184_v15 = vld [vmem:[#allocation3 + $0xa28] sm:$0xff]  ;;  %v3181_v50 = vld [vmem:[#allocation3 + $0xa10] sm:$0xff] }
 0x7a5   :  { %6529 = vmatpush1.bf16.msra.mxu0 %v3097_v7  ;;  %6785 = vmatpush1.bf16.msra.mxu1 %v3099_v8  ;;  %v3183_v7 = vld [vmem:[#allocation3 + $0xa20] sm:$0xff]  ;;  %v3189_v8 = vld [vmem:[#allocation3 + $0xa50] sm:$0xff] }
 0x7a6   :  { %6531 = vmatprep.subr.bf16.mxu0 %v3105_v9  ;;  %6787 = vmatprep.subr.bf16.mxu1 %v3107_v61  ;;  %v3191_v9 = vld [vmem:[#allocation3 + $0xa60] sm:$0xff]  ;;  %v3188_v61 = vld [vmem:[#allocation3 + $0xa48] sm:$0xff] }
 0x7a9   :  { %6533 = vmatpush1.bf16.msra.mxu0 %v3104_v29  ;;  %6789 = vmatpush1.bf16.msra.mxu1 %v3106_v17  ;;  %v3190_v29 = vld [vmem:[#allocation3 + $0xa58] sm:$0xff]  ;;  %v3196_v17 = vld [vmem:[#allocation3 + $0xa88] sm:$0xff] }
 0x7aa   :  { %6535 = vmatprep.subr.bf16.mxu0 %v3112_v19  ;;  %6791 = vmatprep.subr.bf16.mxu1 %v3114_v3  ;;  %v3198_v19 = vld [vmem:[#allocation3 + $0xa98] sm:$0xff]  ;;  %v3195_v3 = vld [vmem:[#allocation3 + $0xa80] sm:$0xff] }
 0x7ad   :  { %6537 = vmatpush1.bf16.msra.mxu0 %v3111_v21  ;;  %6793 = vmatpush1.bf16.msra.mxu1 %v3113_v24  ;;  %v3197_v21 = vld [vmem:[#allocation3 + $0xa90] sm:$0xff]  ;;  %v3203_v24 = vld [vmem:[#allocation3 + $0xac0] sm:$0xff] }
 0x7ae   :  { %6539 = vmatprep.subr.bf16.mxu0 %v3119_v25  ;;  %6795 = vmatprep.subr.bf16.mxu1 %v3121_v51  ;;  %v3205_v25 = vld [vmem:[#allocation3 + $0xad0] sm:$0xff]  ;;  %v3202_v51 = vld [vmem:[#allocation3 + $0xab8] sm:$0xff] }
 0x7b1   :  { %6541 = vmatpush1.bf16.msra.mxu0 %v3118_v26  ;;  %6797 = vmatpush1.bf16.msra.mxu1 %v3120_v27  ;;  %v3204_v26 = vld [vmem:[#allocation3 + $0xac8] sm:$0xff]  ;;  %v3210_v27 = vld [vmem:[#allocation3 + $0xaf8] sm:$0xff] }
 0x7b2   :  { %6543 = vmatprep.subr.bf16.mxu0 %v3126_v28  ;;  %6799 = vmatprep.subr.bf16.mxu1 %v3128_v35  ;;  %v3212_v28 = vld [vmem:[#allocation3 + $0xb08] sm:$0xff]  ;;  %v3209_v35 = vld [vmem:[#allocation3 + $0xaf0] sm:$0xff] }
 0x7b5   :  { %6545 = vmatpush1.bf16.msra.mxu0 %v3125_v36  ;;  %6801 = vmatpush1.bf16.msra.mxu1 %v3127_v37  ;;  %v3211_v36 = vld [vmem:[#allocation3 + $0xb00] sm:$0xff]  ;;  %v3217_v37 = vld [vmem:[#allocation3 + $0xb30] sm:$0xff] }
 0x7b6   :  { %6547 = vmatprep.subr.bf16.mxu0 %v3133_v31  ;;  %6803 = vmatprep.subr.bf16.mxu1 %v3135_v38  ;;  %v3219_v31 = vld [vmem:[#allocation3 + $0xb40] sm:$0xff]  ;;  %v3216_v38 = vld [vmem:[#allocation3 + $0xb28] sm:$0xff] }
 0x7b9   :  { %6549 = vmatpush1.bf16.msra.mxu0 %v3132_v39  ;;  %6805 = vmatpush1.bf16.msra.mxu1 %v3134_v40  ;;  %v3218_v39 = vld [vmem:[#allocation3 + $0xb38] sm:$0xff]  ;;  %v3224_v40 = vld [vmem:[#allocation3 + $0xb68] sm:$0xff] }
 0x7ba   :  { %6551 = vmatprep.subr.bf16.mxu0 %v3140_v41  ;;  %6807 = vmatprep.subr.bf16.mxu1 %v3142_v42  ;;  %v3226_v41 = vld [vmem:[#allocation3 + $0xb78] sm:$0xff]  ;;  %v3223_v42 = vld [vmem:[#allocation3 + $0xb60] sm:$0xff] }
 0x7bd   :  { %6553 = vmatpush1.bf16.msra.mxu0 %v3139_v43  ;;  %6809 = vmatpush1.bf16.msra.mxu1 %v3141_v33  ;;  %v3225_v43 = vld [vmem:[#allocation3 + $0xb70] sm:$0xff]  ;;  %v3231_v33 = vld [vmem:[#allocation3 + $0xba0] sm:$0xff] }
 0x7be   :  { %6555 = vmatprep.subr.bf16.mxu0 %v3147_v44  ;;  %6811 = vmatprep.subr.bf16.mxu1 %v3149_v45  ;;  %v3233_v44 = vld [vmem:[#allocation3 + $0xbb0] sm:$0xff]  ;;  %v3230_v45 = vld [vmem:[#allocation3 + $0xb98] sm:$0xff] }
 0x7c1   :  { %6557 = vmatpush1.bf16.msra.mxu0 %v3146_v52  ;;  %6813 = vmatpush1.bf16.msra.mxu1 %v3148_v53  ;;  %v3232_v52 = vld [vmem:[#allocation3 + $0xba8] sm:$0xff]  ;;  %v3238_v53 = vld [vmem:[#allocation3 + $0xbd8] sm:$0xff] }
 0x7c2   :  { %6559 = vmatprep.subr.bf16.mxu0 %v3154_v18  ;;  %6815 = vmatprep.subr.bf16.mxu1 %v3156_v55  ;;  %v3240_v18 = vld [vmem:[#allocation3 + $0xbe8] sm:$0xff]  ;;  %v3237_v55 = vld [vmem:[#allocation3 + $0xbd0] sm:$0xff] }
 0x7c5   :  { %6561 = vmatpush1.bf16.msra.mxu0 %v3153_v34  ;;  %6817 = vmatpush1.bf16.msra.mxu1 %v3155_v16  ;;  %v3239_v34 = vld [vmem:[#allocation3 + $0xbe0] sm:$0xff]  ;;  %v3245_v16 = vld [vmem:[#allocation3 + $0xc10] sm:$0xff] }
 0x7c6   :  { %6563 = vmatprep.subr.bf16.mxu0 %v3161_v57  ;;  %6819 = vmatprep.subr.bf16.mxu1 %v3163_v62  ;;  %v3247_v57 = vld [vmem:[#allocation3 + $0xc20] sm:$0xff]  ;;  %v3244_v62 = vld [vmem:[#allocation3 + $0xc08] sm:$0xff] }
 0x7c9   :  { %6565 = vmatpush1.bf16.msra.mxu0 %v3160_v1  ;;  %6821 = vmatpush1.bf16.msra.mxu1 %v3162_v2  ;;  %v3246_v1 = vld [vmem:[#allocation3 + $0xc18] sm:$0xff]  ;;  %v3252_v2 = vld [vmem:[#allocation3 + $0xc48] sm:$0xff] }
 0x7ca   :  { %6567 = vmatprep.subr.bf16.mxu0 %v3168_v46  ;;  %6823 = vmatprep.subr.bf16.mxu1 %v3170_v4  ;;  %v3254_v46 = vld [vmem:[#allocation3 + $0xc58] sm:$0xff]  ;;  %v3251_v4 = vld [vmem:[#allocation3 + $0xc40] sm:$0xff] }
 0x7cd   :  { %6569 = vmatpush1.bf16.msra.mxu0 %v3167_v5  ;;  %6825 = vmatpush1.bf16.msra.mxu1 %v3169_v6  ;;  %v3253_v5 = vld [vmem:[#allocation3 + $0xc50] sm:$0xff]  ;;  %v3259_v6 = vld [vmem:[#allocation3 + $0xc80] sm:$0xff] }
 0x7ce   :  { %6571 = vmatprep.subr.bf16.mxu0 %v3175_v10  ;;  %6827 = vmatprep.subr.bf16.mxu1 %v3177_v11  ;;  %v3261_v10 = vld [vmem:[#allocation3 + $0xc90] sm:$0xff]  ;;  %v3258_v11 = vld [vmem:[#allocation3 + $0xc78] sm:$0xff] }
 0x7d1   :  { %6573 = vmatpush1.bf16.msra.mxu0 %v3174_v47  ;;  %6829 = vmatpush1.bf16.msra.mxu1 %v3176_v49  ;;  %v3260_v47 = vld [vmem:[#allocation3 + $0xc88] sm:$0xff]  ;;  %v3266_v49 = vld [vmem:[#allocation3 + $0xcb8] sm:$0xff] }
 0x7d2   :  { %6575 = vmatprep.subr.bf16.mxu0 %v3182_v14  ;;  %6831 = vmatprep.subr.bf16.mxu1 %v3184_v15  ;;  %v3268_v14 = vld [vmem:[#allocation3 + $0xcc8] sm:$0xff]  ;;  %v3265_v15 = vld [vmem:[#allocation3 + $0xcb0] sm:$0xff] }
 0x7d5   :  { %6577 = vmatpush1.bf16.msra.mxu0 %v3181_v50  ;;  %6833 = vmatpush1.bf16.msra.mxu1 %v3183_v7  ;;  %v3267_v50 = vld [vmem:[#allocation3 + $0xcc0] sm:$0xff]  ;;  %v3273_v7 = vld [vmem:[#allocation3 + $0xcf0] sm:$0xff] }
 0x7d6   :  { %6579 = vmatprep.subr.bf16.mxu0 %v3189_v8  ;;  %6835 = vmatprep.subr.bf16.mxu1 %v3191_v9  ;;  %v3275_v8 = vld [vmem:[#allocation3 + $0xd00] sm:$0xff]  ;;  %v3272_v9 = vld [vmem:[#allocation3 + $0xce8] sm:$0xff] }
 0x7d9   :  { %6581 = vmatpush1.bf16.msra.mxu0 %v3188_v61  ;;  %6837 = vmatpush1.bf16.msra.mxu1 %v3190_v29  ;;  %v3274_v61 = vld [vmem:[#allocation3 + $0xcf8] sm:$0xff]  ;;  %v3280_v29 = vld [vmem:[#allocation3 + $0xd28] sm:$0xff] }
 0x7da   :  { %6583 = vmatprep.subr.bf16.mxu0 %v3196_v17  ;;  %6839 = vmatprep.subr.bf16.mxu1 %v3198_v19  ;;  %v3282_v17 = vld [vmem:[#allocation3 + $0xd38] sm:$0xff]  ;;  %v3279_v19 = vld [vmem:[#allocation3 + $0xd20] sm:$0xff] }
 0x7dc   :  { %4447 = vmatmul.mubr.f32.vlgmr.msra.gmra.mrb[6].mxu0 %v8551_v48  ;;  %4731 = vmatmul.mubr.f32.vlgmr.msra.gmra.mrb[10].mxu1 %v8551_v48 }
 0x7dd   :  { %6585 = vmatpush1.bf16.msra.mxu0 %v3195_v3  ;;  %6841 = vmatpush1.bf16.msra.mxu1 %v3197_v21  ;;  %v3281_v3 = vld [vmem:[#allocation3 + $0xd30] sm:$0xff]  ;;  %v3287_v21 = vld [vmem:[#allocation3 + $0xd60] sm:$0xff] }
 0x7de   :  { %6587 = vmatprep.subr.bf16.mxu0 %v3203_v24  ;;  %6843 = vmatprep.subr.bf16.mxu1 %v3205_v25  ;;  %v3289_v24 = vld [vmem:[#allocation3 + $0xd70] sm:$0xff]  ;;  %v3286_v25 = vld [vmem:[#allocation3 + $0xd58] sm:$0xff] }
 0x7df   :  { %4517 = vmatprep.mubr.f32.mxu0 %v8557_v23  ;;  %4801 = vmatprep.mubr.f32.mxu1 %v8557_v23 }
 0x7e1   :  { %6589 = vmatpush1.bf16.msra.mxu0 %v3202_v51  ;;  %6845 = vmatpush1.bf16.msra.mxu1 %v3204_v26  ;;  %v3288_v51 = vld [vmem:[#allocation3 + $0xd68] sm:$0xff]  ;;  %v3294_v26 = vld [vmem:[#allocation3 + $0xd98] sm:$0xff] }
 0x7e2   :  { %6591 = vmatprep.subr.bf16.mxu0 %v3210_v27  ;;  %6847 = vmatprep.subr.bf16.mxu1 %v3212_v28  ;;  %v3296_v27 = vld [vmem:[#allocation3 + $0xda8] sm:$0xff]  ;;  %v3293_v28 = vld [vmem:[#allocation3 + $0xd90] sm:$0xff] }
 0x7e5   :  { %6593 = vmatpush1.bf16.msra.mxu0 %v3209_v35  ;;  %6849 = vmatpush1.bf16.msra.mxu1 %v3211_v36  ;;  %v3295_v35 = vld [vmem:[#allocation3 + $0xda0] sm:$0xff]  ;;  %v3301_v36 = vld [vmem:[#allocation3 + $0xdd0] sm:$0xff] }
 0x7e6   :  { %6595 = vmatprep.subr.bf16.mxu0 %v3217_v37  ;;  %6851 = vmatprep.subr.bf16.mxu1 %v3219_v31  ;;  %v3303_v37 = vld [vmem:[#allocation3 + $0xde0] sm:$0xff]  ;;  %v3300_v31 = vld [vmem:[#allocation3 + $0xdc8] sm:$0xff] }
 0x7e9   :  { %6597 = vmatpush1.bf16.msra.mxu0 %v3216_v38  ;;  %6853 = vmatpush1.bf16.msra.mxu1 %v3218_v39  ;;  %v3302_v38 = vld [vmem:[#allocation3 + $0xdd8] sm:$0xff]  ;;  %v2864_v39 = vld [vmem:[#allocation3 + $0x28] sm:$0xff] }
 0x7ea   :  { %6599 = vmatprep.subr.bf16.mxu0 %v3224_v40  ;;  %6855 = vmatprep.subr.bf16.mxu1 %v3226_v41  ;;  %v2921_v40 = vld [vmem:[#allocation3 + $0x1f0] sm:$0xff]  ;;  %v2863_v41 = vld [vmem:[#allocation3 + $0x20] sm:$0xff] }
 0x7ed   :  { %6601 = vmatpush1.bf16.msra.mxu0 %v3223_v42  ;;  %6857 = vmatpush1.bf16.msra.mxu1 %v3225_v43  ;;  %v2865_v42 = vld [vmem:[#allocation3 + $0x30] sm:$0xff]  ;;  %v2871_v43 = vld [vmem:[#allocation3 + $0x60] sm:$0xff] }
 0x7ee   :  { %6603 = vmatprep.subr.bf16.mxu0 %v3231_v33  ;;  %6859 = vmatprep.subr.bf16.mxu1 %v3233_v44  ;;  %v2928_v33 = vld [vmem:[#allocation3 + $0x228] sm:$0xff]  ;;  %v2870_v44 = vld [vmem:[#allocation3 + $0x58] sm:$0xff] }
 0x7f1   :  { %6605 = vmatpush1.bf16.msra.mxu0 %v3230_v45  ;;  %6861 = vmatpush1.bf16.msra.mxu1 %v3232_v52  ;;  %v2872_v45 = vld [vmem:[#allocation3 + $0x68] sm:$0xff]  ;;  %v2878_v52 = vld [vmem:[#allocation3 + $0x98] sm:$0xff] }
 0x7f2   :  { %6607 = vmatprep.subr.bf16.mxu0 %v3238_v53  ;;  %6863 = vmatprep.subr.bf16.mxu1 %v3240_v18  ;;  %v2935_v53 = vld [vmem:[#allocation3 + $0x260] sm:$0xff]  ;;  %v2877_v18 = vld [vmem:[#allocation3 + $0x90] sm:$0xff] }
 0x7f5   :  { %6609 = vmatpush1.bf16.msra.mxu0 %v3237_v55  ;;  %6865 = vmatpush1.bf16.msra.mxu1 %v3239_v34  ;;  %v2879_v55 = vld [vmem:[#allocation3 + $0xa0] sm:$0xff]  ;;  %v2885_v34 = vld [vmem:[#allocation3 + $0xd0] sm:$0xff] }
 0x7f6   :  { %6611 = vmatprep.subr.bf16.mxu0 %v3245_v16  ;;  %6867 = vmatprep.subr.bf16.mxu1 %v3247_v57  ;;  %v2942_v16 = vld [vmem:[#allocation3 + $0x298] sm:$0xff]  ;;  %v2884_v57 = vld [vmem:[#allocation3 + $0xc8] sm:$0xff] }
 0x7f9   :  { %6613 = vmatpush1.bf16.msra.mxu0 %v3244_v62  ;;  %6869 = vmatpush1.bf16.msra.mxu1 %v3246_v1  ;;  %v2886_v62 = vld [vmem:[#allocation3 + $0xd8] sm:$0xff]  ;;  %v2892_v1 = vld [vmem:[#allocation3 + $0x108] sm:$0xff] }
 0x7fa   :  { %6615 = vmatprep.subr.bf16.mxu0 %v3252_v2  ;;  %6871 = vmatprep.subr.bf16.mxu1 %v3254_v46  ;;  %v2949_v2 = vld [vmem:[#allocation3 + $0x2d0] sm:$0xff] }
 0x7fb   :  { %v2893_v46 = vld [vmem:[#allocation3 + $0x110] sm:$0xff] }
 0x7fd   :  { %6617 = vmatpush1.bf16.msra.mxu0 %v3251_v4  ;;  %6873 = vmatpush1.bf16.msra.mxu1 %v3253_v5  ;;  %v2899_v4 = vld [vmem:[#allocation3 + $0x140] sm:$0xff]  ;;  %v2956_v5 = vld [vmem:[#allocation3 + $0x308] sm:$0xff] }
 0x7fe   :  { %6619 = vmatprep.subr.bf16.mxu0 %v3259_v6  ;;  %6875 = vmatprep.subr.bf16.mxu1 %v3261_v10  ;;  %v2898_v6 = vld [vmem:[#allocation3 + $0x138] sm:$0xff]  ;;  %v2900_v10 = vld [vmem:[#allocation3 + $0x148] sm:$0xff] }
 0x801   :  { %6621 = vmatpush1.bf16.msra.mxu0 %v3258_v11  ;;  %6877 = vmatpush1.bf16.msra.mxu1 %v3260_v47  ;;  %v2906_v11 = vld [vmem:[#allocation3 + $0x178] sm:$0xff]  ;;  %v2963_v47 = vld [vmem:[#allocation3 + $0x340] sm:$0xff] }
 0x802   :  { %6623 = vmatprep.subr.bf16.mxu0 %v3266_v49  ;;  %6879 = vmatprep.subr.bf16.mxu1 %v3268_v14  ;;  %v2905_v49 = vld [vmem:[#allocation3 + $0x170] sm:$0xff]  ;;  %v2907_v14 = vld [vmem:[#allocation3 + $0x180] sm:$0xff] }
 0x805   :  { %6625 = vmatpush1.bf16.msra.mxu0 %v3265_v15  ;;  %6881 = vmatpush1.bf16.msra.mxu1 %v3267_v50  ;;  %v2913_v15 = vld [vmem:[#allocation3 + $0x1b0] sm:$0xff]  ;;  %v2970_v50 = vld [vmem:[#allocation3 + $0x378] sm:$0xff] }
 0x806   :  { %6627 = vmatprep.subr.bf16.mxu0 %v3273_v7  ;;  %6883 = vmatprep.subr.bf16.mxu1 %v3275_v8  ;;  %v2912_v7 = vld [vmem:[#allocation3 + $0x1a8] sm:$0xff]  ;;  %v2914_v8 = vld [vmem:[#allocation3 + $0x1b8] sm:$0xff] }
 0x809   :  { %6629 = vmatpush1.bf16.msra.mxu0 %v3272_v9  ;;  %6885 = vmatpush1.bf16.msra.mxu1 %v3274_v61  ;;  %v2920_v9 = vld [vmem:[#allocation3 + $0x1e8] sm:$0xff]  ;;  %v3033_v61 = vld [vmem:[#allocation3 + $0x570] sm:$0xff] }
 0x80a   :  { %6631 = vmatprep.subr.bf16.mxu0 %v3280_v29  ;;  %6887 = vmatprep.subr.bf16.mxu1 %v3282_v17  ;;  %v2919_v29 = vld [vmem:[#allocation3 + $0x1e0] sm:$0xff]  ;;  %v2977_v17 = vld [vmem:[#allocation3 + $0x3b0] sm:$0xff] }
 0x80d   :  { %6633 = vmatpush1.bf16.msra.mxu0 %v3279_v19  ;;  %6889 = vmatpush1.bf16.msra.mxu1 %v3281_v3  ;;  %v2927_v19 = vld [vmem:[#allocation3 + $0x220] sm:$0xff]  ;;  %v3040_v3 = vld [vmem:[#allocation3 + $0x5a8] sm:$0xff] }
 0x80e   :  { %6635 = vmatprep.subr.bf16.mxu0 %v3287_v21  ;;  %6891 = vmatprep.subr.bf16.mxu1 %v3289_v24  ;;  %v2926_v21 = vld [vmem:[#allocation3 + $0x218] sm:$0xff]  ;;  %v2984_v24 = vld [vmem:[#allocation3 + $0x3e8] sm:$0xff] }
 0x811   :  { %6637 = vmatpush1.bf16.msra.mxu0 %v3286_v25  ;;  %6893 = vmatpush1.bf16.msra.mxu1 %v3288_v51  ;;  %v2934_v25 = vld [vmem:[#allocation3 + $0x258] sm:$0xff]  ;;  %v3047_v51 = vld [vmem:[#allocation3 + $0x5e0] sm:$0xff] }
 0x812   :  { %6639 = vmatprep.subr.bf16.mxu0 %v3294_v26  ;;  %6895 = vmatprep.subr.bf16.mxu1 %v3296_v27  ;;  %v2933_v26 = vld [vmem:[#allocation3 + $0x250] sm:$0xff]  ;;  %v2991_v27 = vld [vmem:[#allocation3 + $0x420] sm:$0xff] }
 0x815   :  { %6641 = vmatpush1.bf16.msra.mxu0 %v3293_v28  ;;  %6897 = vmatpush1.bf16.msra.mxu1 %v3295_v35  ;;  %v2941_v28 = vld [vmem:[#allocation3 + $0x290] sm:$0xff]  ;;  %v3054_v35 = vld [vmem:[#allocation3 + $0x618] sm:$0xff] }
 0x816   :  { %6643 = vmatprep.subr.bf16.mxu0 %v3301_v36  ;;  %6899 = vmatprep.subr.bf16.mxu1 %v3303_v37  ;;  %v2940_v36 = vld [vmem:[#allocation3 + $0x288] sm:$0xff]  ;;  %v2998_v37 = vld [vmem:[#allocation3 + $0x458] sm:$0xff] }
 0x819   :  { %6645 = vmatpush1.bf16.msra.mxu0 %v3300_v31  ;;  %6901 = vmatpush1.bf16.msra.mxu1 %v3302_v38  ;;  %v2948_v31 = vld [vmem:[#allocation3 + $0x2c8] sm:$0xff]  ;;  %v3061_v38 = vld [vmem:[#allocation3 + $0x650] sm:$0xff] }
 0x81a   :  { %6903 = vmatprep.subr.bf16.mxu0 %v2864_v39  ;;  %7159 = vmatprep.subr.bf16.mxu1 %v2921_v40  ;;  %v2947_v39 = vld [vmem:[#allocation3 + $0x2c0] sm:$0xff]  ;;  %v3005_v40 = vld [vmem:[#allocation3 + $0x490] sm:$0xff] }
 0x81c   :  { %4518 = vmatmul.mubr.f32.vlgmr.msra.gmra.mrb[6].mxu0 %v8553_v20  ;;  %4802 = vmatmul.mubr.f32.vlgmr.msra.gmra.mrb[10].mxu1 %v8553_v20 }
 0x81d   :  { %6905 = vmatpush1.bf16.msra.mxu0 %v2863_v41  ;;  %7161 = vmatpush3.bf16.msra.mxu1 %v2865_v42  ;;  %v2955_v41 = vld [vmem:[#allocation3 + $0x300] sm:$0xff]  ;;  %v3068_v42 = vld [vmem:[#allocation3 + $0x688] sm:$0xff] }
 0x81e   :  { %6907 = vmatprep.subr.bf16.mxu0 %v2871_v43  ;;  %7163 = vmatprep.subr.bf16.mxu1 %v2928_v33  ;;  %v2954_v43 = vld [vmem:[#allocation3 + $0x2f8] sm:$0xff]  ;;  %v3012_v33 = vld [vmem:[#allocation3 + $0x4c8] sm:$0xff] }
 0x81f   :  { %4872 = vmatprep.mubr.f32.mxu0 %v8511_v58  ;;  %5156 = vmatprep.mubr.f32.mxu1 %v8511_v58  ;;  %v2891_v58 = vld [vmem:[#allocation3 + $0x100] sm:$0xff] }
 0x821   :  { %6909 = vmatpush1.bf16.msra.mxu0 %v2870_v44  ;;  %7165 = vmatpush3.bf16.msra.mxu1 %v2872_v45  ;;  %v2962_v44 = vld [vmem:[#allocation3 + $0x338] sm:$0xff]  ;;  %v3075_v45 = vld [vmem:[#allocation3 + $0x6c0] sm:$0xff] }
 0x822   :  { %6911 = vmatprep.subr.bf16.mxu0 %v2878_v52  ;;  %7167 = vmatprep.subr.bf16.mxu1 %v2935_v53  ;;  %v2961_v52 = vld [vmem:[#allocation3 + $0x330] sm:$0xff]  ;;  %v3019_v53 = vld [vmem:[#allocation3 + $0x500] sm:$0xff] }
 0x825   :  { %6913 = vmatpush1.bf16.msra.mxu0 %v2877_v18  ;;  %7169 = vmatpush3.bf16.msra.mxu1 %v2879_v55  ;;  %v2969_v18 = vld [vmem:[#allocation3 + $0x370] sm:$0xff]  ;;  %v3082_v55 = vld [vmem:[#allocation3 + $0x6f8] sm:$0xff] }
 0x826   :  { %6915 = vmatprep.subr.bf16.mxu0 %v2885_v34  ;;  %7171 = vmatprep.subr.bf16.mxu1 %v2942_v16  ;;  %v2968_v34 = vld [vmem:[#allocation3 + $0x368] sm:$0xff]  ;;  %v3026_v16 = vld [vmem:[#allocation3 + $0x538] sm:$0xff] }
 0x829   :  { %6917 = vmatpush1.bf16.msra.mxu0 %v2884_v57  ;;  %7173 = vmatpush3.bf16.msra.mxu1 %v2886_v62  ;;  %v2976_v57 = vld [vmem:[#allocation3 + $0x3a8] sm:$0xff]  ;;  %v3145_v62 = vld [vmem:[#allocation3 + $0x8f0] sm:$0xff] }
 0x82a   :  { %6919 = vmatprep.subr.bf16.mxu0 %v2892_v1  ;;  %7175 = vmatprep.subr.bf16.mxu1 %v2949_v2  ;;  %v2975_v1 = vld [vmem:[#allocation3 + $0x3a0] sm:$0xff]  ;;  %v3089_v2 = vld [vmem:[#allocation3 + $0x730] sm:$0xff] }
 0x82d   :  { %6921 = vmatpush1.bf16.msra.mxu0 %v2891_v58  ;;  %7177 = vmatpush3.bf16.msra.mxu1 %v2893_v46  ;;  %v2983_v58 = vld [vmem:[#allocation3 + $0x3e0] sm:$0xff]  ;;  %v3152_v46 = vld [vmem:[#allocation3 + $0x928] sm:$0xff] }
 0x82e   :  { %6923 = vmatprep.subr.bf16.mxu0 %v2899_v4  ;;  %7179 = vmatprep.subr.bf16.mxu1 %v2956_v5  ;;  %v2982_v4 = vld [vmem:[#allocation3 + $0x3d8] sm:$0xff]  ;;  %v3096_v5 = vld [vmem:[#allocation3 + $0x768] sm:$0xff] }
 0x831   :  { %6925 = vmatpush1.bf16.msra.mxu0 %v2898_v6  ;;  %7181 = vmatpush3.bf16.msra.mxu1 %v2900_v10  ;;  %v2990_v6 = vld [vmem:[#allocation3 + $0x418] sm:$0xff]  ;;  %v3159_v10 = vld [vmem:[#allocation3 + $0x960] sm:$0xff] }
 0x832   :  { %6927 = vmatprep.subr.bf16.mxu0 %v2906_v11  ;;  %7183 = vmatprep.subr.bf16.mxu1 %v2963_v47  ;;  %v2989_v11 = vld [vmem:[#allocation3 + $0x410] sm:$0xff] }
 0x833   :  { %v2997_v47 = vld [vmem:[#allocation3 + $0x450] sm:$0xff] }
 0x835   :  { %6929 = vmatpush1.bf16.msra.mxu0 %v2905_v49  ;;  %7185 = vmatpush3.bf16.msra.mxu1 %v2907_v14  ;;  %v3166_v49 = vld [vmem:[#allocation3 + $0x998] sm:$0xff]  ;;  %v2996_v14 = vld [vmem:[#allocation3 + $0x448] sm:$0xff] }
 0x836   :  { %6931 = vmatprep.subr.bf16.mxu0 %v2913_v15  ;;  %7187 = vmatprep.subr.bf16.mxu1 %v2970_v50  ;;  %v3110_v15 = vld [vmem:[#allocation3 + $0x7d8] sm:$0xff]  ;;  %v3004_v50 = vld [vmem:[#allocation3 + $0x488] sm:$0xff] }
 0x839   :  { %6933 = vmatpush1.bf16.msra.mxu0 %v2912_v7  ;;  %7189 = vmatpush3.bf16.msra.mxu1 %v2914_v8  ;;  %v3173_v7 = vld [vmem:[#allocation3 + $0x9d0] sm:$0xff] }
 0x83a   :  { %6935 = vmatprep.subr.bf16.mxu0 %v2920_v9  ;;  %7191 = vmatprep.subr.bf16.mxu1 %v3033_v61  ;;  %v3117_v8 = vld [vmem:[#allocation3 + $0x810] sm:$0xff]  ;;  %v3011_v9 = vld [vmem:[#allocation3 + $0x4c0] sm:$0xff]  ;;  %v3180_v61 = vld [vmem:[#allocation3 + $0xa08] sm:$0xff] }
 0x83c   :  { %5157 = vmatmul.mubr.f32.vlgmr.msra.gmra.mrb[12].mxu1 %v8507_v54 }
 0x83d   :  { %6937 = vmatpush1.bf16.msra.mxu0 %v2919_v29  ;;  %7193 = vmatpush3.bf16.msra.mxu1 %v2977_v17  ;;  %v3010_v29 = vld [vmem:[#allocation3 + $0x4b8] sm:$0xff]  ;;  %v3124_v17 = vld [vmem:[#allocation3 + $0x848] sm:$0xff] }
 0x83e   :  { %6939 = vmatprep.subr.bf16.mxu0 %v2927_v19  ;;  %7195 = vmatprep.subr.bf16.mxu1 %v3040_v3  ;;  %v3018_v19 = vld [vmem:[#allocation3 + $0x4f8] sm:$0xff]  ;;  %v3187_v3 = vld [vmem:[#allocation3 + $0xa40] sm:$0xff] }
 0x83f   :  { %5226 = vmatprep.mubr.f32.mxu1 %v8513_v12 }
 0x841   :  { %6941 = vmatpush1.bf16.msra.mxu0 %v2926_v21  ;;  %7197 = vmatpush3.bf16.msra.mxu1 %v2984_v24  ;;  %v3017_v21 = vld [vmem:[#allocation3 + $0x4f0] sm:$0xff]  ;;  %v3131_v24 = vld [vmem:[#allocation3 + $0x880] sm:$0xff] }
 0x842   :  { %6943 = vmatprep.subr.bf16.mxu0 %v2934_v25  ;;  %7199 = vmatprep.subr.bf16.mxu1 %v3047_v51  ;;  %v3025_v25 = vld [vmem:[#allocation3 + $0x530] sm:$0xff]  ;;  %v3194_v51 = vld [vmem:[#allocation3 + $0xa78] sm:$0xff] }
 0x845   :  { %6945 = vmatpush1.bf16.msra.mxu0 %v2933_v26  ;;  %7201 = vmatpush3.bf16.msra.mxu1 %v2991_v27  ;;  %v3024_v26 = vld [vmem:[#allocation3 + $0x528] sm:$0xff]  ;;  %v3138_v27 = vld [vmem:[#allocation3 + $0x8b8] sm:$0xff] }
 0x846   :  { %6947 = vmatprep.subr.bf16.mxu0 %v2941_v28  ;;  %7203 = vmatprep.subr.bf16.mxu1 %v3054_v35  ;;  %v3032_v28 = vld [vmem:[#allocation3 + $0x568] sm:$0xff]  ;;  %v3257_v35 = vld [vmem:[#allocation3 + $0xc70] sm:$0xff] }
 0x849   :  { %6949 = vmatpush1.bf16.msra.mxu0 %v2940_v36  ;;  %7205 = vmatpush3.bf16.msra.mxu1 %v2998_v37  ;;  %v3031_v36 = vld [vmem:[#allocation3 + $0x560] sm:$0xff]  ;;  %v3201_v37 = vld [vmem:[#allocation3 + $0xab0] sm:$0xff] }
 0x84a   :  { %6951 = vmatprep.subr.bf16.mxu0 %v2948_v31  ;;  %7207 = vmatprep.subr.bf16.mxu1 %v3061_v38  ;;  %v3039_v31 = vld [vmem:[#allocation3 + $0x5a0] sm:$0xff]  ;;  %v3264_v38 = vld [vmem:[#allocation3 + $0xca8] sm:$0xff] }
 0x84d   :  { %6953 = vmatpush1.bf16.msra.mxu0 %v2947_v39  ;;  %7209 = vmatpush3.bf16.msra.mxu1 %v3005_v40  ;;  %v3038_v39 = vld [vmem:[#allocation3 + $0x598] sm:$0xff]  ;;  %v3208_v40 = vld [vmem:[#allocation3 + $0xae8] sm:$0xff] }
 0x84e   :  { %6955 = vmatprep.subr.bf16.mxu0 %v2955_v41  ;;  %7211 = vmatprep.subr.bf16.mxu1 %v3068_v42  ;;  %v3046_v41 = vld [vmem:[#allocation3 + $0x5d8] sm:$0xff]  ;;  %v3271_v42 = vld [vmem:[#allocation3 + $0xce0] sm:$0xff] }
 0x851   :  { %6957 = vmatpush1.bf16.msra.mxu0 %v2954_v43  ;;  %7213 = vmatpush3.bf16.msra.mxu1 %v3012_v33  ;;  %v3045_v43 = vld [vmem:[#allocation3 + $0x5d0] sm:$0xff]  ;;  %v3215_v33 = vld [vmem:[#allocation3 + $0xb20] sm:$0xff] }
 0x852   :  { %6959 = vmatprep.subr.bf16.mxu0 %v2962_v44  ;;  %7215 = vmatprep.subr.bf16.mxu1 %v3075_v45  ;;  %v3053_v44 = vld [vmem:[#allocation3 + $0x610] sm:$0xff]  ;;  %v3278_v45 = vld [vmem:[#allocation3 + $0xd18] sm:$0xff] }
 0x855   :  { %6961 = vmatpush1.bf16.msra.mxu0 %v2961_v52  ;;  %7217 = vmatpush3.bf16.msra.mxu1 %v3019_v53  ;;  %v3052_v52 = vld [vmem:[#allocation3 + $0x608] sm:$0xff]  ;;  %v3222_v53 = vld [vmem:[#allocation3 + $0xb58] sm:$0xff] }
 0x856   :  { %6963 = vmatprep.subr.bf16.mxu0 %v2969_v18  ;;  %7219 = vmatprep.subr.bf16.mxu1 %v3082_v55  ;;  %v3060_v18 = vld [vmem:[#allocation3 + $0x648] sm:$0xff]  ;;  %v3285_v55 = vld [vmem:[#allocation3 + $0xd50] sm:$0xff] }
 0x859   :  { %6965 = vmatpush1.bf16.msra.mxu0 %v2968_v34  ;;  %7221 = vmatpush3.bf16.msra.mxu1 %v3026_v16  ;;  %v3059_v34 = vld [vmem:[#allocation3 + $0x640] sm:$0xff]  ;;  %v3229_v16 = vld [vmem:[#allocation3 + $0xb90] sm:$0xff] }
 0x85a   :  { %6967 = vmatprep.subr.bf16.mxu0 %v2976_v57  ;;  %7223 = vmatprep.subr.bf16.mxu1 %v3145_v62  ;;  %v3067_v57 = vld [vmem:[#allocation3 + $0x680] sm:$0xff]  ;;  %v3292_v62 = vld [vmem:[#allocation3 + $0xd88] sm:$0xff] }
 0x85c   :  { %4873 = vmatmul.mubr.f32.vlgmr.msra.gmra.mrb[8].mxu0 %v8507_v54  ;;  %5227 = vmatmul.mubr.f32.vlgmr.msra.gmra.mrb[14].mxu1 %v8509_v56  ;;  %v3103_v54 = vld [vmem:[#allocation3 + $0x7a0] sm:$0xff] }
 0x85d   :  { %6969 = vmatpush1.bf16.msra.mxu0 %v2975_v1  ;;  %7225 = vmatpush3.bf16.msra.mxu1 %v3089_v2  ;;  %v3066_v1 = vld [vmem:[#allocation3 + $0x678] sm:$0xff]  ;;  %v3236_v2 = vld [vmem:[#allocation3 + $0xbc8] sm:$0xff] }
 0x85e   :  { %6971 = vmatprep.subr.bf16.mxu0 %v2983_v58  ;;  %7227 = vmatprep.subr.bf16.mxu1 %v3152_v46  ;;  %v3074_v58 = vld [vmem:[#allocation3 + $0x6b8] sm:$0xff]  ;;  %v3299_v46 = vld [vmem:[#allocation3 + $0xdc0] sm:$0xff] }
 0x85f   :  { %4943 = vmatprep.mubr.f32.mxu0 %v8513_v12  ;;  %5296 = vmatprep.mubr.f32.mxu1 %v8555_v22  ;;  %v3003_v12 = vld [vmem:[#allocation3 + $0x480] sm:$0xff] }
 0x861   :  { %6973 = vmatpush1.bf16.msra.mxu0 %v2982_v4  ;;  %7229 = vmatpush3.bf16.msra.mxu1 %v3096_v5  ;;  %v3073_v4 = vld [vmem:[#allocation3 + $0x6b0] sm:$0xff]  ;;  %v3243_v5 = vld [vmem:[#allocation3 + $0xc00] sm:$0xff] }
 0x862   :  { %6975 = vmatprep.subr.bf16.mxu0 %v2990_v6  ;;  %7231 = vmatprep.subr.bf16.mxu1 %v3159_v10  ;;  %v3081_v6 = vld [vmem:[#allocation3 + $0x6f0] sm:$0xff]  ;;  %v3306_v10 = vld [vmem:[#allocation3 + $0xdf8] sm:$0xff] }
 0x865   :  { %6977 = vmatpush1.bf16.msra.mxu0 %v2989_v11  ;;  %7233 = vmatpush3.bf16.msra.mxu1 %v3103_v54  ;;  %v3080_v11 = vld [vmem:[#allocation3 + $0x6e8] sm:$0xff]  ;;  %v3250_v54 = vld [vmem:[#allocation3 + $0xc38] sm:$0xff] }
 0x866   :  { %6979 = vmatprep.subr.bf16.mxu0 %v2997_v47  ;;  %7235 = vmatprep.subr.bf16.mxu1 %v3166_v49  ;;  %v3088_v47 = vld [vmem:[#allocation3 + $0x728] sm:$0xff]  ;;  %v3087_v49 = vld [vmem:[#allocation3 + $0x720] sm:$0xff] }
 0x869   :  { %6981 = vmatpush1.bf16.msra.mxu0 %v2996_v14  ;;  %7237 = vmatpush3.bf16.msra.mxu1 %v3110_v15  ;;  %v3095_v14 = vld [vmem:[#allocation3 + $0x760] sm:$0xff]  ;;  %v3094_v15 = vld [vmem:[#allocation3 + $0x758] sm:$0xff] }
 0x86a   :  { %6983 = vmatprep.subr.bf16.mxu0 %v3004_v50  ;;  %7239 = vmatprep.subr.bf16.mxu1 %v3173_v7  ;;  %v3102_v50 = vld [vmem:[#allocation3 + $0x798] sm:$0xff]  ;;  %v3101_v7 = vld [vmem:[#allocation3 + $0x790] sm:$0xff] }
 0x86d   :  { %6985 = vmatpush1.bf16.msra.mxu0 %v3003_v12  ;;  %7241 = vmatpush3.bf16.msra.mxu1 %v3117_v8  ;;  %v3109_v12 = vld [vmem:[#allocation3 + $0x7d0] sm:$0xff]  ;;  %v3108_v8 = vld [vmem:[#allocation3 + $0x7c8] sm:$0xff] }
 0x86e   :  { %6987 = vmatprep.subr.bf16.mxu0 %v3011_v9  ;;  %7243 = vmatprep.subr.bf16.mxu1 %v3180_v61  ;;  %v3116_v9 = vld [vmem:[#allocation3 + $0x808] sm:$0xff]  ;;  %v3115_v61 = vld [vmem:[#allocation3 + $0x800] sm:$0xff] }
 0x871   :  { %6989 = vmatpush1.bf16.msra.mxu0 %v3010_v29  ;;  %7245 = vmatpush3.bf16.msra.mxu1 %v3124_v17  ;;  %v3122_v29 = vld [vmem:[#allocation3 + $0x838] sm:$0xff] }
 0x872   :  { %6991 = vmatprep.subr.bf16.mxu0 %v3018_v19  ;;  %7247 = vmatprep.subr.bf16.mxu1 %v3187_v3  ;;  %v3130_v17 = vld [vmem:[#allocation3 + $0x878] sm:$0xff]  ;;  %v3137_v19 = vld [vmem:[#allocation3 + $0x8b0] sm:$0xff]  ;;  %v3136_v3 = vld [vmem:[#allocation3 + $0x8a8] sm:$0xff] }
 0x875   :  { %6993 = vmatpush1.bf16.msra.mxu0 %v3017_v21  ;;  %7249 = vmatpush3.bf16.msra.mxu1 %v3131_v24  ;;  %v3144_v21 = vld [vmem:[#allocation3 + $0x8e8] sm:$0xff]  ;;  %v3143_v24 = vld [vmem:[#allocation3 + $0x8e0] sm:$0xff] }
 0x876   :  { %6995 = vmatprep.subr.bf16.mxu0 %v3025_v25  ;;  %7251 = vmatprep.subr.bf16.mxu1 %v3194_v51  ;;  %v3151_v25 = vld [vmem:[#allocation3 + $0x920] sm:$0xff]  ;;  %v3150_v51 = vld [vmem:[#allocation3 + $0x918] sm:$0xff] }
 0x879   :  { %6997 = vmatpush1.bf16.msra.mxu0 %v3024_v26  ;;  %7253 = vmatpush3.bf16.msra.mxu1 %v3138_v27  ;;  %v3158_v26 = vld [vmem:[#allocation3 + $0x958] sm:$0xff]  ;;  %v3157_v27 = vld [vmem:[#allocation3 + $0x950] sm:$0xff] }
 0x87a   :  { %6999 = vmatprep.subr.bf16.mxu0 %v3032_v28  ;;  %7255 = vmatprep.subr.bf16.mxu1 %v3257_v35  ;;  %v3165_v28 = vld [vmem:[#allocation3 + $0x990] sm:$0xff]  ;;  %v3164_v35 = vld [vmem:[#allocation3 + $0x988] sm:$0xff] }
 0x87c   :  { %5297 = vmatmul.mubr.f32.vlgmr.msra.gmra.mrb[16].mxu1 %v8551_v48 }
 0x87d   :  { %7001 = vmatpush1.bf16.msra.mxu0 %v3031_v36  ;;  %7257 = vmatpush3.bf16.msra.mxu1 %v3201_v37  ;;  %v3172_v36 = vld [vmem:[#allocation3 + $0x9c8] sm:$0xff]  ;;  %v3171_v37 = vld [vmem:[#allocation3 + $0x9c0] sm:$0xff] }
 0x87e   :  { %7003 = vmatprep.subr.bf16.mxu0 %v3039_v31  ;;  %7259 = vmatprep.subr.bf16.mxu1 %v3264_v38  ;;  %v3179_v31 = vld [vmem:[#allocation3 + $0xa00] sm:$0xff]  ;;  %v3178_v38 = vld [vmem:[#allocation3 + $0x9f8] sm:$0xff] }
 0x87f   :  { %5366 = vmatprep.mubr.f32.mxu1 %v8557_v23 }
 0x881   :  { %7005 = vmatpush1.bf16.msra.mxu0 %v3038_v39  ;;  %7261 = vmatpush3.bf16.msra.mxu1 %v3208_v40  ;;  %v3186_v39 = vld [vmem:[#allocation3 + $0xa38] sm:$0xff]  ;;  %v3185_v40 = vld [vmem:[#allocation3 + $0xa30] sm:$0xff] }
 0x882   :  { %7007 = vmatprep.subr.bf16.mxu0 %v3046_v41  ;;  %7263 = vmatprep.subr.bf16.mxu1 %v3271_v42  ;;  %v3193_v41 = vld [vmem:[#allocation3 + $0xa70] sm:$0xff]  ;;  %v3192_v42 = vld [vmem:[#allocation3 + $0xa68] sm:$0xff] }
 0x885   :  { %7009 = vmatpush1.bf16.msra.mxu0 %v3045_v43  ;;  %7265 = vmatpush3.bf16.msra.mxu1 %v3215_v33  ;;  %v3200_v43 = vld [vmem:[#allocation3 + $0xaa8] sm:$0xff]  ;;  %v3199_v33 = vld [vmem:[#allocation3 + $0xaa0] sm:$0xff] }
 0x886   :  { %7011 = vmatprep.subr.bf16.mxu0 %v3053_v44  ;;  %7267 = vmatprep.subr.bf16.mxu1 %v3278_v45  ;;  %v3207_v44 = vld [vmem:[#allocation3 + $0xae0] sm:$0xff]  ;;  %v3206_v45 = vld [vmem:[#allocation3 + $0xad8] sm:$0xff] }
 0x889   :  { %7013 = vmatpush1.bf16.msra.mxu0 %v3052_v52  ;;  %7269 = vmatpush3.bf16.msra.mxu1 %v3222_v53  ;;  %v3214_v52 = vld [vmem:[#allocation3 + $0xb18] sm:$0xff]  ;;  %v3213_v53 = vld [vmem:[#allocation3 + $0xb10] sm:$0xff] }
 0x88a   :  { %7015 = vmatprep.subr.bf16.mxu0 %v3060_v18  ;;  %7271 = vmatprep.subr.bf16.mxu1 %v3285_v55  ;;  %v3221_v18 = vld [vmem:[#allocation3 + $0xb50] sm:$0xff]  ;;  %v3220_v55 = vld [vmem:[#allocation3 + $0xb48] sm:$0xff] }
 0x88d   :  { %7017 = vmatpush1.bf16.msra.mxu0 %v3059_v34  ;;  %7273 = vmatpush3.bf16.msra.mxu1 %v3229_v16  ;;  %v3228_v34 = vld [vmem:[#allocation3 + $0xb88] sm:$0xff]  ;;  %v8590_v16 = vld [vmem:[#allocation28] sm:$0xff] }
 0x88e   :  { %7019 = vmatprep.subr.bf16.mxu0 %v3067_v57  ;;  %7275 = vmatprep.subr.bf16.mxu1 %v3292_v62  ;;  %v3227_v57 = vld [vmem:[#allocation3 + $0xb80] sm:$0xff]  ;;  %v4216_v62 = vrot.slane %v8590_v16, %v8436_v63 }
 0x891   :  { %7021 = vmatpush1.bf16.msra.mxu0 %v3066_v1  ;;  %7277 = vmatpush3.bf16.msra.mxu1 %v3236_v2  ;;  %v4212_v1 = vrot.slane %v8590_v16, %v8405_v32  ;;  %v4220_v2 = vrot.slane %v8590_v16, %v8439_v0  ;;  %v3248_v0 = vld [vmem:[#allocation3 + $0xc28] sm:$0xff] }
 0x892   :  { %7023 = vmatprep.subr.bf16.mxu0 %v3074_v58  ;;  %7279 = vmatprep.subr.bf16.mxu1 %v3299_v46  ;;  %v3234_v58 = vld [vmem:[#allocation3 + $0xbb8] sm:$0xff] }
 0x895   :  { %7025 = vmatpush1.bf16.msra.mxu0 %v3073_v4  ;;  %7281 = vmatpush3.bf16.msra.mxu1 %v3243_v5  ;;  %v3242_v5 = vld [vmem:[#allocation3 + $0xbf8] sm:$0xff] }
 0x896   :  { %7027 = vmatprep.subr.bf16.mxu0 %v3081_v6  ;;  %7283 = vmatprep.subr.bf16.mxu1 %v3306_v10 }
 0x899   :  { %7029 = vmatpush1.bf16.msra.mxu0 %v3080_v11  ;;  %7285 = vmatpush3.bf16.msra.mxu1 %v3250_v54 }
 0x89a   :  { %7031 = vmatprep.subr.bf16.mxu0 %v3088_v47 }
 0x89c   :  { %4944 = vmatmul.mubr.f32.vlgmr.msra.gmra.mrb[8].mxu0 %v8509_v56  ;;  %5367 = vmatmul.mubr.f32.vlgmr.msra.gmra.mrb[18].mxu1 %v8553_v20  ;;  %v3123_v56 = vld [vmem:[#allocation3 + $0x840] sm:$0xff] }
 0x89d   :  { %7033 = vmatpush1.bf16.msra.mxu0 %v3087_v49  ;;  %5014 = vmatprep.mubr.f32.mxu0 %v8555_v22  ;;  %v3129_v22 = vld [vmem:[#allocation3 + $0x870] sm:$0xff] }
 0x89e   :  { %7035 = vmatprep.subr.bf16.mxu0 %v3095_v14  ;;  %v3241_v14 = vld [vmem:[#allocation3 + $0xbf0] sm:$0xff] }
 0x8a1   :  { %7037 = vmatpush1.bf16.msra.mxu0 %v3094_v15 }
 0x8a2   :  { %7039 = vmatprep.subr.bf16.mxu0 %v3102_v50  ;;  %v3249_v50 = vld [vmem:[#allocation3 + $0xc30] sm:$0xff] }
 0x8a5   :  { %7041 = vmatpush1.bf16.msra.mxu0 %v3101_v7  ;;  %v3256_v7 = vld [vmem:[#allocation3 + $0xc68] sm:$0xff] }
 0x8a6   :  { %7043 = vmatprep.subr.bf16.mxu0 %v3109_v12  ;;  %v3255_v12 = vld [vmem:[#allocation3 + $0xc60] sm:$0xff] }
 0x8a9   :  { %7045 = vmatpush1.bf16.msra.mxu0 %v3108_v8  ;;  %v3263_v8 = vld [vmem:[#allocation3 + $0xca0] sm:$0xff] }
 0x8aa   :  { %7047 = vmatprep.subr.bf16.mxu0 %v3116_v9 }
 0x8ad   :  { %7049 = vmatpush1.bf16.msra.mxu0 %v3115_v61  ;;  %v3262_v61 = vld [vmem:[#allocation3 + $0xc98] sm:$0xff] }
 0x8ae   :  { %7051 = vmatprep.subr.bf16.mxu0 %v3123_v56 }
 0x8b1   :  { %7053 = vmatpush1.bf16.msra.mxu0 %v3122_v29 }
 0x8b2   :  { %7055 = vmatprep.subr.bf16.mxu0 %v3130_v17  ;;  %v3270_v17 = vld [vmem:[#allocation3 + $0xcd8] sm:$0xff] }
 0x8b5   :  { %7057 = vmatpush1.bf16.msra.mxu0 %v3129_v22 }
 0x8b6   :  { %7059 = vmatprep.subr.bf16.mxu0 %v3137_v19 }
 0x8b9   :  { %7061 = vmatpush1.bf16.msra.mxu0 %v3136_v3 }
 0x8ba   :  { %7063 = vmatprep.subr.bf16.mxu0 %v3144_v21 }
 0x8bd   :  { %7065 = vmatpush1.bf16.msra.mxu0 %v3143_v24 }
 0x8be   :  { %7067 = vmatprep.subr.bf16.mxu0 %v3151_v25  ;;  %v3269_v25 = vld [vmem:[#allocation3 + $0xcd0] sm:$0xff] }
 0x8c1   :  { %7069 = vmatpush1.bf16.msra.mxu0 %v3150_v51  ;;  %v3277_v51 = vld [vmem:[#allocation3 + $0xd10] sm:$0xff] }
 0x8c2   :  { %7071 = vmatprep.subr.bf16.mxu0 %v3158_v26  ;;  %v3276_v26 = vld [vmem:[#allocation3 + $0xd08] sm:$0xff] }
 0x8c5   :  { %7073 = vmatpush1.bf16.msra.mxu0 %v3157_v27  ;;  %v3284_v27 = vld [vmem:[#allocation3 + $0xd48] sm:$0xff] }
 0x8c6   :  { %7075 = vmatprep.subr.bf16.mxu0 %v3165_v28  ;;  %v3283_v28 = vld [vmem:[#allocation3 + $0xd40] sm:$0xff] }
 0x8c9   :  { %7077 = vmatpush1.bf16.msra.mxu0 %v3164_v35 }
 0x8ca   :  { %7079 = vmatprep.subr.bf16.mxu0 %v3172_v36  ;;  %v3291_v36 = vld [vmem:[#allocation3 + $0xd80] sm:$0xff] }
 0x8cd   :  { %7081 = vmatpush1.bf16.msra.mxu0 %v3171_v37 }
 0x8ce   :  { %7083 = vmatprep.subr.bf16.mxu0 %v3179_v31 }
 0x8d1   :  { %7085 = vmatpush1.bf16.msra.mxu0 %v3178_v38 }
 0x8d2   :  { %7087 = vmatprep.subr.bf16.mxu0 %v3186_v39  ;;  %v3290_v39 = vld [vmem:[#allocation3 + $0xd78] sm:$0xff] }
 0x8d5   :  { %7089 = vmatpush1.bf16.msra.mxu0 %v3185_v40  ;;  %v3298_v40 = vld [vmem:[#allocation3 + $0xdb8] sm:$0xff] }
 0x8d6   :  { %7091 = vmatprep.subr.bf16.mxu0 %v3193_v41 }
 0x8d9   :  { %7093 = vmatpush1.bf16.msra.mxu0 %v3192_v42 }
 0x8da   :  { %7095 = vmatprep.subr.bf16.mxu0 %v3200_v43 }
 0x8dc   :  { %5015 = vmatmul.mubr.f32.vlgmr.msra.gmra.mrb[8].mxu0 %v8551_v48  ;;  %v3235_v48 = vld [vmem:[#allocation3 + $0xbc0] sm:$0xff] }
 0x8dd   :  { %7097 = vmatpush1.bf16.msra.mxu0 %v3199_v33  ;;  %5085 = vmatprep.mubr.f32.mxu0 %v8557_v23  ;;  %v4208_v23 = vrot.slane %v8590_v16, %v8402_v30  ;;  %v3297_v33 = vld [vmem:[#allocation3 + $0xdb0] sm:$0xff] }
 0x8de   :  { %7099 = vmatprep.subr.bf16.mxu0 %v3207_v44  ;;  %v3305_v44 = vld [vmem:[#allocation3 + $0xdf0] sm:$0xff] }
 0x8e1   :  { %7101 = vmatpush1.bf16.msra.mxu0 %v3206_v45  ;;  %v3304_v45 = vld [vmem:[#allocation3 + $0xde8] sm:$0xff] }
 0x8e2   :  { %7103 = vmatprep.subr.bf16.mxu0 %v3214_v52  ;;  %v4232_v52 = vrot.slane %v8590_v16, %v8519_v60  ;;  %v4224_v60 = vrot.slane %v8590_v16, %v8516_v59 }
 0x8e5   :  { %7105 = vmatpush1.bf16.msra.mxu0 %v3213_v53 }
 0x8e6   :  { %7107 = vmatprep.subr.bf16.mxu0 %v3221_v18 }
 0x8e9   :  { %7109 = vmatpush1.bf16.msra.mxu0 %v3220_v55 }
 0x8ea   :  { %7111 = vmatprep.subr.bf16.mxu0 %v3228_v34 }
 0x8ed   :  { %7113 = vmatpush1.bf16.msra.mxu0 %v3227_v57 }
 0x8ee   :  { %7115 = vmatprep.subr.bf16.mxu0 %v3235_v48 }
 0x8ef   :  { %v4519_v46 = vpop.f32.mrb[6].mxu0  ;;  %v4803_v4 = vpop.f32.mrb[10].mxu1 }
 0x8f0   :  { %v7294_v6 = vadd.f32 %v4519_v46, %v4208_v23  ;;  %v7296_v10 = vadd.f32 %v4803_v4, %v4216_v62  ;;  %v4521_v11 = vpop.f32.mrb[7].mxu0  ;;  %v4805_v54 = vpop.f32.mrb[11].mxu1 }
 0x8f1   :  { %v7295_v30 = vadd.f32 %v4521_v11, %v4212_v1  ;;  %v7297_v47 = vadd.f32 %v4805_v54, %v4220_v2  ;;  %7117 = vmatpush1.bf16.msra.mxu0 %v3234_v58  ;;  %v4228_v11 = vrot.slane %v8590_v16, %v8522_v13 }
 0x8f2   :  { %v5454_v63 = vmul.f32 -1.442695, %v7294_v6  ;;  %v5456_v49 = vmul.f32 -1.442695, %v7296_v10  ;;  %7119 = vmatprep.subr.bf16.mxu0 %v3242_v5 }
 0x8f3   :  { %v5455_v32 = vmul.f32 -1.442695, %v7295_v30  ;;  %v5457_v15 = vmul.f32 -1.442695, %v7297_v47 }
 0x8f4   :  { %7623 = vpow2.f32 %v5454_v63 }
 0x8f5   :  { %7625 = vpow2.f32 %v5456_v49  ;;  %7121 = vmatpush1.bf16.msra.mxu0 %v3241_v14 }
 0x8f6   :  { %7627 = vpow2.f32 %v5455_v32  ;;  %7123 = vmatprep.subr.bf16.mxu0 %v3249_v50 }
 0x8f7   :  { %7629 = vpow2.f32 %v5457_v15 }
 0x8f9   :  { %7125 = vmatpush1.bf16.msra.mxu0 %v3248_v0 }
 0x8fa   :  { %7127 = vmatprep.subr.bf16.mxu0 %v3256_v7 }
 0x8fd   :  { %7129 = vmatpush1.bf16.msra.mxu0 %v3255_v12 }
 0x8fe   :  { %v7624_v9 = vpop.eup %7623  ;;  %7131 = vmatprep.subr.bf16.mxu0 %v3263_v8 }
 0x8ff   :  { %v7626_v56 = vpop.eup %7625  ;;  %v5393_v29 = vadd.f32 1.0, %v7624_v9 }
 0x900   :  { %v7628_v22 = vpop.eup %7627  ;;  %v5395_v19 = vadd.f32 1.0, %v7626_v56 }
 0x901   :  { %v7630_v3 = vpop.eup %7629  ;;  %7631 = vrcp.f32 %v5393_v29  ;;  %v5394_v21 = vadd.f32 1.0, %v7628_v22  ;;  %7133 = vmatpush1.bf16.msra.mxu0 %v3262_v61 }
 0x902   :  { %7633 = vrcp.f32 %v5395_v19  ;;  %v5396_v24 = vadd.f32 1.0, %v7630_v3  ;;  %7135 = vmatprep.subr.bf16.mxu0 %v3270_v17 }
 0x903   :  { %7635 = vrcp.f32 %v5394_v21 }
 0x904   :  { %7637 = vrcp.f32 %v5396_v24 }
 0x905   :  { %7137 = vmatpush1.bf16.msra.mxu0 %v3269_v25 }
 0x906   :  { %7139 = vmatprep.subr.bf16.mxu0 %v3277_v51 }
 0x909   :  { %7141 = vmatpush1.bf16.msra.mxu0 %v3276_v26 }
 0x90a   :  { %7143 = vmatprep.subr.bf16.mxu0 %v3284_v27 }
 0x90b   :  { %v7632_v35 = vpop.eup %7631 }
 0x90c   :  { %v7634_v37 = vpop.eup %7633  ;;  %5414 = vst [vmem:[%s8647_s19] sm:$0xff] %v7632_v35 }
 0x90d   :  { %v7636_v31 = vpop.eup %7635  ;;  %5416 = vst [vmem:[%s8647_s19 + $0x10] sm:$0xff] %v7634_v37  ;;  %7145 = vmatpush1.bf16.msra.mxu0 %v3283_v28 }
 0x90e   :  { %v7638_v38 = vpop.eup %7637  ;;  %5415 = vst [vmem:[%s8647_s19 + $0x8] sm:$0xff] %v7636_v31  ;;  %7147 = vmatprep.subr.bf16.mxu0 %v3291_v36 }
 0x90f   :  { %5417 = vst [vmem:[%s8647_s19 + $0x18] sm:$0xff] %v7638_v38  ;;  %v5551_v41 = vpop.f32.mrb[12].mxu1 }
 0x910   :  { %v5552_v42 = vpop.f32.mrb[13].mxu1 }
 0x911   :  { %7149 = vmatpush1.bf16.msra.mxu0 %v3290_v39  ;;  %v5553_v43 = vadd.f32 %v5552_v42, %v5551_v41 }
 0x912   :  { %7151 = vmatprep.subr.bf16.mxu0 %v3298_v40 }
 0x913   :  { %v5159_v53 = vadd.f32 %v5553_v43, %v4232_v52 }
 0x915   :  { %7153 = vmatpush1.bf16.msra.mxu0 %v3297_v33 }
 0x916   :  { %7155 = vmatprep.subr.bf16.mxu0 %v3305_v44 }
 0x919   :  { %7157 = vmatpush1.bf16.msra.mxu0 %v3304_v45 }
 0x91c   :  { %5086 = vmatmul.mubr.f32.vlgmr.msra.gmra.mrb[8].mxu0 %v8553_v20 }
 0x92f   :  { %v5586_v18 = vpop.f32.mrb[14].mxu1 }
 0x930   :  { %v5587_v55 = vpop.f32.mrb[15].mxu1 }
 0x931   :  { %v5588_v34 = vadd.f32 %v5587_v55, %v5586_v18 }
 0x933   :  { %v5229_v57 = vadd.f32 %v5588_v34, %v5159_v53 }
 0x94f   :  { %v5621_v48 = vpop.f32.mrb[16].mxu1 }
 0x950   :  { %v5622_v23 = vpop.f32.mrb[17].mxu1 }
 0x951   :  { %v5623_v62 = vadd.f32 %v5622_v23, %v5621_v48 }
 0x953   :  { %v5299_v1 = vadd.f32 %v5623_v62, %v5229_v57 }
 0x96f   :  { %v5656_v2 = vpop.f32.mrb[18].mxu1 }
 0x970   :  { %v5657_v58 = vpop.f32.mrb[19].mxu1 }
 0x971   :  { %v5658_v46 = vadd.f32 %v5657_v58, %v5656_v2 }
 0x973   :  { %v5369_v4 = vadd.f32 %v5658_v46, %v5299_v1 }
 0x975   :  { %v5460_v5 = vmul.f32 -1.442695, %v5369_v4 }
 0x977   :  { %7639 = vpow2.f32 %v5460_v5 }
 0x981   :  { %v7640_v6 = vpop.eup %7639 }
 0x982   :  { %v5399_v20 = vadd.f32 1.0, %v7640_v6 }
 0x984   :  { %7641 = vrcp.f32 %v5399_v20 }
 0x98e   :  { %v7642_v10 = vpop.eup %7641 }
 0x98f   :  { %5420 = vst [vmem:[%s8647_s19 + $0x30] sm:$0xff] %v7642_v10 }
 0x9ef   :  { %v5087_v54 = vpop.f32.mrb[8].mxu0 }
 0x9f0   :  { %v7298_v30 = vadd.f32 %v5087_v54, %v4224_v60  ;;  %v5089_v47 = vpop.f32.mrb[9].mxu0 }
 0x9f1   :  { %v7299_v63 = vadd.f32 %v5089_v47, %v4228_v11 }
 0x9f2   :  { %v5458_v49 = vmul.f32 -1.442695, %v7298_v30 }
 0x9f3   :  { %v5459_v14 = vmul.f32 -1.442695, %v7299_v63 }
 0x9f4   :  { %7643 = vpow2.f32 %v5458_v49 }
 0x9f5   :  { %7645 = vpow2.f32 %v5459_v14 }
 0x9fe   :  { %v7644_v32 = vpop.eup %7643 }
 0x9ff   :  { %v7646_v15 = vpop.eup %7645  ;;  %v5397_v50 = vadd.f32 1.0, %v7644_v32 }
 0xa00   :  { %v5398_v0 = vadd.f32 1.0, %v7646_v15 }
 0xa01   :  { %7647 = vrcp.f32 %v5397_v50 }
 0xa02   :  { %7649 = vrcp.f32 %v5398_v0 }
 0xa0b   :  { %v7648_v7 = vpop.eup %7647 }
 0xa0c   :  { %v7650_v12 = vpop.eup %7649  ;;  %5418 = vst [vmem:[%s8647_s19 + $0x20] sm:$0xff] %v7648_v7 }
 0xa0d   :  { %5419 = vst [vmem:[%s8647_s19 + $0x28] sm:$0xff] %v7650_v12 }
 0xa0e   :  { %5425 = vsyncpa [#allocation6], 1 }
 0xa0f   :  { %5426 = vsyncpa [#allocation8], 1 }
 0xa10   :  { %5427 = vsyncpa [#allocation11], 1 }
 0xa11   :  { %5428 = vsyncpa [#allocation14], 1 }
 0xa12   :  { %5429 = vsyncpa [#allocation17], 1 }
 0xa13   :  { %5430 = vsyncpa [#allocation20], 1 }
 0xa14   :  { %5431 = vsyncpa [#allocation23], 1 }
 0xa15   :  { %5432 = vsyncpa [#allocation26], 1 }
 0xa16   :  { %5433 = vsyncpa [#allocation29], 1 }
 0xa17   :  { %5434 = vsyncmov [#allocation4] }
 0xa1a   :  { %s5435_s0 = vpop.sfrf %5434 }
 0xa1b   :  { %p5461_p2 = scmp.ne.s32.totalorder %s5435_s0, 0 }
 0xa1d   :  { %5439 = shalt.err (%p5461_p2)  }
 0xa1e   :  { %5441 = vsyncmov [#allocation4 + $0x1] }
 0xa21   :  { %s5442_s30 = vpop.sfrf %5441 }
 0xa22   :  { %p5462_p3 = scmp.ne.s32.totalorder %s5442_s30, 0 }
 0xa24   :  { %5446 = shalt.err (%p5462_p3)  }

</bundles_post_ra>
